<compile_context>
chip_gen: v6e
topology: v6e:2x2x1
jax: 0.10.0
libtpu: 0.0.40
codegen_flags: <defaults>
</compile_context>

<pallas_src>
import jax
import jax.numpy as jnp
from jax.experimental import pallas as pl
from jax.experimental.pallas import tpu as pltpu

# Real (PyTorch) layer sizes.
REAL_DIMS = [("L1", 42, 200), ("L2", 200, 300), ("L3", 300, 100),
             ("L4", 100, 100), ("final", 100, 7)]
# Device-side (lane-padded) sizes.  L1's input dim stays at the true 42 so no
# 128-lane padded activation copy is ever materialized in HBM.
PAD_IN = {"L1": 42, "L2": 256, "L3": 384, "L4": 128, "final": 128}
PAD_OUT = {"L1": 256, "L2": 384, "L3": 128, "L4": 128, "final": 128}

D_IN = 42          # real board vector width
D_OUT_PAD = 128    # padded logits width (7 real)
N_ACTIONS = 7
MAX_M_TILE = 512   # max batch-tile rows per grid step

_LAYER_NAMES = ("L1", "L2", "L3", "L4", "final")


def _mlp_softmax_kernel(x_ref,
                        w1_ref, b1_ref, w2_ref, b2_ref, w3_ref, b3_ref,
                        w4_ref, b4_ref, w5_ref, b5_ref, out_ref):
    # bf16 matmul operands -> f32 MXU accumulation; elementwise math in f32
    # (v5e's VPU/EUP have no bf16 path).
    def layer(h_bf16, w_ref, b_ref):
        acc = jnp.dot(h_bf16, w_ref[...], preferred_element_type=jnp.float32)
        return jnp.maximum(acc + b_ref[...], 0.0)

    h = layer(x_ref[...], w1_ref, b1_ref)              # K=42 matmul
    h = layer(h.astype(jnp.bfloat16), w2_ref, b2_ref)
    h = layer(h.astype(jnp.bfloat16), w3_ref, b3_ref)
    h = layer(h.astype(jnp.bfloat16), w4_ref, b4_ref)

    logits = jnp.dot(h.astype(jnp.bfloat16), w5_ref[...],
                     preferred_element_type=jnp.float32) + b5_ref[...]

    # Softmax only over the 7 real logits: padded lanes -> -inf (exp == 0).
    lane = jax.lax.broadcasted_iota(jnp.int32, logits.shape, 1)
    logits = jnp.where(lane < N_ACTIONS, logits, -jnp.inf)

    m = jnp.max(logits, axis=-1, keepdims=True)
    e = jnp.exp(logits - m)
    s = jnp.sum(e, axis=-1, keepdims=True)
    probs = e * pl.reciprocal(s, approx=True)          # EUP slot (nearly free)
    out_ref[...] = probs.astype(out_ref.dtype)         # bf16 writeback


def _choose_tile(batch):
    """Batch tile (multiple of 128, <= MAX_M_TILE) and padded batch size.

    Keeps the grid length >= 2 whenever the batch allows it, so both v7x
    TensorCores are used under dimension_semantics=("parallel",).
    """
    b128 = -(-batch // 128) * 128
    if b128 <= 128:
        # TODO(synk): a dedicated tiny-tile (e.g. 16-row) variant would cut
        # wasted work ~8x for the per-step RL action-selection path.
        return 128, 128
    tile = max(128, min(MAX_M_TILE, (b128 // 2) // 128 * 128))
    b_padded = -(-b128 // tile) * tile
    return tile, b_padded


@jax.jit
def direct_policy_agent_forward(x, packed):
    """x: (B, 42) or (42,) board(s); packed: dict name -> (w_pad bf16, b_pad f32).
    Returns softmax probabilities of shape (B, 7) (or (7,) for one board)."""
    squeeze = (x.ndim == 1)
    xb = x.reshape(-1, D_IN)
    b = xb.shape[0]
    m_tile, b_padded = _choose_tile(b)

    x_bf16 = xb.astype(jnp.bfloat16)
    if b != b_padded:  # row-pad only; no lane padding on the host
        x_bf16 = jnp.zeros((b_padded, D_IN), jnp.bfloat16).at[:b].set(x_bf16)

    in_specs = [pl.BlockSpec((m_tile, D_IN), lambda i: (i, 0))]
    args = [x_bf16]
    for name in _LAYER_NAMES:
        w_pad, bias_pad = packed[name]
        # Constant index_map -> weights/biases stay resident in VMEM.
        in_specs.append(pl.BlockSpec((PAD_IN[name], PAD_OUT[name]),
                                     lambda i: (0, 0)))
        in_specs.append(pl.BlockSpec((1, PAD_OUT[name]), lambda i: (0, 0)))
        args.append(w_pad)
        args.append(bias_pad)

    out = pl.pallas_call(
        _mlp_softmax_kernel,
        out_shape=jax.ShapeDtypeStruct((b_padded, D_OUT_PAD), jnp.bfloat16),
        grid=(b_padded // m_tile,),
        in_specs=in_specs,
        out_specs=pl.BlockSpec((m_tile, D_OUT_PAD), lambda i: (i, 0)),
        compiler_params=pltpu.CompilerParams(
            dimension_semantics=("parallel",),
            vmem_limit_bytes=32 * 1024 * 1024),
    )(*args)

    probs = out[:b, :N_ACTIONS].astype(jnp.float32)
    return probs[0] if squeeze else probs


def init_params(key):
    """Deterministic init mimicking nn.Linear default (uniform +/- 1/sqrt(fan_in)).
    Weights stored as (in, out), i.e. PyTorch weight.T."""
    params = {}
    for name, fan_in, fan_out in REAL_DIMS:
        key, kw, kb = jax.random.split(key, 3)
        bound = 1.0 / jnp.sqrt(jnp.float32(fan_in))
        w = jax.random.uniform(kw, (fan_in, fan_out), jnp.float32, -bound, bound)
        b = jax.random.uniform(kb, (fan_out,), jnp.float32, -bound, bound)
        params[name] = (w, b)
    return params


def pack_params(params):
    """Zero-pad to lane-friendly sizes and cast weights to bf16 (done once)."""
    packed = {}
    for name, fan_in, fan_out in REAL_DIMS:
        w, b = params[name]
        w_pad = jnp.zeros((PAD_IN[name], PAD_OUT[name]), jnp.bfloat16)
        w_pad = w_pad.at[:fan_in, :fan_out].set(w.astype(jnp.bfloat16))
        b_pad = jnp.zeros((1, PAD_OUT[name]), jnp.float32)
        b_pad = b_pad.at[0, :fan_out].set(b)
        packed[name] = (w_pad, b_pad)
    return packed


def reference_forward(x, params):
    """Mirrors the kernel math (bf16 matmul operands, f32 accumulation)."""
    h = x.reshape(-1, D_IN).astype(jnp.float32)
    for name in ("L1", "L2", "L3", "L4"):
        w, b = params[name]
        h = jnp.dot(h.astype(jnp.bfloat16), w.astype(jnp.bfloat16),
                    preferred_element_type=jnp.float32) + b
        h = jnp.maximum(h, 0.0)
    w, b = params["final"]
    logits = jnp.dot(h.astype(jnp.bfloat16), w.astype(jnp.bfloat16),
                     preferred_element_type=jnp.float32) + b
    return jax.nn.softmax(logits, axis=-1)


if __name__ == "__main__":
    key = jax.random.PRNGKey(0)
    key, kx = jax.random.split(key)
    params = init_params(key)
    packed = pack_params(params)

    # Connect-four style flattened boards (entries in {-1, 0, 1}).  1024 rows
    # -> tile 512 x grid 2 (both v7x TensorCores busy) yet still tiny data.
    batch = 1024
    x = jax.random.randint(kx, (batch, 42), -1, 2).astype(jnp.float32)

    probs = direct_policy_agent_forward(x, packed)
    probs = jax.block_until_ready(probs)

    ref = reference_forward(x, params)
    assert probs.shape == (batch, N_ACTIONS)
    assert jnp.allclose(probs, ref, atol=1e-2, rtol=1e-2)
    assert jnp.allclose(jnp.sum(probs, axis=-1), 1.0, atol=3e-2)

    # Single-board path (matches the torch module's (42,) -> (7,) usage).
    p1 = direct_policy_agent_forward(x[0], packed)
    p1 = jax.block_until_ready(p1)
    assert p1.shape == (N_ACTIONS,)
    assert jnp.allclose(p1, probs[0], atol=5e-3)

    # TODO(synk): select_action / calculate_rewards are host-side RL
    # bookkeeping (Categorical sampling, reward discounting) and are not
    # part of the device forward pass.
    print("KERNEL_OK")
</pallas_src>

<mosaic_0001>
module attributes {stable_mosaic.version = 11 : i64} {
  func.func @_mlp_softmax_kernel(%arg0: i32, %arg1: memref<512x42xbf16, #tpu.memory_space<vmem>>, %arg2: memref<42x256xbf16, #tpu.memory_space<vmem>>, %arg3: memref<1x256xf32, #tpu.memory_space<vmem>>, %arg4: memref<256x384xbf16, #tpu.memory_space<vmem>>, %arg5: memref<1x384xf32, #tpu.memory_space<vmem>>, %arg6: memref<384x128xbf16, #tpu.memory_space<vmem>>, %arg7: memref<1x128xf32, #tpu.memory_space<vmem>>, %arg8: memref<128x128xbf16, #tpu.memory_space<vmem>>, %arg9: memref<1x128xf32, #tpu.memory_space<vmem>>, %arg10: memref<128x128xbf16, #tpu.memory_space<vmem>>, %arg11: memref<1x128xf32, #tpu.memory_space<vmem>>, %arg12: memref<512x128xbf16, #tpu.memory_space<vmem>>) attributes {dimension_semantics = [#tpu.dimension_semantics<parallel>], iteration_bounds = array<i64: 2>, scalar_prefetch = 0 : i64, scratch_operands = 0 : i64, tpu.core_type = #tpu.core_type<tc>, window_params = [{transform_indices = @transform_0, window_bounds = array<i64: 512, 42>}, {pipeline_mode = #tpu.pipeline_mode<synchronous>, transform_indices = @transform_1, window_bounds = array<i64: 42, 256>}, {pipeline_mode = #tpu.pipeline_mode<synchronous>, transform_indices = @transform_2, window_bounds = array<i64: 1, 256>}, {pipeline_mode = #tpu.pipeline_mode<synchronous>, transform_indices = @transform_3, window_bounds = array<i64: 256, 384>}, {pipeline_mode = #tpu.pipeline_mode<synchronous>, transform_indices = @transform_4, window_bounds = array<i64: 1, 384>}, {pipeline_mode = #tpu.pipeline_mode<synchronous>, transform_indices = @transform_5, window_bounds = array<i64: 384, 128>}, {pipeline_mode = #tpu.pipeline_mode<synchronous>, transform_indices = @transform_6, window_bounds = array<i64: 1, 128>}, {pipeline_mode = #tpu.pipeline_mode<synchronous>, transform_indices = @transform_7, window_bounds = array<i64: 128, 128>}, {pipeline_mode = #tpu.pipeline_mode<synchronous>, transform_indices = @transform_8, window_bounds = array<i64: 1, 128>}, {pipeline_mode = #tpu.pipeline_mode<synchronous>, transform_indices = @transform_9, window_bounds = array<i64: 128, 128>}, {pipeline_mode = #tpu.pipeline_mode<synchronous>, transform_indices = @transform_10, window_bounds = array<i64: 1, 128>}, {transform_indices = @transform_11, window_bounds = array<i64: 512, 128>}]} {
    %c0 = arith.constant 0 : index
    %c0_0 = arith.constant 0 : index
    %0 = vector.load %arg1[%c0, %c0_0] : memref<512x42xbf16, #tpu.memory_space<vmem>>, vector<512x42xbf16>
    %c0_1 = arith.constant 0 : index
    %c0_2 = arith.constant 0 : index
    %1 = vector.load %arg2[%c0_1, %c0_2] : memref<42x256xbf16, #tpu.memory_space<vmem>>, vector<42x256xbf16>
    %cst = arith.constant dense<0.000000e+00> : vector<512x256xf32>
    %2 = tpu.matmul %0, %1, %cst {dimension_numbers = #tpu.dot_dimension_numbers<[1], [0], [0], [1], [0, 0, 1, 1], [], []>} : vector<512x42xbf16>, vector<42x256xbf16>, vector<512x256xf32> -> vector<512x256xf32>
    %c0_3 = arith.constant 0 : index
    %c0_4 = arith.constant 0 : index
    %3 = vector.load %arg3[%c0_3, %c0_4] : memref<1x256xf32, #tpu.memory_space<vmem>>, vector<1x256xf32>
    %4 = vector.broadcast %3 : vector<1x256xf32> to vector<512x256xf32>
    %5 = arith.addf %2, %4 : vector<512x256xf32>
    %cst_5 = arith.constant 0.000000e+00 : f32
    %6 = vector.broadcast %cst_5 : f32 to vector<512x256xf32>
    %7 = arith.maximumf %5, %6 : vector<512x256xf32>
    %8 = arith.truncf %7 : vector<512x256xf32> to vector<512x256xbf16>
    %c0_6 = arith.constant 0 : index
    %c0_7 = arith.constant 0 : index
    %9 = vector.load %arg4[%c0_6, %c0_7] : memref<256x384xbf16, #tpu.memory_space<vmem>>, vector<256x384xbf16>
    %cst_8 = arith.constant dense<0.000000e+00> : vector<512x384xf32>
    %10 = tpu.matmul %8, %9, %cst_8 {dimension_numbers = #tpu.dot_dimension_numbers<[1], [0], [0], [1], [0, 0, 1, 1], [], []>} : vector<512x256xbf16>, vector<256x384xbf16>, vector<512x384xf32> -> vector<512x384xf32>
    %c0_9 = arith.constant 0 : index
    %c0_10 = arith.constant 0 : index
    %11 = vector.load %arg5[%c0_9, %c0_10] : memref<1x384xf32, #tpu.memory_space<vmem>>, vector<1x384xf32>
    %12 = vector.broadcast %11 : vector<1x384xf32> to vector<512x384xf32>
    %13 = arith.addf %10, %12 : vector<512x384xf32>
    %cst_11 = arith.constant 0.000000e+00 : f32
    %14 = vector.broadcast %cst_11 : f32 to vector<512x384xf32>
    %15 = arith.maximumf %13, %14 : vector<512x384xf32>
    %16 = arith.truncf %15 : vector<512x384xf32> to vector<512x384xbf16>
    %c0_12 = arith.constant 0 : index
    %c0_13 = arith.constant 0 : index
    %17 = vector.load %arg6[%c0_12, %c0_13] : memref<384x128xbf16, #tpu.memory_space<vmem>>, vector<384x128xbf16>
    %cst_14 = arith.constant dense<0.000000e+00> : vector<512x128xf32>
    %18 = tpu.matmul %16, %17, %cst_14 {dimension_numbers = #tpu.dot_dimension_numbers<[1], [0], [0], [1], [0, 0, 1, 1], [], []>} : vector<512x384xbf16>, vector<384x128xbf16>, vector<512x128xf32> -> vector<512x128xf32>
    %c0_15 = arith.constant 0 : index
    %c0_16 = arith.constant 0 : index
    %19 = vector.load %arg7[%c0_15, %c0_16] : memref<1x128xf32, #tpu.memory_space<vmem>>, vector<1x128xf32>
    %20 = vector.broadcast %19 : vector<1x128xf32> to vector<512x128xf32>
    %21 = arith.addf %18, %20 : vector<512x128xf32>
    %cst_17 = arith.constant 0.000000e+00 : f32
    %22 = vector.broadcast %cst_17 : f32 to vector<512x128xf32>
    %23 = arith.maximumf %21, %22 : vector<512x128xf32>
    %24 = arith.truncf %23 : vector<512x128xf32> to vector<512x128xbf16>
    %c0_18 = arith.constant 0 : index
    %c0_19 = arith.constant 0 : index
    %25 = vector.load %arg8[%c0_18, %c0_19] : memref<128x128xbf16, #tpu.memory_space<vmem>>, vector<128x128xbf16>
    %cst_20 = arith.constant dense<0.000000e+00> : vector<512x128xf32>
    %26 = tpu.matmul %24, %25, %cst_20 {dimension_numbers = #tpu.dot_dimension_numbers<[1], [0], [0], [1], [0, 0, 1, 1], [], []>} : vector<512x128xbf16>, vector<128x128xbf16>, vector<512x128xf32> -> vector<512x128xf32>
    %c0_21 = arith.constant 0 : index
    %c0_22 = arith.constant 0 : index
    %27 = vector.load %arg9[%c0_21, %c0_22] : memref<1x128xf32, #tpu.memory_space<vmem>>, vector<1x128xf32>
    %28 = vector.broadcast %27 : vector<1x128xf32> to vector<512x128xf32>
    %29 = arith.addf %26, %28 : vector<512x128xf32>
    %cst_23 = arith.constant 0.000000e+00 : f32
    %30 = vector.broadcast %cst_23 : f32 to vector<512x128xf32>
    %31 = arith.maximumf %29, %30 : vector<512x128xf32>
    %32 = arith.truncf %31 : vector<512x128xf32> to vector<512x128xbf16>
    %c0_24 = arith.constant 0 : index
    %c0_25 = arith.constant 0 : index
    %33 = vector.load %arg10[%c0_24, %c0_25] : memref<128x128xbf16, #tpu.memory_space<vmem>>, vector<128x128xbf16>
    %cst_26 = arith.constant dense<0.000000e+00> : vector<512x128xf32>
    %34 = tpu.matmul %32, %33, %cst_26 {dimension_numbers = #tpu.dot_dimension_numbers<[1], [0], [0], [1], [0, 0, 1, 1], [], []>} : vector<512x128xbf16>, vector<128x128xbf16>, vector<512x128xf32> -> vector<512x128xf32>
    %c0_27 = arith.constant 0 : index
    %c0_28 = arith.constant 0 : index
    %35 = vector.load %arg11[%c0_27, %c0_28] : memref<1x128xf32, #tpu.memory_space<vmem>>, vector<1x128xf32>
    %36 = vector.broadcast %35 : vector<1x128xf32> to vector<512x128xf32>
    %37 = arith.addf %34, %36 : vector<512x128xf32>
    %38 = tpu.iota {dimensions = array<i32: 1>} : vector<512x128xi32>
    %c7_i32 = arith.constant 7 : i32
    %39 = vector.broadcast %c7_i32 : i32 to vector<512x128xi32>
    %40 = arith.cmpi slt, %38, %39 : vector<512x128xi32>
    %cst_29 = arith.constant 0xFF800000 : f32
    %41 = vector.broadcast %cst_29 : f32 to vector<512x128xf32>
    %42 = arith.select %40, %37, %41 : vector<512x128xi1>, vector<512x128xf32>
    %cst_30 = arith.constant dense<0xFF800000> : vector<512xf32>
    %43 = vector.multi_reduction <maximumf>, %42, %cst_30 [1] : vector<512x128xf32> to vector<512xf32>
    %44 = vector.shape_cast %43 : vector<512xf32> to vector<512x1xf32>
    %45 = vector.broadcast %44 : vector<512x1xf32> to vector<512x128xf32>
    %46 = arith.subf %42, %45 : vector<512x128xf32>
    %47 = math.exp %46 : vector<512x128xf32>
    %cst_31 = arith.constant dense<0.000000e+00> : vector<512xf32>
    %48 = vector.multi_reduction <add>, %47, %cst_31 [1] : vector<512x128xf32> to vector<512xf32>
    %49 = vector.shape_cast %48 : vector<512xf32> to vector<512x1xf32>
    %50 = tpu.reciprocal %49 {approx = true} : vector<512x1xf32> -> vector<512x1xf32>
    %51 = vector.broadcast %50 : vector<512x1xf32> to vector<512x128xf32>
    %52 = arith.mulf %47, %51 : vector<512x128xf32>
    %53 = arith.truncf %52 : vector<512x128xf32> to vector<512x128xbf16>
    %c0_32 = arith.constant 0 : index
    %c0_33 = arith.constant 0 : index
    %54 = vector.load %arg12[%c0_32, %c0_33] : memref<512x128xbf16, #tpu.memory_space<vmem>>, vector<512x128xbf16>
    tpu.vector_store %arg12[%c0_32, %c0_33], %53 {strides = array<i32>} : memref<512x128xbf16, #tpu.memory_space<vmem>>, vector<512x128xbf16>,
    return
  }
  func.func @transform_0(%arg0: i32) -> (i32, i32) {
    %c0_i32 = arith.constant 0 : i32
    %c0_i32_0 = arith.constant 0 : i32
    return %arg0, %c0_i32 : i32, i32
  }
  func.func @transform_1(%arg0: i32) -> (i32, i32) {
    %c0_i32 = arith.constant 0 : i32
    %c0_i32_0 = arith.constant 0 : i32
    %c0_i32_1 = arith.constant 0 : i32
    return %c0_i32, %c0_i32_0 : i32, i32
  }
  func.func @transform_2(%arg0: i32) -> (i32, i32) {
    %c0_i32 = arith.constant 0 : i32
    %c0_i32_0 = arith.constant 0 : i32
    %c0_i32_1 = arith.constant 0 : i32
    return %c0_i32, %c0_i32_0 : i32, i32
  }
  func.func @transform_3(%arg0: i32) -> (i32, i32) {
    %c0_i32 = arith.constant 0 : i32
    %c0_i32_0 = arith.constant 0 : i32
    %c0_i32_1 = arith.constant 0 : i32
    return %c0_i32, %c0_i32_0 : i32, i32
  }
  func.func @transform_4(%arg0: i32) -> (i32, i32) {
    %c0_i32 = arith.constant 0 : i32
    %c0_i32_0 = arith.constant 0 : i32
    %c0_i32_1 = arith.constant 0 : i32
    return %c0_i32, %c0_i32_0 : i32, i32
  }
  func.func @transform_5(%arg0: i32) -> (i32, i32) {
    %c0_i32 = arith.constant 0 : i32
    %c0_i32_0 = arith.constant 0 : i32
    %c0_i32_1 = arith.constant 0 : i32
    return %c0_i32, %c0_i32_0 : i32, i32
  }
  func.func @transform_6(%arg0: i32) -> (i32, i32) {
    %c0_i32 = arith.constant 0 : i32
    %c0_i32_0 = arith.constant 0 : i32
    %c0_i32_1 = arith.constant 0 : i32
    return %c0_i32, %c0_i32_0 : i32, i32
  }
  func.func @transform_7(%arg0: i32) -> (i32, i32) {
    %c0_i32 = arith.constant 0 : i32
    %c0_i32_0 = arith.constant 0 : i32
    %c0_i32_1 = arith.constant 0 : i32
    return %c0_i32, %c0_i32_0 : i32, i32
  }
  func.func @transform_8(%arg0: i32) -> (i32, i32) {
    %c0_i32 = arith.constant 0 : i32
    %c0_i32_0 = arith.constant 0 : i32
    %c0_i32_1 = arith.constant 0 : i32
    return %c0_i32, %c0_i32_0 : i32, i32
  }
  func.func @transform_9(%arg0: i32) -> (i32, i32) {
    %c0_i32 = arith.constant 0 : i32
    %c0_i32_0 = arith.constant 0 : i32
    %c0_i32_1 = arith.constant 0 : i32
    return %c0_i32, %c0_i32_0 : i32, i32
  }
  func.func @transform_10(%arg0: i32) -> (i32, i32) {
    %c0_i32 = arith.constant 0 : i32
    %c0_i32_0 = arith.constant 0 : i32
    %c0_i32_1 = arith.constant 0 : i32
    return %c0_i32, %c0_i32_0 : i32, i32
  }
  func.func @transform_11(%arg0: i32) -> (i32, i32) {
    %c0_i32 = arith.constant 0 : i32
    %c0_i32_0 = arith.constant 0 : i32
    return %arg0, %c0_i32 : i32, i32
  }
}

</mosaic_0001>

<bundles_post_ra>
// kernel: direct_policy_agent_forward.1
= control target key start
LH: loop header
LB: loop body
LE: loop exit
PB: predicated region body
PF: predicated region fallthrough
CT: control target
= control target key end

     0   :  { %s6622_s17 = smov 0   ;;  %s8915_s0 = inlined_call_operand.vmem [shape: bf16[1024,42], index: 0, kind: input, shape index: {}]   ;;  %s8916_s1 = inlined_call_operand.vmem [shape: bf16[42,256], index: 1, kind: input, shape index: {}]   ;;  %s8917_s2 = inlined_call_operand.vmem [shape: f32[1,256], index: 2, kind: input, shape index: {}]   ;;  %s8918_s3 = inlined_call_operand.vmem [shape: bf16[256,384], index: 3, kind: input, shape index: {}]   ;;  %s8919_s4 = inlined_call_operand.vmem [shape: f32[1,384], index: 4, kind: input, shape index: {}]   ;;  %s8920_s5 = inlined_call_operand.vmem [shape: bf16[384,128], index: 5, kind: input, shape index: {}]   ;;  %s8921_s6 = inlined_call_operand.vmem [shape: f32[1,128], index: 6, kind: input, shape index: {}]   ;;  %s8922_s7 = inlined_call_operand.vmem [shape: bf16[128,128], index: 7, kind: input, shape index: {}]   ;;  %s8923_s8 = inlined_call_operand.vmem [shape: f32[1,128], index: 8, kind: input, shape index: {}]   ;;  %s8924_s9 = inlined_call_operand.vmem [shape: bf16[128,128], index: 9, kind: input, shape index: {}]   ;;  %s8925_s10 = inlined_call_operand.vmem [shape: f32[1,128], index: 10, kind: input, shape index: {}]   ;;  %s8926_s11 = inlined_call_operand.vmem [shape: bf16[1024,128], index: 11, kind: output, shape index: {}]  }
   0x1 LB: > { %s5285_s18 = sadd.s32 4294967295, %s6559_s17   ;;  %p5289_p0 = scmp.ge.s32.totalorder %s6559_s17, 1  ;;  %s6559_s17 = sphi %s6622_s17, %s21_s17  }
   0x2   : > { %p338_p1 = scmp.lt.s32.totalorder %s6559_s17, 3 }
   0x4   : > { %p339_p2 = pnand %p5289_p0, %p338_p1 }
   0x6   : > { %342 = sbr.rel (%p339_p2) target bundleno = 1684 (0x694), region = 64 }
   0xb   : > { %v6152_v0 = vld [vmem:[%s8916_s1 + $0x24] ss:$8 sps:$4 sm:$0x1f]   ;;  %vm758_vm0 = vcmask 1044480   ;;  %v6155_v2 = vld [vmem:[%s8916_s1 + $0x14] ss:$8 sps:$4 sm:$0xff]  }
   0xc   : > { %v6154_v1 = vld [vmem:[%s8916_s1 + $0x20] ss:$8 sps:$4 sm:$0x1f]   ;;  %5332 = vmatprep.subr.msk.bf16.mxu0 %vm758_vm0, %v6152_v0  ;;  %6137 = vmatprep.subr.msk.bf16.mxu1 %vm758_vm0, %v6152_v0  ;;  %v6157_v4 = vld [vmem:[%s8916_s1 + $0x10] ss:$8 sps:$4 sm:$0xff]   ;;  %v6561_v5 = vmov 0  }
   0xd   : > { %v760_v3 = vsel %vm758_vm0, %v6154_v1, 0  ;;  %797 = vmatprep.mubr.bf16.mxu0 %v6561_v5  ;;  %1037 = vmatprep.mubr.bf16.mxu1 %v6561_v5  ;;  %s5290_s27 = sshll.u32 %s5285_s18, 6  ;;  %v6158_v6 = vld [vmem:[%s8916_s1 + $0x4] ss:$8 sps:$4 sm:$0xff]   ;;  %v6160_v7 = vld [vmem:[%s8916_s1] ss:$8 sps:$4 sm:$0xff]  }
   0xe   : > { %776 = vmatpush1.bf16.msra.mxu0 %v760_v3  ;;  %6140 = vmatpush1.bf16.msra.mxu1 %v760_v3  ;;  %p379_p3 = scmp.lt.s32.totalorder %s5290_s27, 127  ;;  %vm661_vm1 = vcmask 343040   ;;  %v6170_v9 = vld [vmem:[%s8918_s3 + $0xb0] ss:$12 sps:$4 sm:$0xff]   ;;  %v6172_v10 = vld [vmem:[%s8918_s3 + $0x98] ss:$12 sps:$4 sm:$0xff]  }
   0xf   : > { %777 = vmatprep.subr.bf16.mxu0 %v6155_v2  ;;  %6138 = vmatprep.subr.bf16.mxu1 %v6155_v2  ;;  %v6175_v12 = vld [vmem:[%s8918_s3 + $0x80] ss:$12 sps:$4 sm:$0xff]   ;;  %v6177_v13 = vld [vmem:[%s8918_s3 + $0x68] ss:$12 sps:$4 sm:$0xff]   ;;  %v6180_v15 = vld [vmem:[%s8918_s3 + $0x50] ss:$12 sps:$4 sm:$0xff]  }
  0x10   : > { %s8967_s27 = smov (!%p379_p3, %s5290_s27), 127  ;;  %v6187_v17 = vld [vmem:[%s8918_s3 + $0xa8] ss:$12 sps:$4 sm:$0xff]   ;;  %v6189_v18 = vld [vmem:[%s8918_s3 + $0xac] ss:$12 sps:$4 sm:$0xff]  }
  0x11   : > { %s5291_s13 = sshll.u32 %s8967_s27, 2  ;;  %v6182_v19 = vld [vmem:[%s8918_s3 + $0x38] ss:$12 sps:$4 sm:$0xff]   ;;  %v6194_v21 = vld [vmem:[%s8918_s3 + $0x94] ss:$12 sps:$4 sm:$0xff]  }
  0x12   : > { %778 = vmatpush1.bf16.msra.mxu0 %v6157_v4  ;;  %6141 = vmatpush1.bf16.msra.mxu1 %v6157_v4  ;;  %s6658_s16 = scalar_lea.vmem %s8915_s0, %s5291_s13  ;;  %v6192_v22 = vld [vmem:[%s8918_s3 + $0x90] ss:$12 sps:$4 sm:$0xff]   ;;  %v6186_v23 = vld [vmem:[%s8918_s3 + $0x20] ss:$12 sps:$4 sm:$0xff]   ;;  %v6195_v26 = vld [vmem:[%s8918_s3 + $0x78] ss:$12 sps:$4 sm:$0xff]   ;;  %s8770_s20 = scalar_lea.vmem %s8926_s11, %s5291_s13 }
  0x13   : > { %779 = vmatprep.subr.bf16.mxu0 %v6158_v6  ;;  %6139 = vmatprep.subr.bf16.mxu1 %v6158_v6  ;;  %v6161_v8 = vld [vmem:[%s6658_s16] sm:$0xff]   ;;  %v6162_v11 = vld [vmem:[%s6658_s16 + $0x8] sm:$0xff]   ;;  %v6163_v14 = vld [vmem:[%s6658_s16 + $0x10] sm:$0xff]  }
  0x14   : > { %v6185_v16 = vld [vmem:[%s6658_s16 + $0xc0] sm:$0xff]   ;;  %v6164_v20 = vld [vmem:[%s6658_s16 + $0x18] sm:$0xff]   ;;  %v6191_v24 = vld [vmem:[%s6658_s16 + $0xc8] sm:$0xff]  }
  0x15   : > { %v6197_v25 = vld [vmem:[%s8918_s3 + $0x7c] ss:$12 sps:$4 sm:$0xff]   ;;  %v6203_v28 = vld [vmem:[%s8918_s3 + $0x64] ss:$12 sps:$4 sm:$0xff]   ;;  %v6201_v30 = vld [vmem:[%s8918_s3 + $0x60] ss:$12 sps:$4 sm:$0xff]  }
  0x16   : > { %780 = vmatpush1.bf16.msra.mxu0 %v6160_v7  ;;  %6142 = vmatpush1.bf16.msra.mxu1 %v6160_v7  ;;  %v6198_v27 = vld [vmem:[%s8918_s3 + $0x8] ss:$12 sps:$4 sm:$0xff]   ;;  %v6165_v29 = vld [vmem:[%s6658_s16 + $0x20] sm:$0xff]   ;;  %v6206_v31 = vld [vmem:[%s8918_s3 + $0x4c] ss:$12 sps:$4 sm:$0xff]  }
  0x17   : > { %2000 = vmatprep.subr.bf16.mxu0 %v6561_v5  ;;  %1647 = vmatprep.subr.bf16.mxu1 %v6189_v18  ;;  %v6200_v32 = vld [vmem:[%s6658_s16 + $0xd0] sm:$0xff]   ;;  %v6166_v36 = vld [vmem:[%s6658_s16 + $0x28] sm:$0xff]   ;;  %v6208_v39 = vld [vmem:[%s6658_s16 + $0xd8] sm:$0xff]  }
  0x18   : > { %v6204_v33 = vld [vmem:[%s8918_s3 + $0x48] ss:$12 sps:$4 sm:$0xff]   ;;  %v6212_v34 = vld [vmem:[%s8918_s3 + $0x170] ss:$12 sps:$4 sm:$0xff]   ;;  %v6213_v40 = vld [vmem:[%s8918_s3 + $0x18] ss:$12 sps:$4 sm:$0xff]  }
  0x19   : > { %5333 = vmatmul.mubr.msk.bf16.vlgmr.msra.gmra.mxu0 %vm661_vm1, %v6161_v8  ;;  %5357 = vmatmul.mubr.msk.bf16.vlgmr.msra.gmra.mxu1 %vm661_vm1, %v6185_v16  ;;  %v6211_v35 = vld [vmem:[%s8918_s3 + $0x34] ss:$12 sps:$4 sm:$0xff]   ;;  %v6209_v37 = vld [vmem:[%s8918_s3 + $0x30] ss:$12 sps:$4 sm:$0xff]   ;;  %v6224_v42 = vld [vmem:[%s8918_s3 + $0x158] ss:$12 sps:$4 sm:$0xff]  }
  0x1a   : > { %807 = vmatprep.mubr.bf16.mxu0 %v6561_v5  ;;  %2001 = vmatpush1.bf16.msra.mxu0 %v6170_v9  ;;  %v6215_v38 = vld [vmem:[%s8918_s3 + $0x1c] ss:$12 sps:$4 sm:$0xff]   ;;  %v6220_v41 = vld [vmem:[%s8918_s3 + $0x4] ss:$12 sps:$4 sm:$0xff]   ;;  %v6218_v44 = vld [vmem:[%s8918_s3] ss:$12 sps:$4 sm:$0xff]  }
  0x1b   : > { %2002 = vmatprep.subr.bf16.mxu0 %v6561_v5  ;;  %1047 = vmatprep.mubr.bf16.mxu1 %v6561_v5  ;;  %v6167_v43 = vld [vmem:[%s6658_s16 + $0x30] sm:$0xff]   ;;  %v6223_v45 = vld [vmem:[%s8918_s3 + $0x16c] ss:$12 sps:$4 sm:$0xff]   ;;  %v6217_v46 = vld [vmem:[%s6658_s16 + $0xe0] sm:$0xff]  }
  0x1c   : > { %1648 = vmatpush1.bf16.msra.mxu1 %v6187_v17  ;;  %v6221_v47 = vld [vmem:[%s8918_s3 + $0x168] ss:$12 sps:$4 sm:$0xff]   ;;  %v6233_v49 = vld [vmem:[%s8918_s3 + $0x140] ss:$12 sps:$4 sm:$0xff]   ;;  %v6168_v50 = vld [vmem:[%s6658_s16 + $0x38] sm:$0xff]  }
  0x1d   : > { %1649 = vmatprep.subr.bf16.mxu1 %v6194_v21  ;;  %v6229_v48 = vld [vmem:[%s8918_s3 + $0x154] ss:$12 sps:$4 sm:$0xff]   ;;  %v6227_v51 = vld [vmem:[%s8918_s3 + $0x150] ss:$12 sps:$4 sm:$0xff]   ;;  %v6226_v53 = vld [vmem:[%s6658_s16 + $0xe8] sm:$0xff]  }
  0x1e   : > { %2003 = vmatpush1.bf16.msra.mxu0 %v6172_v10  ;;  %v6232_v52 = vld [vmem:[%s8918_s3 + $0x13c] ss:$12 sps:$4 sm:$0xff]   ;;  %v6230_v54 = vld [vmem:[%s8918_s3 + $0x138] ss:$12 sps:$4 sm:$0xff]   ;;  %v6236_v58 = vld [vmem:[%s8918_s3 + $0x120] ss:$12 sps:$4 sm:$0xff]  }
  0x1f   : > { %2004 = vmatprep.subr.bf16.mxu0 %v6561_v5  ;;  %v6239_v55 = vld [vmem:[%s8918_s3 + $0x128] ss:$12 sps:$4 sm:$0xff]   ;;  %v6238_v56 = vld [vmem:[%s8918_s3 + $0x124] ss:$12 sps:$4 sm:$0xff]   ;;  %v6242_v60 = vld [vmem:[%s8918_s3 + $0x10c] ss:$12 sps:$4 sm:$0xff]  }
  0x20   : > { %1650 = vmatpush1.bf16.msra.mxu1 %v6192_v22  ;;  %v6169_v57 = vld [vmem:[%s6658_s16 + $0x40] sm:$0xff]   ;;  %v6243_v59 = vld [vmem:[%s8918_s3 + $0x110] ss:$12 sps:$4 sm:$0xff]   ;;  %v6240_v62 = vld [vmem:[%s8918_s3 + $0x108] ss:$12 sps:$4 sm:$0xff]  }
  0x21   : > { %5334 = vmatmul.mubr.msk.bf16.gmra.mxu0 %vm661_vm1, %v6162_v11  ;;  %5358 = vmatmul.mubr.msk.bf16.gmra.mxu1 %vm661_vm1, %v6191_v24  ;;  %v6235_v61 = vld [vmem:[%s6658_s16 + $0xf0] sm:$0xff]   ;;  %v6248_v0 = vld [vmem:[%s8918_s3 + $0xf8] ss:$12 sps:$4 sm:$0xff]   ;;  %v6171_v1 = vld [vmem:[%s6658_s16 + $0x48] sm:$0xff]  }
  0x22   : > { %817 = vmatprep.mubr.bf16.mxu0 %v6561_v5  ;;  %2005 = vmatpush1.bf16.msra.mxu0 %v6175_v12  ;;  %v6247_v63 = vld [vmem:[%s8918_s3 + $0xf4] ss:$12 sps:$4 sm:$0xff]   ;;  %v6244_v2 = vld [vmem:[%s6658_s16 + $0xf8] sm:$0xff]   ;;  %v6255_v8 = vld [vmem:[%s8918_s3 + $0xc4] ss:$12 sps:$4 sm:$0xff]  }
  0x23   : > { %2006 = vmatprep.subr.bf16.mxu0 %v6561_v5  ;;  %1651 = vmatprep.subr.bf16.mxu1 %v6197_v25  ;;  %v6245_v3 = vld [vmem:[%s8918_s3 + $0xf0] ss:$12 sps:$4 sm:$0xff]   ;;  %v6252_v6 = vld [vmem:[%s8918_s3 + $0xe0] ss:$12 sps:$4 sm:$0xff]   ;;  %v6249_v7 = vld [vmem:[%s8918_s3 + $0xd8] ss:$12 sps:$4 sm:$0xff]  }
  0x24   : > { %1057 = vmatprep.mubr.bf16.mxu1 %v6561_v5  ;;  %1652 = vmatpush1.bf16.msra.mxu1 %v6195_v26  ;;  %v6251_v4 = vld [vmem:[%s8918_s3 + $0xdc] ss:$12 sps:$4 sm:$0xff]   ;;  %v6173_v10 = vld [vmem:[%s6658_s16 + $0x50] sm:$0xff]   ;;  %v6253_v11 = vld [vmem:[%s8918_s3 + $0xc0] ss:$12 sps:$4 sm:$0xff]   ;;  %v463_v26 = vlaneseq }
  0x25   : > { %1653 = vmatprep.subr.bf16.mxu1 %v6203_v28  ;;  %v6256_v9 = vld [vmem:[%s8918_s3 + $0xc8] ss:$12 sps:$4 sm:$0xff]   ;;  %v6174_v12 = vld [vmem:[%s6658_s16 + $0x58] sm:$0xff]   ;;  %v6183_v17 = vld [vmem:[%s6658_s16 + $0x80] sm:$0xff]  }
  0x26   : > { %2007 = vmatpush1.bf16.msra.mxu0 %v6177_v13  ;;  %v6176_v13 = vld [vmem:[%s6658_s16 + $0x60] sm:$0xff]   ;;  %v6181_v16 = vld [vmem:[%s6658_s16 + $0x78] sm:$0xff]   ;;  %v6225_v24 = vld [vmem:[%s6658_s16 + $0xb0] sm:$0xff]  }
  0x27   : > { %2008 = vmatprep.subr.bf16.mxu0 %v6561_v5  ;;  %v6261_v18 = vld [vmem:[%s8920_s5 + $0xb8] sm:$0xff]   ;;  %v6207_v22 = vld [vmem:[%s6658_s16 + $0xa0] sm:$0xff]  }
  0x28   : > { %1654 = vmatpush1.bf16.msra.mxu1 %v6201_v30  ;;  %v6199_v21 = vld [vmem:[%s6658_s16 + $0x98] sm:$0xff]   ;;  %v461_v30 = vld [vmem:[%s8917_s2] sm:$0x3] }
  0x29   : > { %5335 = vmatmul.mubr.msk.bf16.gmra.mxu0 %vm661_vm1, %v6163_v14  ;;  %1655 = vmatprep.subr.bf16.mxu1 %v6206_v31  ;;  %v6178_v14 = vld [vmem:[%s6658_s16 + $0x68] sm:$0xff]   ;;  %v6234_v25 = vld [vmem:[%s6658_s16 + $0xb8] sm:$0xff]  }
  0x2a   : > { %827 = vmatprep.mubr.bf16.mxu0 %v6561_v5  ;;  %2009 = vmatpush1.bf16.msra.mxu0 %v6180_v15  ;;  %v6179_v15 = vld [vmem:[%s6658_s16 + $0x70] sm:$0xff]  }
  0x2b   : > { %2010 = vmatprep.subr.bf16.mxu0 %v6561_v5  ;;  %5359 = vmatmul.mubr.msk.bf16.gmra.mxu1 %vm661_vm1, %v6200_v32 }
  0x2c   : > { %1067 = vmatprep.mubr.bf16.mxu1 %v6561_v5  ;;  %1656 = vmatpush1.bf16.msra.mxu1 %v6204_v33 }
  0x2d   : > { %1657 = vmatprep.subr.bf16.mxu1 %v6211_v35 }
  0x2e   : > { %2011 = vmatpush1.bf16.msra.mxu0 %v6182_v19  ;;  %v6184_v19 = vld [vmem:[%s6658_s16 + $0x88] sm:$0xff]  }
  0x2f   : > { %2012 = vmatprep.subr.bf16.mxu0 %v6561_v5 }
  0x30   : > { %1658 = vmatpush1.bf16.msra.mxu1 %v6209_v37 }
  0x31   : > { %5336 = vmatmul.mubr.msk.bf16.gmra.mxu0 %vm661_vm1, %v6164_v20  ;;  %1659 = vmatprep.subr.bf16.mxu1 %v6215_v38  ;;  %v6190_v20 = vld [vmem:[%s6658_s16 + $0x90] sm:$0xff]  }
  0x32   : > { %837 = vmatprep.mubr.bf16.mxu0 %v6561_v5  ;;  %2013 = vmatpush1.bf16.msra.mxu0 %v6186_v23  ;;  %v6216_v23 = vld [vmem:[%s6658_s16 + $0xa8] sm:$0xff]  }
  0x33   : > { %2014 = vmatprep.subr.bf16.mxu0 %v6561_v5  ;;  %5360 = vmatmul.mubr.msk.bf16.gmra.mxu1 %vm661_vm1, %v6208_v39 }
  0x34   : > { %1077 = vmatprep.mubr.bf16.mxu1 %v6561_v5  ;;  %1660 = vmatpush1.bf16.msra.mxu1 %v6213_v40 }
  0x35   : > { %1661 = vmatprep.subr.bf16.mxu1 %v6220_v41 }
  0x36   : > { %2015 = vmatpush1.bf16.msra.mxu0 %v6198_v27  ;;  %v6919_v27 = vshrl.u32 %v463_v26, 7 }
  0x37   : > { %2016 = vmatprep.subr.bf16.mxu0 %v6561_v5 }
  0x38   : > { %1662 = vmatpush1.bf16.msra.mxu1 %v6218_v44  ;;  %v469_v28 = vsub.s32 1, %v6919_v27 }
  0x39   : > { %5337 = vmatmul.mubr.msk.bf16.gmra.mxu0 %vm661_vm1, %v6165_v29  ;;  %1663 = vmatprep.subr.bf16.mxu1 %v6223_v45  ;;  %v465_v29 = vsub.s32 0, %v6919_v27 }
  0x3a   : > { %847 = vmatprep.mubr.bf16.mxu0 %v6561_v5  ;;  %2017 = vmatpush2.bf16.msra.mxu0 %v6212_v34  ;;  %v6928_v32 = vrot.slane %v461_v30, %v469_v28 }
  0x3b   : > { %2018 = vmatprep.subr.bf16.mxu0 %v6561_v5  ;;  %5361 = vmatmul.mubr.msk.bf16.gmra.mxu1 %vm661_vm1, %v6217_v46  ;;  %v6932_v33 = vrot.slane %v461_v30, %v465_v29 }
  0x3c   : > { %1087 = vmatprep.mubr.bf16.mxu1 %v6561_v5  ;;  %1664 = vmatpush2.bf16.msra.mxu1 %v6221_v47 }
  0x3d   : > { %1665 = vmatprep.subr.bf16.mxu1 %v6229_v48  ;;  %v6257_v48 = vld [vmem:[%s8920_s5 + $0x38] sm:$0xff]  }
  0x3e   : > { %2019 = vmatpush2.bf16.msra.mxu0 %v6224_v42 }
  0x3f   : > { %2020 = vmatprep.subr.bf16.mxu0 %v6561_v5 }
  0x40   : > { %1666 = vmatpush2.bf16.msra.mxu1 %v6227_v51  ;;  %v6264_v51 = vld [vmem:[%s8920_s5 + $0xb0] sm:$0xff]  }
  0x41   : > { %5338 = vmatmul.mubr.msk.bf16.gmra.mxu0 %vm661_vm1, %v6166_v36  ;;  %1667 = vmatprep.subr.bf16.mxu1 %v6232_v52 }
  0x42   : > { %857 = vmatprep.mubr.bf16.mxu0 %v6561_v5  ;;  %2021 = vmatpush2.bf16.msra.mxu0 %v6233_v49 }
  0x43   : > { %2022 = vmatprep.subr.bf16.mxu0 %v6561_v5  ;;  %5362 = vmatmul.mubr.msk.bf16.gmra.mxu1 %vm661_vm1, %v6226_v53 }
  0x44   : > { %1097 = vmatprep.mubr.bf16.mxu1 %v6561_v5  ;;  %1668 = vmatpush2.bf16.msra.mxu1 %v6230_v54 }
  0x45   : > { %1669 = vmatprep.subr.bf16.mxu1 %v6238_v56 }
  0x46   : > { %2023 = vmatpush2.bf16.msra.mxu0 %v6239_v55 }
  0x47   : > { %2024 = vmatprep.subr.bf16.mxu0 %v6561_v5 }
  0x48   : > { %1670 = vmatpush2.bf16.msra.mxu1 %v6236_v58 }
  0x49   : > { %5339 = vmatmul.mubr.msk.bf16.gmra.mxu0 %vm661_vm1, %v6167_v43  ;;  %1671 = vmatprep.subr.bf16.mxu1 %v6242_v60  ;;  %v6267_v60 = vld [vmem:[%s8920_s5 + $0xa8] sm:$0xff]  }
  0x4a   : > { %867 = vmatprep.mubr.bf16.mxu0 %v6561_v5  ;;  %2025 = vmatpush2.bf16.msra.mxu0 %v6243_v59 }
  0x4b   : > { %2026 = vmatprep.subr.bf16.mxu0 %v6561_v5  ;;  %5363 = vmatmul.mubr.msk.bf16.gmra.mxu1 %vm661_vm1, %v6235_v61 }
  0x4c   : > { %1107 = vmatprep.mubr.bf16.mxu1 %v6561_v5  ;;  %1672 = vmatpush2.bf16.msra.mxu1 %v6240_v62 }
  0x4d   : > { %1673 = vmatprep.subr.bf16.mxu1 %v6247_v63 }
  0x4e   : > { %2027 = vmatpush2.bf16.msra.mxu0 %v6248_v0 }
  0x4f   : > { %2028 = vmatprep.subr.bf16.mxu0 %v6561_v5 }
  0x50   : > { %1674 = vmatpush2.bf16.msra.mxu1 %v6245_v3 }
  0x51   : > { %5340 = vmatmul.mubr.msk.bf16.gmra.mxu0 %vm661_vm1, %v6168_v50  ;;  %1675 = vmatprep.subr.bf16.mxu1 %v6251_v4 }
  0x52   : > { %877 = vmatprep.mubr.bf16.mxu0 %v6561_v5  ;;  %2029 = vmatpush2.bf16.msra.mxu0 %v6252_v6 }
  0x53   : > { %5364 = vmatmul.mubr.msk.bf16.gmra.mxu1 %vm661_vm1, %v6244_v2  ;;  %2030 = vmatprep.subr.bf16.mxu0 %v6561_v5  ;;  %v6259_v2 = vld [vmem:[%s8920_s5 + $0x28] sm:$0xff]  }
  0x54   : > { %1676 = vmatpush2.bf16.msra.mxu1 %v6249_v7 }
  0x55   : > { %1677 = vmatprep.subr.bf16.mxu1 %v6255_v8 }
  0x56   : > { %2031 = vmatpush2.bf16.msra.mxu0 %v6256_v9 }
  0x57   : > { %5897 = vmatprep.subr.bf16.mxu0 %v6261_v18 }
  0x58   : > { %1678 = vmatpush2.bf16.msra.mxu1 %v6253_v11  ;;  %v6260_v11 = vld [vmem:[%s8920_s5 + $0x20] sm:$0xff]  }
  0x59   : > { %5341 = vmatmul.mubr.msk.bf16.gmra.mxu0 %vm661_vm1, %v6169_v57  ;;  %2776 = vmatprep.subr.bf16.mxu1 %v6561_v5  ;;  %v6258_v57 = vld [vmem:[%s8920_s5 + $0x30] sm:$0xff]  }
  0x5a   : > { %887 = vmatprep.mubr.bf16.mxu0 %v6561_v5 }
  0x61   : > { %5342 = vmatmul.mubr.msk.bf16.gmra.mxu0 %vm661_vm1, %v6171_v1 }
  0x62   : > { %897 = vmatprep.mubr.bf16.mxu0 %v6561_v5 }
  0x69   : > { %5343 = vmatmul.mubr.msk.bf16.gmra.mxu0 %vm661_vm1, %v6173_v10 }
  0x6a   : > { %907 = vmatprep.mubr.bf16.mxu0 %v6561_v5 }
  0x71   : > { %5344 = vmatmul.mubr.msk.bf16.gmra.mxu0 %vm661_vm1, %v6174_v12 }
  0x72   : > { %917 = vmatprep.mubr.bf16.mxu0 %v6561_v5 }
  0x79   : > { %5345 = vmatmul.mubr.msk.bf16.gmra.mxu0 %vm661_vm1, %v6176_v13 }
  0x7a   : > { %927 = vmatprep.mubr.bf16.mxu0 %v6561_v5 }
  0x81   : > { %5346 = vmatmul.mubr.msk.bf16.gmra.mxu0 %vm661_vm1, %v6178_v14 }
  0x82   : > { %937 = vmatprep.mubr.bf16.mxu0 %v6561_v5 }
  0x89   : > { %5347 = vmatmul.mubr.msk.bf16.gmra.mxu0 %vm661_vm1, %v6179_v15 }
  0x8a   : > { %947 = vmatprep.mubr.bf16.mxu0 %v6561_v5 }
  0x91   : > { %5348 = vmatmul.mubr.msk.bf16.gmra.mxu0 %vm661_vm1, %v6181_v16 }
  0x92   : > { %957 = vmatprep.mubr.bf16.mxu0 %v6561_v5 }
  0x99   : > { %5349 = vmatmul.mubr.msk.bf16.gmra.mxu0 %vm661_vm1, %v6183_v17 }
  0x9a   : > { %967 = vmatprep.mubr.bf16.mxu0 %v6561_v5 }
  0xa1   : > { %5350 = vmatmul.mubr.msk.bf16.gmra.mxu0 %vm661_vm1, %v6184_v19  ;;  %v6262_v19 = vld [vmem:[%s8920_s5 + $0x18] sm:$0xff]  }
  0xa2   : > { %977 = vmatprep.mubr.bf16.mxu0 %v6561_v5 }
  0xa9   : > { %5351 = vmatmul.mubr.msk.bf16.gmra.mxu0 %vm661_vm1, %v6190_v20 }
  0xaa   : > { %987 = vmatprep.mubr.bf16.mxu0 %v6561_v5 }
  0xb1   : > { %5352 = vmatmul.mubr.msk.bf16.gmra.mxu0 %vm661_vm1, %v6199_v21 }
  0xb2   : > { %997 = vmatprep.mubr.bf16.mxu0 %v6561_v5 }
  0xb9   : > { %5353 = vmatmul.mubr.msk.bf16.gmra.mxu0 %vm661_vm1, %v6207_v22 }
  0xba   : > { %1007 = vmatprep.mubr.bf16.mxu0 %v6561_v5 }
  0xc1   : > { %5354 = vmatmul.mubr.msk.bf16.gmra.mxu0 %vm661_vm1, %v6216_v23 }
  0xc2   : > { %1017 = vmatprep.mubr.bf16.mxu0 %v6561_v5 }
  0xc9   : > { %5355 = vmatmul.mubr.msk.bf16.gmra.mxu0 %vm661_vm1, %v6225_v24 }
  0xca   : > { %1027 = vmatprep.mubr.bf16.mxu0 %v6561_v5 }
  0xd1   : > { %5356 = vmatmul.mubr.msk.bf16.gmra.mxu0 %vm661_vm1, %v6234_v25 }
  0xd9   : > { %v799_v31 = vpop.f32.mrf.mxu0 }
  0xda   : > { %v800_v38 = vadd.f32 %v799_v31, %v6932_v33  ;;  %v6263_v31 = vld [vmem:[%s8920_s5 + $0x10] sm:$0xff]  }
  0xdb   : > { %v801_v34 = vpop.f32.mrf.mxu0 }
  0xdc   : > { %v802_v36 = vadd.f32 %v801_v34, %v6928_v32  ;;  %v1118_v45 = vmax.f32 %v800_v38, 0.0 }
  0xdd   : > { %v803_v35 = vpop.f32.mrf.mxu0 }
  0xde   : > { %v804_v37 = vadd.f32 %v803_v35, %v6932_v33  ;;  %v1119_v43 = vmax.f32 %v802_v36, 0.0 }
  0xdf   : > { %v805_v39 = vpop.f32.mrf.mxu0 }
  0xe0   : > { %v806_v40 = vadd.f32 %v805_v39, %v6928_v32  ;;  %v1120_v41 = vmax.f32 %v804_v37, 0.0 }
  0xe1   : > { %v809_v42 = vpop.f32.mrf.mxu0 }
  0xe2   : > { %v1121_v44 = vmax.f32 %v806_v40, 0.0  ;;  %v1246_v49 = vpack.c.bf16 %v1120_v41, %v1118_v45  ;;  %v810_v54 = vadd.f32 %v809_v42, %v6932_v33  ;;  %v6265_v41 = vld [vmem:[%s8920_s5 + $0x8] sm:$0xff]   ;;  %v6270_v42 = vld [vmem:[%s8920_s5 + $0xa0] sm:$0xff]  }
  0xe3   : > { %v811_v46 = vpop.f32.mrf.mxu0 }
  0xe4   : > { %v1247_v47 = vpack.c.bf16 %v1121_v44, %v1119_v43  ;;  %v812_v52 = vadd.f32 %v811_v46, %v6928_v32  ;;  %v1122_v63 = vmax.f32 %v810_v54, 0.0 }
  0xe5   : > { %v813_v50 = vpop.f32.mrf.mxu0 }
  0xe6   : > { %v814_v53 = vadd.f32 %v813_v50, %v6932_v33  ;;  %1679 = vmatprep.mubr.bf16.mxu1 %v1247_v47  ;;  %2032 = vmatprep.mubr.bf16.mxu0 %v1247_v47  ;;  %v1123_v61 = vmax.f32 %v812_v52, 0.0  ;;  %v6266_v50 = vld [vmem:[%s8920_s5] sm:$0xff]  }
  0xe7   : > { %v815_v55 = vpop.f32.mrf.mxu0  ;;  %1680 = vmatmul.mubr.bf16.vlgmr.msra.gmra.mxu1 %v1246_v49  ;;  %2033 = vmatmul.mubr.bf16.vlgmr.msra.gmra.mxu0 %v1246_v49 }
  0xe8   : > { %v816_v56 = vadd.f32 %v815_v55, %v6928_v32  ;;  %2777 = vmatpush1.bf16.msra.mxu1 %v6257_v48  ;;  %5898 = vmatpush3.bf16.msra.mxu0 %v6261_v18  ;;  %v1124_v58 = vmax.f32 %v814_v53, 0.0 }
  0xe9   : > { %v819_v59 = vpop.f32.mrf.mxu0  ;;  %2778 = vmatprep.subr.bf16.mxu1 %v6561_v5  ;;  %5899 = vmatprep.subr.bf16.mxu0 %v6264_v51 }
  0xea   : > { %v1125_v62 = vmax.f32 %v816_v56, 0.0  ;;  %v1248_v3 = vpack.c.bf16 %v1124_v58, %v1122_v63  ;;  %v820_v8 = vadd.f32 %v819_v59, %v6932_v33  ;;  %v6268_v58 = vld [vmem:[%s8920_s5 + $0x78] sm:$0xff]  }
  0xeb   : > { %v821_v0 = vpop.f32.mrf.mxu0 }
  0xec   : > { %v1249_v1 = vpack.c.bf16 %v1125_v62, %v1123_v61  ;;  %2779 = vmatpush1.bf16.msra.mxu1 %v6258_v57  ;;  %5900 = vmatpush3.bf16.msra.mxu0 %v6264_v51  ;;  %v822_v6 = vadd.f32 %v821_v0, %v6928_v32  ;;  %v1126_v16 = vmax.f32 %v820_v8, 0.0 }
  0xed   : > { %v823_v4 = vpop.f32.mrf.mxu0  ;;  %2780 = vmatprep.subr.bf16.mxu1 %v6561_v5  ;;  %5901 = vmatprep.subr.bf16.mxu0 %v6267_v60 }
  0xee   : > { %v824_v7 = vadd.f32 %v823_v4, %v6932_v33  ;;  %1689 = vmatprep.mubr.bf16.mxu1 %v1249_v1  ;;  %2040 = vmatprep.mubr.bf16.mxu0 %v1249_v1  ;;  %v1127_v14 = vmax.f32 %v822_v6, 0.0 }
  0xef   : > { %v825_v9 = vpop.f32.mrf.mxu0  ;;  %1690 = vmatmul.mubr.bf16.gmra.mxu1 %v1248_v3  ;;  %2041 = vmatmul.mubr.bf16.gmra.mxu0 %v1248_v3 }
  0xf0   : > { %v826_v10 = vadd.f32 %v825_v9, %v6928_v32  ;;  %2781 = vmatpush1.bf16.msra.mxu1 %v6259_v2  ;;  %5902 = vmatpush3.bf16.msra.mxu0 %v6267_v60  ;;  %v1128_v12 = vmax.f32 %v824_v7, 0.0  ;;  %v6269_v2 = vld [vmem:[%s8920_s5 + $0x70] sm:$0xff]  }
  0xf1   : > { %v829_v13 = vpop.f32.mrf.mxu0  ;;  %2782 = vmatprep.subr.bf16.mxu1 %v6561_v5  ;;  %5903 = vmatprep.subr.bf16.mxu0 %v6270_v42 }
  0xf2   : > { %v1129_v15 = vmax.f32 %v826_v10, 0.0  ;;  %v1250_v20 = vpack.c.bf16 %v1128_v12, %v1126_v16  ;;  %v830_v24 = vadd.f32 %v829_v13, %v6932_v33 }
  0xf3   : > { %v831_v17 = vpop.f32.mrf.mxu0 }
  0xf4   : > { %v1251_v18 = vpack.c.bf16 %v1129_v15, %v1127_v14  ;;  %2783 = vmatpush1.bf16.msra.mxu1 %v6260_v11  ;;  %v832_v22 = vadd.f32 %v831_v17, %v6928_v32  ;;  %v1130_v38 = vmax.f32 %v830_v24, 0.0  ;;  %5904 = vmatpush3.bf16.msra.mxu0 %v6270_v42  ;;  %v6271_v11 = vld [vmem:[%s8920_s5 + $0x68] sm:$0xff]  }
  0xf5   : > { %v833_v21 = vpop.f32.mrf.mxu0  ;;  %2784 = vmatprep.subr.bf16.mxu1 %v6561_v5 }
  0xf6   : > { %v834_v23 = vadd.f32 %v833_v21, %v6932_v33  ;;  %1699 = vmatprep.mubr.bf16.mxu1 %v1251_v18  ;;  %2048 = vmatprep.mubr.bf16.mxu0 %v1251_v18  ;;  %v1131_v36 = vmax.f32 %v832_v22, 0.0 }
  0xf7   : > { %v835_v25 = vpop.f32.mrf.mxu0  ;;  %1700 = vmatmul.mubr.bf16.gmra.mxu1 %v1250_v20  ;;  %2049 = vmatmul.mubr.bf16.gmra.mxu0 %v1250_v20 }
  0xf8   : > { %v836_v30 = vadd.f32 %v835_v25, %v6928_v32  ;;  %2785 = vmatpush1.bf16.msra.mxu1 %v6262_v19  ;;  %v1132_v34 = vmax.f32 %v834_v23, 0.0 }
  0xf9   : > { %v839_v35 = vpop.f32.mrf.mxu0  ;;  %2786 = vmatprep.subr.bf16.mxu1 %v6561_v5 }
  0xfa   : > { %v1133_v37 = vmax.f32 %v836_v30, 0.0  ;;  %v1252_v43 = vpack.c.bf16 %v1132_v34, %v1130_v38  ;;  %v840_v47 = vadd.f32 %v839_v35, %v6932_v33 }
  0xfb   : > { %v841_v39 = vpop.f32.mrf.mxu0 }
  0xfc   : > { %v1253_v40 = vpack.c.bf16 %v1133_v37, %v1131_v36  ;;  %2787 = vmatpush1.bf16.msra.mxu1 %v6263_v31  ;;  %v842_v45 = vadd.f32 %v841_v39, %v6928_v32  ;;  %v1134_v55 = vmax.f32 %v840_v47, 0.0 }
  0xfd   : > { %v843_v44 = vpop.f32.mrf.mxu0  ;;  %2788 = vmatprep.subr.bf16.mxu1 %v6561_v5 }
  0xfe   : > { %v844_v46 = vadd.f32 %v843_v44, %v6932_v33  ;;  %1709 = vmatprep.mubr.bf16.mxu1 %v1253_v40  ;;  %2056 = vmatprep.mubr.bf16.mxu0 %v1253_v40  ;;  %v1135_v53 = vmax.f32 %v842_v45, 0.0  ;;  %v6273_v44 = vld [vmem:[%s8920_s5 + $0x98] sm:$0xff]  }
  0xff   : > { %v845_v48 = vpop.f32.mrf.mxu0  ;;  %1710 = vmatmul.mubr.bf16.gmra.mxu1 %v1252_v43  ;;  %2057 = vmatmul.mubr.bf16.gmra.mxu0 %v1252_v43  ;;  %v6272_v43 = vld [vmem:[%s8920_s5 + $0x60] sm:$0xff]  }
 0x100   : > { %v846_v49 = vadd.f32 %v845_v48, %v6928_v32  ;;  %2789 = vmatpush1.bf16.msra.mxu1 %v6265_v41  ;;  %v1136_v51 = vmax.f32 %v844_v46, 0.0  ;;  %5905 = vmatprep.subr.bf16.mxu0 %v6273_v44 }
 0x101   : > { %v849_v52 = vpop.f32.mrf.mxu0  ;;  %2790 = vmatprep.subr.bf16.mxu1 %v6561_v5  ;;  %5906 = vmatpush3.bf16.msra.mxu0 %v6273_v44 }
 0x102   : > { %v1137_v54 = vmax.f32 %v846_v49, 0.0  ;;  %v1254_v59 = vpack.c.bf16 %v1136_v51, %v1134_v55  ;;  %v850_v63 = vadd.f32 %v849_v52, %v6932_v33 }
 0x103   : > { %v851_v56 = vpop.f32.mrf.mxu0 }
 0x104   : > { %v1255_v57 = vpack.c.bf16 %v1137_v54, %v1135_v53  ;;  %2791 = vmatpush1.bf16.msra.mxu1 %v6266_v50  ;;  %v852_v61 = vadd.f32 %v851_v56, %v6928_v32  ;;  %v1138_v8 = vmax.f32 %v850_v63, 0.0 }
 0x105   : > { %v853_v60 = vpop.f32.mrf.mxu0  ;;  %2792 = vmatprep.subr.bf16.mxu1 %v6561_v5 }
 0x106   : > { %v854_v62 = vadd.f32 %v853_v60, %v6932_v33  ;;  %1719 = vmatprep.mubr.bf16.mxu1 %v1255_v57  ;;  %2064 = vmatprep.mubr.bf16.mxu0 %v1255_v57  ;;  %v1139_v6 = vmax.f32 %v852_v61, 0.0 }
 0x107   : > { %v855_v0 = vpop.f32.mrf.mxu0  ;;  %1720 = vmatmul.mubr.bf16.gmra.mxu1 %v1254_v59  ;;  %2065 = vmatmul.mubr.bf16.gmra.mxu0 %v1254_v59 }
 0x108   : > { %v856_v1 = vadd.f32 %v855_v0, %v6928_v32  ;;  %2793 = vmatpush2.bf16.msra.mxu1 %v6268_v58  ;;  %v1140_v3 = vmax.f32 %v854_v62, 0.0 }
 0x109   : > { %v859_v4 = vpop.f32.mrf.mxu0  ;;  %2794 = vmatprep.subr.bf16.mxu1 %v6561_v5 }
 0x10a   : > { %v1141_v7 = vmax.f32 %v856_v1, 0.0  ;;  %v1256_v12 = vpack.c.bf16 %v1140_v3, %v1138_v8  ;;  %v860_v16 = vadd.f32 %v859_v4, %v6932_v33  ;;  %v7034_v8 = vpop.f32.mrf.mxu1 }
 0x10b   : > { %v861_v9 = vpop.f32.mrf.mxu0 }
 0x10c   : > { %v1257_v10 = vpack.c.bf16 %v1141_v7, %v1139_v6  ;;  %2795 = vmatpush2.bf16.msra.mxu1 %v6269_v2  ;;  %v862_v14 = vadd.f32 %v861_v9, %v6928_v32  ;;  %v1142_v23 = vmax.f32 %v860_v16, 0.0 }
 0x10d   : > { %v863_v13 = vpop.f32.mrf.mxu0  ;;  %2796 = vmatprep.subr.bf16.mxu1 %v6561_v5 }
 0x10e   : > { %v864_v15 = vadd.f32 %v863_v13, %v6932_v33  ;;  %1729 = vmatprep.mubr.bf16.mxu1 %v1257_v10  ;;  %2072 = vmatprep.mubr.bf16.mxu0 %v1257_v10  ;;  %v1143_v21 = vmax.f32 %v862_v14, 0.0 }
 0x10f   : > { %v865_v17 = vpop.f32.mrf.mxu0  ;;  %1730 = vmatmul.mubr.bf16.gmra.mxu1 %v1256_v12  ;;  %2073 = vmatmul.mubr.bf16.gmra.mxu0 %v1256_v12 }
 0x110   : > { %v866_v18 = vadd.f32 %v865_v17, %v6928_v32  ;;  %2797 = vmatpush2.bf16.msra.mxu1 %v6271_v11  ;;  %v1144_v19 = vmax.f32 %v864_v15, 0.0  ;;  %v6274_v11 = vld [vmem:[%s8920_s5 + $0x58] sm:$0xff]   ;;  %v7039_v17 = vpop.f32.mrf.mxu1 }
 0x111   : > { %v869_v20 = vpop.f32.mrf.mxu0  ;;  %2798 = vmatprep.subr.bf16.mxu1 %v6561_v5 }
 0x112   : > { %v1145_v22 = vmax.f32 %v866_v18, 0.0  ;;  %v1258_v30 = vpack.c.bf16 %v1144_v19, %v1142_v23  ;;  %v870_v36 = vadd.f32 %v869_v20, %v6932_v33 }
 0x113   : > { %v871_v24 = vpop.f32.mrf.mxu0 }
 0x114   : > { %v1259_v25 = vpack.c.bf16 %v1145_v22, %v1143_v21  ;;  %v872_v34 = vadd.f32 %v871_v24, %v6928_v32  ;;  %v1146_v45 = vmax.f32 %v870_v36, 0.0  ;;  %2799 = vmatpush2.bf16.msra.mxu1 %v6272_v43 }
 0x115   : > { %v873_v31 = vpop.f32.mrf.mxu0  ;;  %2800 = vmatprep.subr.bf16.mxu1 %v6561_v5 }
 0x116   : > { %v874_v35 = vadd.f32 %v873_v31, %v6932_v33  ;;  %1739 = vmatprep.mubr.bf16.mxu1 %v1259_v25  ;;  %2080 = vmatprep.mubr.bf16.mxu0 %v1259_v25  ;;  %v1147_v41 = vmax.f32 %v872_v34, 0.0  ;;  %v7046_v25 = vpop.f32.mrf.mxu1 }
 0x117   : > { %v875_v37 = vpop.f32.mrf.mxu0  ;;  %1740 = vmatmul.mubr.bf16.gmra.mxu1 %v1258_v30  ;;  %2081 = vmatmul.mubr.bf16.gmra.mxu0 %v1258_v30 }
 0x118   : > { %v876_v38 = vadd.f32 %v875_v37, %v6928_v32  ;;  %v1148_v39 = vmax.f32 %v874_v35, 0.0  ;;  %2801 = vmatpush2.bf16.msra.mxu1 %v6274_v11 }
 0x119   : > { %v879_v40 = vpop.f32.mrf.mxu0  ;;  %2802 = vmatprep.subr.bf16.mxu1 %v6561_v5 }
 0x11a   : > { %v1149_v42 = vmax.f32 %v876_v38, 0.0  ;;  %v1260_v48 = vpack.c.bf16 %v1148_v39, %v1146_v45  ;;  %v880_v52 = vadd.f32 %v879_v40, %v6932_v33  ;;  %v7048_v39 = vpop.f32.mrf.mxu1 }
 0x11b   : > { %v881_v46 = vpop.f32.mrf.mxu0 }
 0x11c   : > { %v1261_v47 = vpack.c.bf16 %v1149_v42, %v1147_v41  ;;  %v882_v50 = vadd.f32 %v881_v46, %v6928_v32  ;;  %v1150_v59 = vmax.f32 %v880_v52, 0.0  ;;  %v6275_v52 = vld [vmem:[%s8920_s5 + $0x50] sm:$0xff]  }
 0x11d   : > { %v883_v49 = vpop.f32.mrf.mxu0  ;;  %2803 = vmatpush2.bf16.msra.mxu1 %v6275_v52 }
 0x11e   : > { %v884_v51 = vadd.f32 %v883_v49, %v6932_v33  ;;  %1749 = vmatprep.mubr.bf16.mxu1 %v1261_v47  ;;  %2088 = vmatprep.mubr.bf16.mxu0 %v1261_v47  ;;  %v1151_v57 = vmax.f32 %v882_v50, 0.0  ;;  %v7054_v47 = vpop.f32.mrf.mxu1 }
 0x11f   : > { %v885_v53 = vpop.f32.mrf.mxu0  ;;  %1750 = vmatmul.mubr.bf16.gmra.mxu1 %v1260_v48  ;;  %2089 = vmatmul.mubr.bf16.gmra.mxu0 %v1260_v48 }
 0x120   : > { %v886_v54 = vadd.f32 %v885_v53, %v6928_v32  ;;  %v1152_v55 = vmax.f32 %v884_v51, 0.0  ;;  %2804 = vmatprep.subr.bf16.mxu1 %v6561_v5 }
 0x121   : > { %v889_v56 = vpop.f32.mrf.mxu0 }
 0x122   : > { %v1153_v58 = vmax.f32 %v886_v54, 0.0  ;;  %v1262_v62 = vpack.c.bf16 %v1152_v55, %v1150_v59  ;;  %v890_v2 = vadd.f32 %v889_v56, %v6932_v33  ;;  %v6276_v54 = vld [vmem:[%s8920_s5 + $0x90] sm:$0xff]  }
 0x123   : > { %v891_v60 = vpop.f32.mrf.mxu0  ;;  %5907 = vmatprep.subr.bf16.mxu0 %v6276_v54 }
 0x124   : > { %v1263_v61 = vpack.c.bf16 %v1153_v58, %v1151_v57  ;;  %v892_v0 = vadd.f32 %v891_v60, %v6928_v32  ;;  %v1154_v12 = vmax.f32 %v890_v2, 0.0  ;;  %v7062_v57 = vpop.f32.mrf.mxu1  ;;  %5908 = vmatpush3.bf16.msra.mxu0 %v6276_v54 }
 0x125   : > { %v893_v63 = vpop.f32.mrf.mxu0 }
 0x126   : > { %v894_v1 = vadd.f32 %v893_v63, %v6932_v33  ;;  %1759 = vmatprep.mubr.bf16.mxu1 %v1263_v61  ;;  %2096 = vmatprep.mubr.bf16.mxu0 %v1263_v61  ;;  %v1155_v9 = vmax.f32 %v892_v0, 0.0 }
 0x127   : > { %v895_v3 = vpop.f32.mrf.mxu0  ;;  %1760 = vmatmul.mubr.bf16.gmra.mxu1 %v1262_v62  ;;  %2097 = vmatmul.mubr.bf16.gmra.mxu0 %v1262_v62 }
 0x128   : > { %v896_v4 = vadd.f32 %v895_v3, %v6928_v32  ;;  %v1156_v6 = vmax.f32 %v894_v1, 0.0  ;;  %v7069_v1 = vpop.f32.mrf.mxu1 }
 0x129   : > { %v899_v7 = vpop.f32.mrf.mxu0 }
 0x12a   : > { %v1157_v10 = vmax.f32 %v896_v4, 0.0  ;;  %v1264_v15 = vpack.c.bf16 %v1156_v6, %v1154_v12  ;;  %v900_v20 = vadd.f32 %v899_v7, %v6932_v33  ;;  %v7071_v11 = vpop.f32.mrf.mxu1 }
 0x12b   : > { %v901_v13 = vpop.f32.mrf.mxu0 }
 0x12c   : > { %v1265_v14 = vpack.c.bf16 %v1157_v10, %v1155_v9  ;;  %v902_v18 = vadd.f32 %v901_v13, %v6928_v32  ;;  %v1158_v34 = vmax.f32 %v900_v20, 0.0  ;;  %v7077_v20 = vpop.f32.mrf.mxu1 }
 0x12d   : > { %v903_v16 = vpop.f32.mrf.mxu0 }
 0x12e   : > { %v904_v19 = vadd.f32 %v903_v16, %v6932_v33  ;;  %1769 = vmatprep.mubr.bf16.mxu1 %v1265_v14  ;;  %2104 = vmatprep.mubr.bf16.mxu0 %v1265_v14  ;;  %v1159_v30 = vmax.f32 %v902_v18, 0.0 }
 0x12f   : > { %v905_v21 = vpop.f32.mrf.mxu0  ;;  %1770 = vmatmul.mubr.bf16.gmra.mxu1 %v1264_v15  ;;  %2105 = vmatmul.mubr.bf16.gmra.mxu0 %v1264_v15 }
 0x130   : > { %v906_v22 = vadd.f32 %v905_v21, %v6928_v32  ;;  %v1160_v23 = vmax.f32 %v904_v19, 0.0 }
 0x131   : > { %v909_v24 = vpop.f32.mrf.mxu0 }
 0x132   : > { %v1161_v31 = vmax.f32 %v906_v22, 0.0  ;;  %v1266_v37 = vpack.c.bf16 %v1160_v23, %v1158_v34  ;;  %v910_v42 = vadd.f32 %v909_v24, %v6932_v33 }
 0x133   : > { %v911_v35 = vpop.f32.mrf.mxu0 }
 0x134   : > { %v1267_v36 = vpack.c.bf16 %v1161_v31, %v1159_v30  ;;  %v912_v40 = vadd.f32 %v911_v35, %v6928_v32  ;;  %v1162_v50 = vmax.f32 %v910_v42, 0.0  ;;  %v6277_v30 = vld [vmem:[%s8920_s5 + $0x48] sm:$0xff]  }
 0x135   : > { %v913_v38 = vpop.f32.mrf.mxu0  ;;  %2805 = vmatpush2.bf16.msra.mxu1 %v6277_v30  ;;  %v6280_v30 = vld [vmem:[%s8920_s5 + $0x80] sm:$0xff]  }
 0x136   : > { %v914_v41 = vadd.f32 %v913_v38, %v6932_v33  ;;  %1779 = vmatprep.mubr.bf16.mxu1 %v1267_v36  ;;  %2112 = vmatprep.mubr.bf16.mxu0 %v1267_v36  ;;  %v1163_v48 = vmax.f32 %v912_v40, 0.0  ;;  %v7082_v36 = vpop.f32.mrf.mxu1 }
 0x137   : > { %v915_v43 = vpop.f32.mrf.mxu0  ;;  %1780 = vmatmul.mubr.bf16.gmra.mxu1 %v1266_v37  ;;  %2113 = vmatmul.mubr.bf16.gmra.mxu0 %v1266_v37 }
 0x138   : > { %v916_v44 = vadd.f32 %v915_v43, %v6928_v32  ;;  %v1164_v45 = vmax.f32 %v914_v41, 0.0  ;;  %2806 = vmatprep.subr.bf16.mxu1 %v6561_v5 }
 0x139   : > { %v919_v46 = vpop.f32.mrf.mxu0 }
 0x13a   : > { %v1165_v49 = vmax.f32 %v916_v44, 0.0  ;;  %v1268_v55 = vpack.c.bf16 %v1164_v45, %v1162_v50  ;;  %v920_v60 = vadd.f32 %v919_v46, %v6932_v33  ;;  %v7089_v45 = vpop.f32.mrf.mxu1 }
 0x13b   : > { %v921_v51 = vpop.f32.mrf.mxu0 }
 0x13c   : > { %v1269_v53 = vpack.c.bf16 %v1165_v49, %v1163_v48  ;;  %v922_v58 = vadd.f32 %v921_v51, %v6928_v32  ;;  %v1166_v4 = vmax.f32 %v920_v60, 0.0  ;;  %v7091_v54 = vpop.f32.mrf.mxu1 }
 0x13d   : > { %v923_v56 = vpop.f32.mrf.mxu0 }
 0x13e   : > { %v924_v59 = vadd.f32 %v923_v56, %v6932_v33  ;;  %1789 = vmatprep.mubr.bf16.mxu1 %v1269_v53  ;;  %2120 = vmatprep.mubr.bf16.mxu0 %v1269_v53  ;;  %v1167_v2 = vmax.f32 %v922_v58, 0.0 }
 0x13f   : > { %v925_v61 = vpop.f32.mrf.mxu0  ;;  %1790 = vmatmul.mubr.bf16.gmra.mxu1 %v1268_v55  ;;  %2121 = vmatmul.mubr.bf16.gmra.mxu0 %v1268_v55 }
 0x140   : > { %v926_v62 = vadd.f32 %v925_v61, %v6928_v32  ;;  %v1168_v63 = vmax.f32 %v924_v59, 0.0 }
 0x141   : > { %v929_v0 = vpop.f32.mrf.mxu0 }
 0x142   : > { %v1169_v3 = vmax.f32 %v926_v62, 0.0  ;;  %v1270_v9 = vpack.c.bf16 %v1168_v63, %v1166_v4  ;;  %v930_v14 = vadd.f32 %v929_v0, %v6932_v33  ;;  %v7097_v62 = vpop.f32.mrf.mxu1  ;;  %v6278_v4 = vld [vmem:[%s8920_s5 + $0x40] sm:$0xff]  }
 0x143   : > { %v931_v6 = vpop.f32.mrf.mxu0  ;;  %2807 = vmatpush2.bf16.msra.mxu1 %v6278_v4 }
 0x144   : > { %v1271_v7 = vpack.c.bf16 %v1169_v3, %v1167_v2  ;;  %v932_v12 = vadd.f32 %v931_v6, %v6928_v32  ;;  %v1170_v23 = vmax.f32 %v930_v14, 0.0 }
 0x145   : > { %v933_v10 = vpop.f32.mrf.mxu0 }
 0x146   : > { %v934_v13 = vadd.f32 %v933_v10, %v6932_v33  ;;  %1799 = vmatprep.mubr.bf16.mxu1 %v1271_v7  ;;  %2128 = vmatprep.mubr.bf16.mxu0 %v1271_v7  ;;  %v1171_v21 = vmax.f32 %v932_v12, 0.0  ;;  %v6279_v7 = vld [vmem:[%s8920_s5 + $0x88] sm:$0xff]   ;;  %v7105_v12 = vpop.f32.mrf.mxu1 }
 0x147   : > { %v935_v15 = vpop.f32.mrf.mxu0  ;;  %1800 = vmatmul.mubr.bf16.gmra.mxu1 %v1270_v9  ;;  %2129 = vmatmul.mubr.bf16.gmra.mxu0 %v1270_v9 }
 0x148   : > { %v936_v16 = vadd.f32 %v935_v15, %v6928_v32  ;;  %v1172_v18 = vmax.f32 %v934_v13, 0.0  ;;  %5909 = vmatprep.subr.bf16.mxu0 %v6279_v7 }
 0x149   : > { %v939_v19 = vpop.f32.mrf.mxu0  ;;  %5910 = vmatpush3.bf16.msra.mxu0 %v6279_v7 }
 0x14a   : > { %v1173_v22 = vmax.f32 %v936_v16, 0.0  ;;  %v1272_v34 = vpack.c.bf16 %v1172_v18, %v1170_v23  ;;  %v940_v40 = vadd.f32 %v939_v19, %v6932_v33  ;;  %5911 = vmatprep.subr.bf16.mxu0 %v6280_v30 }
 0x14b   : > { %v941_v24 = vpop.f32.mrf.mxu0 }
 0x14c   : > { %v1273_v31 = vpack.c.bf16 %v1173_v22, %v1171_v21  ;;  %v942_v37 = vadd.f32 %v941_v24, %v6928_v32  ;;  %v1174_v49 = vmax.f32 %v940_v40, 0.0  ;;  %v7111_v22 = vpop.f32.mrf.mxu1 }
 0x14d   : > { %v943_v35 = vpop.f32.mrf.mxu0  ;;  %5912 = vmatpush3.bf16.msra.mxu0 %v6280_v30 }
 0x14e   : > { %v944_v38 = vadd.f32 %v943_v35, %v6932_v33  ;;  %1809 = vmatprep.mubr.bf16.mxu1 %v1273_v31  ;;  %2136 = vmatprep.mubr.bf16.mxu0 %v1273_v31  ;;  %v1175_v46 = vmax.f32 %v942_v37, 0.0  ;;  %v7116_v40 = vpop.f32.mrf.mxu1 }
 0x14f   : > { %v945_v41 = vpop.f32.mrf.mxu0  ;;  %1810 = vmatmul.mubr.bf16.gmra.mxu1 %v1272_v34  ;;  %2137 = vmatmul.mubr.bf16.gmra.mxu0 %v1272_v34 }
 0x150   : > { %v946_v42 = vadd.f32 %v945_v41, %v6928_v32  ;;  %v1176_v43 = vmax.f32 %v944_v38, 0.0 }
 0x151   : > { %v949_v44 = vpop.f32.mrf.mxu0 }
 0x152   : > { %v1177_v48 = vmax.f32 %v946_v42, 0.0  ;;  %v1274_v52 = vpack.c.bf16 %v1176_v43, %v1174_v49  ;;  %v950_v5 = vadd.f32 %v949_v44, %v6932_v33 }
 0x153   : > { %v951_v50 = vpop.f32.mrf.mxu0 }
 0x154   : > { %v1275_v51 = vpack.c.bf16 %v1177_v48, %v1175_v46  ;;  %v952_v55 = vadd.f32 %v951_v50, %v6928_v32  ;;  %v1178_v2 = vmax.f32 %v950_v5, 0.0  ;;  %v7122_v50 = vpop.f32.mrf.mxu1 }
 0x155   : > { %v953_v53 = vpop.f32.mrf.mxu0 }
 0x156   : > { %v954_v56 = vadd.f32 %v953_v53, %v6932_v33  ;;  %1819 = vmatprep.mubr.bf16.mxu1 %v1275_v51  ;;  %2144 = vmatprep.mubr.bf16.mxu0 %v1275_v51  ;;  %v1179_v63 = vmax.f32 %v952_v55, 0.0 }
 0x157   : > { %v955_v58 = vpop.f32.mrf.mxu0  ;;  %1820 = vmatmul.mubr.bf16.gmra.mxu1 %v1274_v52  ;;  %2145 = vmatmul.mubr.bf16.gmra.mxu0 %v1274_v52 }
 0x158   : > { %v956_v59 = vadd.f32 %v955_v58, %v6928_v32  ;;  %v1180_v60 = vmax.f32 %v954_v56, 0.0  ;;  %v7127_v56 = vld [vmem:[%s8922_s7 + $0x38] sm:$0xff]  }
 0x159   : > { %v959_v61 = vpop.f32.mrf.mxu0  ;;  %5977 = vmatprep.subr.bf16.mxu1 %v7127_v56 }
 0x15a   : > { %v1181_v0 = vmax.f32 %v956_v59, 0.0  ;;  %v1276_v9 = vpack.c.bf16 %v1180_v60, %v1178_v2  ;;  %v960_v15 = vadd.f32 %v959_v61, %v6932_v33  ;;  %v7129_v60 = vpop.f32.mrf.mxu1 }
 0x15b   : > { %v961_v3 = vpop.f32.mrf.mxu0 }
 0x15c   : > { %v1277_v6 = vpack.c.bf16 %v1181_v0, %v1179_v63  ;;  %v962_v13 = vadd.f32 %v961_v3, %v6928_v32  ;;  %v1182_v31 = vmax.f32 %v960_v15, 0.0  ;;  %v7136_v7 = vpop.f32.mrf.mxu1 }
 0x15d   : > { %v963_v10 = vpop.f32.mrf.mxu0 }
 0x15e   : > { %v964_v14 = vadd.f32 %v963_v10, %v6932_v33  ;;  %1829 = vmatprep.mubr.bf16.mxu1 %v1277_v6  ;;  %2152 = vmatprep.mubr.bf16.mxu0 %v1277_v6  ;;  %v1183_v23 = vmax.f32 %v962_v13, 0.0 }
 0x15f   : > { %v965_v16 = vpop.f32.mrf.mxu0  ;;  %1830 = vmatmul.mubr.bf16.gmra.mxu1 %v1276_v9  ;;  %2153 = vmatmul.mubr.bf16.gmra.mxu0 %v1276_v9 }
 0x160   : > { %v966_v18 = vadd.f32 %v965_v16, %v6928_v32  ;;  %v1184_v19 = vmax.f32 %v964_v14, 0.0 }
 0x161   : > { %v969_v21 = vpop.f32.mrf.mxu0 }
 0x162   : > { %v1185_v24 = vmax.f32 %v966_v18, 0.0  ;;  %v1278_v37 = vpack.c.bf16 %v1184_v19, %v1182_v31  ;;  %v970_v43 = vadd.f32 %v969_v21, %v6932_v33  ;;  %v7138_v19 = vpop.f32.mrf.mxu1 }
 0x163   : > { %v971_v34 = vpop.f32.mrf.mxu0 }
 0x164   : > { %v1279_v35 = vpack.c.bf16 %v1185_v24, %v1183_v23  ;;  %v972_v41 = vadd.f32 %v971_v34, %v6928_v32  ;;  %v1186_v53 = vmax.f32 %v970_v43, 0.0 }
 0x165   : > { %v973_v38 = vpop.f32.mrf.mxu0 }
 0x166   : > { %v974_v42 = vadd.f32 %v973_v38, %v6932_v33  ;;  %1839 = vmatprep.mubr.bf16.mxu1 %v1279_v35  ;;  %2160 = vmatprep.mubr.bf16.mxu0 %v1279_v35  ;;  %v1187_v51 = vmax.f32 %v972_v41, 0.0 }
 0x167   : > { %v975_v44 = vpop.f32.mrf.mxu0  ;;  %1840 = vmatmul.mubr.bf16.gmra.mxu1 %v1278_v37  ;;  %2161 = vmatmul.mubr.bf16.gmra.mxu0 %v1278_v37  ;;  %v7144_v37 = vpop.f32.mrf.mxu1 }
 0x168   : > { %v976_v46 = vadd.f32 %v975_v44, %v6928_v32  ;;  %v1188_v48 = vmax.f32 %v974_v42, 0.0 }
 0x169   : > { %v979_v49 = vpop.f32.mrf.mxu0 }
 0x16a   : > { %v1189_v52 = vmax.f32 %v976_v46, 0.0  ;;  %v1280_v58 = vpack.c.bf16 %v1188_v48, %v1186_v53  ;;  %v980_v0 = vadd.f32 %v979_v49, %v6932_v33  ;;  %v7146_v49 = vpop.f32.mrf.mxu1 }
 0x16b   : > { %v981_v55 = vpop.f32.mrf.mxu0 }
 0x16c   : > { %v1281_v5 = vpack.c.bf16 %v1189_v52, %v1187_v51  ;;  %v982_v61 = vadd.f32 %v981_v55, %v6928_v32  ;;  %v1190_v13 = vmax.f32 %v980_v0, 0.0 }
 0x16d   : > { %v983_v59 = vpop.f32.mrf.mxu0 }
 0x16e   : > { %v984_v63 = vadd.f32 %v983_v59, %v6932_v33  ;;  %1849 = vmatprep.mubr.bf16.mxu1 %v1281_v5  ;;  %2168 = vmatprep.mubr.bf16.mxu0 %v1281_v5  ;;  %v1191_v9 = vmax.f32 %v982_v61, 0.0  ;;  %v7152_v61 = vpop.f32.mrf.mxu1 }
 0x16f   : > { %v985_v2 = vpop.f32.mrf.mxu0  ;;  %1850 = vmatmul.mubr.bf16.gmra.mxu1 %v1280_v58  ;;  %2169 = vmatmul.mubr.bf16.gmra.mxu0 %v1280_v58 }
 0x170   : > { %v986_v3 = vadd.f32 %v985_v2, %v6928_v32  ;;  %v1192_v4 = vmax.f32 %v984_v63, 0.0 }
 0x171   : > { %v989_v6 = vpop.f32.mrf.mxu0 }
 0x172   : > { %v1193_v10 = vmax.f32 %v986_v3, 0.0  ;;  %v1282_v16 = vpack.c.bf16 %v1192_v4, %v1190_v13  ;;  %v990_v24 = vadd.f32 %v989_v6, %v6932_v33 }
 0x173   : > { %v991_v14 = vpop.f32.mrf.mxu0 }
 0x174   : > { %v1283_v15 = vpack.c.bf16 %v1193_v10, %v1191_v9  ;;  %v992_v21 = vadd.f32 %v991_v14, %v6928_v32  ;;  %v1194_v42 = vmax.f32 %v990_v24, 0.0  ;;  %v7154_v10 = vpop.f32.mrf.mxu1 }
 0x175   : > { %v993_v18 = vpop.f32.mrf.mxu0 }
 0x176   : > { %v994_v23 = vadd.f32 %v993_v18, %v6932_v33  ;;  %1859 = vmatprep.mubr.bf16.mxu1 %v1283_v15  ;;  %2176 = vmatprep.mubr.bf16.mxu0 %v1283_v15  ;;  %v1195_v38 = vmax.f32 %v992_v21, 0.0  ;;  %v7160_v24 = vpop.f32.mrf.mxu1 }
 0x177   : > { %v995_v30 = vpop.f32.mrf.mxu0  ;;  %1860 = vmatmul.mubr.bf16.gmra.mxu1 %v1282_v16  ;;  %2177 = vmatmul.mubr.bf16.gmra.mxu0 %v1282_v16 }
 0x178   : > { %v996_v31 = vadd.f32 %v995_v30, %v6928_v32  ;;  %v1196_v34 = vmax.f32 %v994_v23, 0.0 }
 0x179   : > { %v999_v35 = vpop.f32.mrf.mxu0 }
 0x17a   : > { %v1197_v41 = vmax.f32 %v996_v31, 0.0  ;;  %v1284_v46 = vpack.c.bf16 %v1196_v34, %v1194_v42  ;;  %v1000_v53 = vadd.f32 %v999_v35, %v6932_v33 }
 0x17b   : > { %v1001_v43 = vpop.f32.mrf.mxu0 }
 0x17c   : > { %v1285_v44 = vpack.c.bf16 %v1197_v41, %v1195_v38  ;;  %v1002_v51 = vadd.f32 %v1001_v43, %v6928_v32  ;;  %v1198_v2 = vmax.f32 %v1000_v53, 0.0  ;;  %v7162_v43 = vpop.f32.mrf.mxu1 }
 0x17d   : > { %v1003_v48 = vpop.f32.mrf.mxu0 }
 0x17e   : > { %v1004_v52 = vadd.f32 %v1003_v48, %v6932_v33  ;;  %1869 = vmatprep.mubr.bf16.mxu1 %v1285_v44  ;;  %2184 = vmatprep.mubr.bf16.mxu0 %v1285_v44  ;;  %v1199_v63 = vmax.f32 %v1002_v51, 0.0 }
 0x17f   : > { %v1005_v55 = vpop.f32.mrf.mxu0  ;;  %1870 = vmatmul.mubr.bf16.gmra.mxu1 %v1284_v46  ;;  %2185 = vmatmul.mubr.bf16.gmra.mxu0 %v1284_v46 }
 0x180   : > { %v1006_v5 = vadd.f32 %v1005_v55, %v6928_v32  ;;  %v1200_v58 = vmax.f32 %v1004_v52, 0.0 }
 0x181   : > { %v1009_v59 = vpop.f32.mrf.mxu0 }
 0x182   : > { %v1201_v0 = vmax.f32 %v1006_v5, 0.0  ;;  %v1286_v6 = vpack.c.bf16 %v1200_v58, %v1198_v2  ;;  %v1010_v15 = vadd.f32 %v1009_v59, %v6932_v33  ;;  %v7168_v5 = vpop.f32.mrf.mxu1 }
 0x183   : > { %v1011_v3 = vpop.f32.mrf.mxu0 }
 0x184   : > { %v1287_v4 = vpack.c.bf16 %v1201_v0, %v1199_v63  ;;  %v1012_v13 = vadd.f32 %v1011_v3, %v6928_v32  ;;  %v1202_v34 = vmax.f32 %v1010_v15, 0.0  ;;  %v1042_v3 = vadd.f32 %v7039_v17, %v6928_v32 }
 0x185   : > { %v1013_v9 = vpop.f32.mrf.mxu0 }
 0x186   : > { %v1014_v14 = vadd.f32 %v1013_v9, %v6932_v33  ;;  %1879 = vmatprep.mubr.bf16.mxu1 %v1287_v4  ;;  %2192 = vmatprep.mubr.bf16.mxu0 %v1287_v4  ;;  %v1203_v30 = vmax.f32 %v1012_v13, 0.0  ;;  %v7172_v9 = vpop.f32.mrf.mxu1  ;;  %v1046_v13 = vadd.f32 %v7048_v39, %v6928_v32 }
 0x187   : > { %v1015_v16 = vpop.f32.mrf.mxu0  ;;  %1880 = vmatmul.mubr.bf16.gmra.mxu1 %v1286_v6  ;;  %2193 = vmatmul.mubr.bf16.gmra.mxu0 %v1286_v6 }
 0x188   : > { %v1016_v18 = vadd.f32 %v1015_v16, %v6928_v32  ;;  %v1204_v21 = vmax.f32 %v1014_v14, 0.0 }
 0x189   : > { %v1019_v23 = vpop.f32.mrf.mxu0 }
 0x18a   : > { %v1205_v31 = vmax.f32 %v1016_v18, 0.0  ;;  %v1288_v41 = vpack.c.bf16 %v1204_v21, %v1202_v34  ;;  %v1020_v48 = vadd.f32 %v1019_v23, %v6932_v33  ;;  %v7180_v23 = vpop.f32.mrf.mxu1 }
 0x18b   : > { %v1021_v35 = vpop.f32.mrf.mxu0 }
 0x18c   : > { %v1289_v38 = vpack.c.bf16 %v1205_v31, %v1203_v30  ;;  %v1022_v44 = vadd.f32 %v1021_v35, %v6928_v32  ;;  %v1206_v63 = vmax.f32 %v1020_v48, 0.0  ;;  %v1215_v30 = vmax.f32 %v1042_v3, 0.0 }
 0x18d   : > { %v1023_v42 = vpop.f32.mrf.mxu0  ;;  %v1217_v31 = vmax.f32 %v1046_v13, 0.0  ;;  %v1052_v48 = vadd.f32 %v7062_v57, %v6928_v32  ;;  %v1050_v57 = vadd.f32 %v7054_v47, %v6932_v33 }
 0x18e   : > { %v1024_v46 = vadd.f32 %v1023_v42, %v6932_v33  ;;  %1889 = vmatprep.mubr.bf16.mxu1 %v1289_v38  ;;  %2200 = vmatprep.mubr.bf16.mxu0 %v1289_v38  ;;  %v1207_v58 = vmax.f32 %v1022_v44, 0.0  ;;  %v1044_v42 = vadd.f32 %v7046_v25, %v6932_v33 }
 0x18f   : > { %v1025_v51 = vpop.f32.mrf.mxu0  ;;  %1890 = vmatmul.mubr.bf16.gmra.mxu1 %v1288_v41  ;;  %2201 = vmatmul.mubr.bf16.gmra.mxu0 %v1288_v41  ;;  %v1040_v41 = vadd.f32 %v7034_v8, %v6932_v33  ;;  %v1219_v25 = vmax.f32 %v1052_v48, 0.0  ;;  %v1218_v47 = vmax.f32 %v1050_v57, 0.0  ;;  %v1086_v57 = vadd.f32 %v7138_v19, %v6928_v32 }
 0x190   : > { %v1026_v52 = vadd.f32 %v1025_v51, %v6928_v32  ;;  %v1208_v53 = vmax.f32 %v1024_v46, 0.0  ;;  %v7186_v46 = vpop.f32.mrf.mxu1  ;;  %v1056_v51 = vadd.f32 %v7071_v11, %v6928_v32  ;;  %v1054_v11 = vadd.f32 %v7069_v1, %v6932_v33 }
 0x191   : > { %v1029_v55 = vpop.f32.mrf.mxu0  ;;  %v1214_v8 = vmax.f32 %v1040_v41, 0.0 }
 0x192   : > { %v1209_v59 = vmax.f32 %v1026_v52, 0.0  ;;  %v1290_v4 = vpack.c.bf16 %v1208_v53, %v1206_v63  ;;  %v1030_v16 = vadd.f32 %v1029_v55, %v6932_v33  ;;  %v1295_v52 = vpack.c.bf16 %v1217_v31, %v1215_v30  ;;  %v7192_v55 = vpop.f32.mrf.mxu1 }
 0x193   : > { %v1031_v0 = vpop.f32.mrf.mxu0  ;;  %v1216_v53 = vmax.f32 %v1044_v42, 0.0  ;;  %v1220_v13 = vmax.f32 %v1054_v11, 0.0 }
 0x194   : > { %v1291_v2 = vpack.c.bf16 %v1209_v59, %v1207_v58  ;;  %v1032_v14 = vadd.f32 %v1031_v0, %v6928_v32  ;;  %v1210_v35 = vmax.f32 %v1030_v16, 0.0  ;;  %v1221_v58 = vmax.f32 %v1056_v51, 0.0  ;;  %v7198_v63 = vpop.f32.mrf.mxu1 }
 0x195   : > { %v1033_v6 = vpop.f32.mrf.mxu0  ;;  %v1294_v59 = vpack.c.bf16 %v1216_v53, %v1214_v8  ;;  %v1062_v0 = vadd.f32 %v7082_v36, %v6928_v32  ;;  %v1070_v8 = vadd.f32 %v7097_v62, %v6932_v33  ;;  %v1074_v53 = vadd.f32 %v7111_v22, %v6932_v33 }
 0x196   : > { %v1034_v15 = vadd.f32 %v1033_v6, %v6932_v33  ;;  %1899 = vmatprep.mubr.bf16.mxu1 %v1291_v2  ;;  %2208 = vmatprep.mubr.bf16.mxu0 %v1291_v2  ;;  %v1211_v34 = vmax.f32 %v1032_v14, 0.0  ;;  %v1066_v2 = vadd.f32 %v7091_v54, %v6928_v32  ;;  %v1297_v3 = vpack.c.bf16 %v1221_v58, %v1219_v25 }
 0x197   : > { %v1035_v18 = vpop.f32.mrf.mxu0  ;;  %1900 = vmatmul.mubr.bf16.gmra.mxu1 %v1290_v4  ;;  %2209 = vmatmul.mubr.bf16.gmra.mxu0 %v1290_v4  ;;  %v1296_v54 = vpack.c.bf16 %v1220_v13, %v1218_v47  ;;  %v1226_v62 = vmax.f32 %v1070_v8, 0.0  ;;  %v1228_v22 = vmax.f32 %v1074_v53, 0.0  ;;  %v1090_v8 = vadd.f32 %v7144_v37, %v6932_v33 }
 0x198   : > { %v1036_v17 = vadd.f32 %v1035_v18, %v6928_v32  ;;  %v1212_v21 = vmax.f32 %v1034_v15, 0.0  ;;  %v1223_v15 = vmax.f32 %v1062_v0, 0.0  ;;  %v1225_v16 = vmax.f32 %v1066_v2, 0.0 }
 0x199   : > { %v1300_v19 = vpack.c.bf16 %v1228_v22, %v1226_v62  ;;  %v1094_v53 = vadd.f32 %v7152_v61, %v6932_v33  ;;  %v1234_v37 = vmax.f32 %v1090_v8, 0.0 }
 0x19a   : > { %v1213_v39 = vmax.f32 %v1036_v17, 0.0  ;;  %v1292_v44 = vpack.c.bf16 %v1212_v21, %v1210_v35  ;;  %v1060_v17 = vadd.f32 %v7077_v20, %v6932_v33  ;;  %v1064_v21 = vadd.f32 %v7089_v45, %v6932_v33 }
 0x19b   : > { %v1299_v35 = vpack.c.bf16 %v1225_v16, %v1223_v15  ;;  %v1080_v16 = vadd.f32 %v7122_v50, %v6932_v33  ;;  %v1236_v61 = vmax.f32 %v1094_v53, 0.0 }
 0x19c   : > { %v1293_v38 = vpack.c.bf16 %v1213_v39, %v1211_v34  ;;  %v1072_v34 = vadd.f32 %v7105_v12, %v6928_v32  ;;  %v1076_v39 = vadd.f32 %v7116_v40, %v6928_v32  ;;  %v1222_v20 = vmax.f32 %v1060_v17, 0.0 }
 0x19d   : > { %v1224_v45 = vmax.f32 %v1064_v21, 0.0  ;;  %v1230_v50 = vmax.f32 %v1080_v16, 0.0 }
 0x19e   : > { %1909 = vmatprep.mubr.bf16.mxu1 %v1293_v38  ;;  %2216 = vmatprep.mubr.bf16.mxu0 %v1293_v38  ;;  %v1227_v48 = vmax.f32 %v1072_v34, 0.0  ;;  %v1229_v51 = vmax.f32 %v1076_v39, 0.0  ;;  %v1096_v34 = vadd.f32 %v7154_v10, %v6928_v32 }
 0x19f   : > { %1910 = vmatmul.mubr.bf16.gmra.mxu1 %v1292_v44  ;;  %2217 = vmatmul.mubr.bf16.gmra.mxu0 %v1292_v44  ;;  %v1298_v40 = vpack.c.bf16 %v1224_v45, %v1222_v20 }
 0x1a0   : > { %1919 = vmatprep.mubr.bf16.mxu1 %v1295_v52  ;;  %2224 = vmatprep.mubr.bf16.mxu0 %v1295_v52  ;;  %v1301_v11 = vpack.c.bf16 %v1229_v51, %v1227_v48  ;;  %v1237_v51 = vmax.f32 %v1096_v34, 0.0 }
 0x1a7   : > { %v7204_v4 = vpop.f32.mrf.mxu1  ;;  %1920 = vmatmul.mubr.bf16.gmra.mxu1 %v1294_v59  ;;  %v7206_v6 = vpop.f32.mrf.mxu0  ;;  %2225 = vmatmul.mubr.bf16.gmra.mxu0 %v1294_v59  ;;  %v1082_v59 = vadd.f32 %v7129_v60, %v6928_v32 }
 0x1a8   : > { %1929 = vmatprep.mubr.bf16.mxu1 %v1297_v3  ;;  %2232 = vmatprep.mubr.bf16.mxu0 %v1297_v3 }
 0x1a9   : > { %v7208_v1 = vpop.f32.mrf.mxu1  ;;  %v2036_v14 = vpop.f32.mrf.mxu0  ;;  %v1231_v13 = vmax.f32 %v1082_v59, 0.0 }
 0x1aa   : > { %v1233_v14 = vmax.f32 %v1086_v57, 0.0  ;;  %v1102_v57 = vadd.f32 %v7162_v43, %v6928_v32 }
 0x1ab   : > { %v7210_v36 = vpop.f32.mrf.mxu1  ;;  %v7212_v18 = vpop.f32.mrf.mxu0 }
 0x1ac   : > { %v1303_v39 = vpack.c.bf16 %v1233_v14, %v1231_v13 }
 0x1ad   : > { %v7218_v30 = vpop.f32.mrf.mxu1  ;;  %v2039_v31 = vpop.f32.mrf.mxu0 }
 0x1ae   : > { %v1092_v31 = vadd.f32 %v7146_v49, %v6928_v32 }
 0x1af   : > { %v7224_v38 = vpop.f32.mrf.mxu1  ;;  %1930 = vmatmul.mubr.bf16.gmra.mxu1 %v1296_v54  ;;  %v7226_v41 = vpop.f32.mrf.mxu0  ;;  %2233 = vmatmul.mubr.bf16.gmra.mxu0 %v1296_v54  ;;  %v1084_v54 = vadd.f32 %v7136_v7, %v6932_v33 }
 0x1b0   : > { %1939 = vmatprep.mubr.bf16.mxu1 %v1299_v35  ;;  %2240 = vmatprep.mubr.bf16.mxu0 %v1299_v35  ;;  %v1235_v48 = vmax.f32 %v1092_v31, 0.0  ;;  %v1104_v31 = vadd.f32 %v7168_v5, %v6932_v33 }
 0x1b1   : > { %v7228_v42 = vpop.f32.mrf.mxu1  ;;  %v2044_v44 = vpop.f32.mrf.mxu0  ;;  %v1232_v7 = vmax.f32 %v1084_v54, 0.0 }
 0x1b2   : > { %v1305_v62 = vpack.c.bf16 %v1237_v51, %v1235_v48 }
 0x1b3   : > { %v7230_v12 = vpop.f32.mrf.mxu1  ;;  %v7232_v52 = vpop.f32.mrf.mxu0  ;;  %v1302_v10 = vpack.c.bf16 %v1232_v7, %v1230_v50  ;;  %v1112_v50 = vadd.f32 %v7186_v46, %v6928_v32  ;;  %v1116_v7 = vadd.f32 %v7198_v63, %v6928_v32  ;;  %v1374_v46 = vld [vmem:[%s8919_s4] sm:$0x7] }
 0x1b5   : > { %v7238_v25 = vpop.f32.mrf.mxu1  ;;  %v2047_v58 = vpop.f32.mrf.mxu0  ;;  %v1243_v63 = vmax.f32 %v1112_v50, 0.0  ;;  %v1245_v53 = vmax.f32 %v1116_v7, 0.0 }
 0x1b7   : > { %v7244_v0 = vpop.f32.mrf.mxu1  ;;  %1940 = vmatmul.mubr.bf16.gmra.mxu1 %v1298_v40  ;;  %v7246_v2 = vpop.f32.mrf.mxu0  ;;  %2241 = vmatmul.mubr.bf16.gmra.mxu0 %v1298_v40 }
 0x1b8   : > { %1949 = vmatprep.mubr.bf16.mxu1 %v1301_v11  ;;  %2248 = vmatprep.mubr.bf16.mxu0 %v1301_v11  ;;  %v1106_v11 = vadd.f32 %v7172_v9, %v6928_v32  ;;  %v1304_v9 = vpack.c.bf16 %v1236_v61, %v1234_v37  ;;  %v1110_v61 = vadd.f32 %v7180_v23, %v6932_v33 }
 0x1b9   : > { %v7248_v3 = vpop.f32.mrf.mxu1  ;;  %v2052_v47 = vpop.f32.mrf.mxu0 }
 0x1ba   : > { %v1241_v16 = vmax.f32 %v1106_v11, 0.0 }
 0x1bb   : > { %v7250_v60 = vpop.f32.mrf.mxu1  ;;  %v7252_v15 = vpop.f32.mrf.mxu0 }
 0x1bd   : > { %v7258_v17 = vpop.f32.mrf.mxu1  ;;  %v2055_v21 = vpop.f32.mrf.mxu0 }
 0x1be   : > { %v1100_v21 = vadd.f32 %v7160_v24, %v6932_v33  ;;  %v1386_v24 = vsub.s32 2, %v6919_v27 }
 0x1bf   : > { %v7264_v35 = vpop.f32.mrf.mxu1  ;;  %1950 = vmatmul.mubr.bf16.gmra.mxu1 %v1300_v19  ;;  %v7266_v20 = vpop.f32.mrf.mxu0  ;;  %2249 = vmatmul.mubr.bf16.gmra.mxu0 %v1300_v19  ;;  %v1239_v19 = vmax.f32 %v1102_v57, 0.0 }
 0x1c0   : > { %1959 = vmatprep.mubr.bf16.mxu1 %v1303_v39  ;;  %2256 = vmatprep.mubr.bf16.mxu0 %v1303_v39  ;;  %v1238_v5 = vmax.f32 %v1100_v21, 0.0  ;;  %v7318_v11 = vrot.slane %v1374_v46, %v1386_v24  ;;  %v7346_v24 = vrot.slane %v1374_v46, %v465_v29 }
 0x1c1   : > { %v7268_v45 = vpop.f32.mrf.mxu1  ;;  %v2060_v44 = vpop.f32.mrf.mxu0 }
 0x1c2   : > { %v1307_v44 = vpack.c.bf16 %v1241_v16, %v1239_v19  ;;  %v2035_v23 = vadd.f32 %v7206_v6, %v7318_v11  ;;  %v2054_v29 = vadd.f32 %v7252_v15, %v7318_v11 }
 0x1c3   : > { %v7270_v49 = vpop.f32.mrf.mxu1  ;;  %v7272_v40 = vpop.f32.mrf.mxu0 }
 0x1c4   : > { %v2291_v6 = vmax.f32 %v2035_v23, 0.0 }
 0x1c5   : > { %v7278_v58 = vpop.f32.mrf.mxu1  ;;  %v2063_v59 = vpop.f32.mrf.mxu0 }
 0x1c7   : > { %v7284_v22 = vpop.f32.mrf.mxu1  ;;  %1960 = vmatmul.mubr.bf16.gmra.mxu1 %v1302_v10  ;;  %v7286_v47 = vpop.f32.mrf.mxu0  ;;  %2257 = vmatmul.mubr.bf16.gmra.mxu0 %v1302_v10  ;;  %v1240_v10 = vmax.f32 %v1104_v31, 0.0  ;;  %v1309_v31 = vpack.c.bf16 %v1245_v53, %v1243_v63  ;;  %v1686_v63 = vadd.f32 %v7210_v36, %v7346_v24  ;;  %v2046_v53 = vadd.f32 %v7232_v52, %v7318_v11 }
 0x1c8   : > { %1969 = vmatprep.mubr.bf16.mxu1 %v1305_v62  ;;  %2264 = vmatprep.mubr.bf16.mxu0 %v1305_v62  ;;  %v7322_v62 = vrot.slane %v1374_v46, %v469_v28  ;;  %v2043_v36 = vadd.f32 %v7226_v41, %v7318_v11 }
 0x1c9   : > { %v7288_v13 = vpop.f32.mrf.mxu1  ;;  %v2068_v14 = vpop.f32.mrf.mxu0  ;;  %v1306_v37 = vpack.c.bf16 %v1240_v10, %v1238_v5  ;;  %v2292_v15 = vmax.f32 %v1686_v63, 0.0 }
 0x1ca   : > { %v1114_v14 = vadd.f32 %v7192_v55, %v6932_v33  ;;  %v1688_v21 = vadd.f32 %v7218_v30, %v7322_v62  ;;  %v1684_v33 = vadd.f32 %v7208_v1, %v7322_v62  ;;  %v1242_v55 = vmax.f32 %v1110_v61, 0.0 }
 0x1cb   : > { %v7290_v43 = vpop.f32.mrf.mxu1  ;;  %v7292_v54 = vpop.f32.mrf.mxu0  ;;  %v1698_v27 = vadd.f32 %v7238_v25, %v7322_v62  ;;  %v2051_v25 = vadd.f32 %v7246_v2, %v7318_v11  ;;  %v1696_v2 = vadd.f32 %v7230_v12, %v7346_v24  ;;  %v1692_v12 = vadd.f32 %v7224_v38, %v7346_v24 }
 0x1cd   : > { %v7298_v34 = vpop.f32.mrf.mxu1  ;;  %v2071_v39 = vpop.f32.mrf.mxu0  ;;  %v2299_v41 = vmax.f32 %v1698_v27, 0.0  ;;  %v2070_v27 = vadd.f32 %v7292_v54, %v7318_v11  ;;  %v2067_v54 = vadd.f32 %v7286_v47, %v7318_v11 }
 0x1cf   : > { %v7304_v48 = vpop.f32.mrf.mxu1  ;;  %1970 = vmatmul.mubr.bf16.gmra.mxu1 %v1304_v9  ;;  %v7306_v51 = vpop.f32.mrf.mxu0  ;;  %2265 = vmatmul.mubr.bf16.gmra.mxu0 %v1304_v9  ;;  %v2038_v9 = vadd.f32 %v7212_v18, %v7318_v11  ;;  %v1244_v18 = vmax.f32 %v1114_v14, 0.0 }
 0x1d0   : > { %1979 = vmatprep.mubr.bf16.mxu1 %v1307_v44  ;;  %2272 = vmatprep.mubr.bf16.mxu0 %v1307_v44  ;;  %v2293_v44 = vmax.f32 %v1688_v21, 0.0  ;;  %v1694_v21 = vadd.f32 %v7228_v42, %v7322_v62  ;;  %v2303_v42 = vmax.f32 %v2051_v25, 0.0 }
 0x1d1   : > { %v7312_v8 = vpop.f32.mrf.mxu1  ;;  %v2076_v32 = vpop.f32.mrf.mxu0  ;;  %v2294_v7 = vmax.f32 %v2038_v9, 0.0  ;;  %v1308_v1 = vpack.c.bf16 %v1244_v18, %v1242_v55  ;;  %v2297_v18 = vmax.f32 %v2043_v36, 0.0 }
 0x1d2   : > { %v2290_v32 = vmax.f32 %v1684_v33, 0.0  ;;  %v2306_v33 = vmax.f32 %v2054_v29, 0.0 }
 0x1d3   : > { %v7314_v59 = vpop.f32.mrf.mxu1  ;;  %v7316_v57 = vpop.f32.mrf.mxu0  ;;  %v2483_v14 = vpack.c.bf16 %v2294_v7, %v2291_v6 }
 0x1d4   : > { %v2482_v46 = vpack.c.bf16 %v2293_v44, %v2290_v32  ;;  %v2296_v44 = vmax.f32 %v1694_v21, 0.0  ;;  %v2298_v21 = vmax.f32 %v1696_v2, 0.0 }
 0x1d5   : > { %v7328_v19 = vpop.f32.mrf.mxu1  ;;  %v2079_v16 = vpop.f32.mrf.mxu0 }
 0x1d6   : > { %v1682_v16 = vadd.f32 %v7204_v4, %v7346_v24  ;;  %v2485_v29 = vpack.c.bf16 %v2299_v41, %v2296_v44 }
 0x1d7   : > { %v7334_v39 = vpop.f32.mrf.mxu1  ;;  %1980 = vmatmul.mubr.bf16.gmra.mxu1 %v1306_v37  ;;  %v7336_v28 = vpop.f32.mrf.mxu0  ;;  %2273 = vmatmul.mubr.bf16.gmra.mxu0 %v1306_v37 }
 0x1d8   : > { %1989 = vmatprep.mubr.bf16.mxu1 %v1309_v31  ;;  %2280 = vmatprep.mubr.bf16.mxu0 %v1309_v31  ;;  %v2300_v31 = vmax.f32 %v2046_v53, 0.0  ;;  %v2289_v55 = vmax.f32 %v1682_v16, 0.0 }
 0x1d9   : > { %v7342_v50 = vpop.f32.mrf.mxu1  ;;  %v2084_v30 = vpop.f32.mrf.mxu0 }
 0x1da   : > { %v2481_v6 = vpack.c.bf16 %v2292_v15, %v2289_v55  ;;  %v2486_v32 = vpack.c.bf16 %v2300_v31, %v2297_v18  ;;  %v2318_v31 = vmax.f32 %v2070_v27, 0.0  ;;  %v2315_v18 = vmax.f32 %v2067_v54, 0.0 }
 0x1db   : > { %v7348_v5 = vpop.f32.mrf.mxu1  ;;  %v7350_v10 = vpop.f32.mrf.mxu0  ;;  %v2075_v27 = vadd.f32 %v7306_v51, %v7318_v11 }
 0x1dd   : > { %v7356_v37 = vpop.f32.mrf.mxu1  ;;  %v2087_v61 = vpop.f32.mrf.mxu0 }
 0x1de   : > { %v2489_v61 = vpack.c.bf16 %v2306_v33, %v2303_v42 }
 0x1df   : > { %v7366_v9 = vpop.f32.mrf.mxu1  ;;  %1990 = vmatmul.mubr.bf16.gmra.mxu1 %v1308_v1  ;;  %v7368_v52 = vpop.f32.mrf.mxu0  ;;  %2281 = vmatmul.mubr.bf16.gmra.mxu0 %v1308_v1  ;;  %v2062_v1 = vadd.f32 %v7272_v40, %v7318_v11  ;;  %v2059_v40 = vadd.f32 %v7266_v20, %v7318_v11 }
 0x1e0   : > { %2808 = vmatprep.mubr.bf16.mxu1 %v2482_v46  ;;  %5913 = vmatprep.mubr.bf16.mxu0 %v2483_v14  ;;  %v1708_v14 = vadd.f32 %v7258_v17, %v7322_v62  ;;  %v6282_v46 = vld [vmem:[%s8922_s7 + $0x30] sm:$0xff]   ;;  %v1704_v17 = vadd.f32 %v7248_v3, %v7322_v62  ;;  %v2295_v3 = vmax.f32 %v1692_v12, 0.0 }
 0x1e1   : > { %v7374_v4 = vpop.f32.mrf.mxu1  ;;  %v2092_v23 = vpop.f32.mrf.mxu0  ;;  %v2312_v25 = vmax.f32 %v2062_v1, 0.0  ;;  %v2309_v41 = vmax.f32 %v2059_v40, 0.0  ;;  %v1718_v1 = vadd.f32 %v7278_v58, %v7322_v62  ;;  %v1714_v58 = vadd.f32 %v7268_v45, %v7322_v62 }
 0x1e2   : > { %v2305_v15 = vmax.f32 %v1708_v14, 0.0  ;;  %v6283_v23 = vld [vmem:[%s8922_s7 + $0x28] sm:$0xff]   ;;  %v2302_v55 = vmax.f32 %v1704_v17, 0.0  ;;  %v2484_v44 = vpack.c.bf16 %v2298_v21, %v2295_v3  ;;  %v6285_v21 = vld [vmem:[%s8922_s7 + $0x18] sm:$0xff]   ;;  %v2321_v45 = vmax.f32 %v2075_v27, 0.0 }
 0x1e3   : > { %v7376_v30 = vpop.f32.mrf.mxu1  ;;  %v7378_v7 = vpop.f32.mrf.mxu0  ;;  %v2492_v42 = vpack.c.bf16 %v2312_v25, %v2309_v41  ;;  %v2311_v51 = vmax.f32 %v1718_v1, 0.0  ;;  %v1716_v41 = vadd.f32 %v7270_v49, %v7346_v24  ;;  %v1712_v1 = vadd.f32 %v7264_v35, %v7346_v24 }
 0x1e4   : > { %v2488_v14 = vpack.c.bf16 %v2305_v15, %v2302_v55  ;;  %v2308_v15 = vmax.f32 %v1714_v58, 0.0  ;;  %v2091_v49 = vadd.f32 %v7368_v52, %v7318_v11 }
 0x1e5   : > { %v7384_v63 = vpop.f32.mrf.mxu1  ;;  %v2095_v53 = vpop.f32.mrf.mxu0  ;;  %v2307_v27 = vmax.f32 %v1712_v1, 0.0 }
 0x1e6   : > { %v2495_v53 = vpack.c.bf16 %v2318_v31, %v2315_v18  ;;  %v2333_v58 = vmax.f32 %v2091_v49, 0.0 }
 0x1e7   : > { %v7397_v16 = vpop.f32.mrf.mxu1  ;;  %v7399_v36 = vpop.f32.mrf.mxu0  ;;  %2809 = vmatmul.mubr.bf16.vlgmr.msra.gmra.mxu1 %v2481_v6  ;;  %5914 = vmatmul.mubr.bf16.vlgmr.msra.gmra.mxu0 %v2486_v32  ;;  %v2078_v6 = vadd.f32 %v7316_v57, %v7318_v11  ;;  %v1702_v57 = vadd.f32 %v7244_v0, %v7346_v24 }
 0x1e8   : > { %2816 = vmatprep.mubr.bf16.mxu1 %v2485_v29  ;;  %5917 = vmatprep.mubr.bf16.mxu0 %v2489_v61  ;;  %v2086_v61 = vadd.f32 %v7350_v10, %v7318_v11  ;;  %v2083_v10 = vadd.f32 %v7336_v28, %v7318_v11 }
 0x1e9   : > { %5978 = vmatpush3.bf16.msra.mxu1 %v7127_v56  ;;  %v7406_v38 = vpop.f32.mrf.mxu1  ;;  %v2100_v20 = vpop.f32.mrf.mxu0  ;;  %v1706_v56 = vadd.f32 %v7250_v60, %v7346_v24  ;;  %v6284_v60 = vld [vmem:[%s8922_s7 + $0x20] sm:$0xff]   ;;  %v2324_v40 = vmax.f32 %v2078_v6, 0.0  ;;  %v2301_v25 = vmax.f32 %v1702_v57, 0.0 }
 0x1ea   : > { %5979 = vmatprep.subr.bf16.mxu1 %v6282_v46  ;;  %v2330_v54 = vmax.f32 %v2086_v61, 0.0  ;;  %v2327_v31 = vmax.f32 %v2083_v10, 0.0  ;;  %v1724_v61 = vadd.f32 %v7288_v13, %v7322_v62 }
 0x1eb   : > { %v7411_v33 = vpop.f32.mrf.mxu1  ;;  %v2101_v47 = vpop.f32.mrf.mxu0  ;;  %v2304_v12 = vmax.f32 %v1706_v56, 0.0  ;;  %v2498_v55 = vpack.c.bf16 %v2324_v40, %v2321_v45  ;;  %v1728_v56 = vadd.f32 %v7298_v34, %v7322_v62  ;;  %v2099_v34 = vadd.f32 %v7399_v36, %v7318_v11 }
 0x1ec   : > { %v2102_v6 = vadd.f32 %v2101_v47, %v7318_v11  ;;  %v2310_v47 = vmax.f32 %v1716_v41, 0.0  ;;  %v2314_v40 = vmax.f32 %v1724_v61, 0.0  ;;  %v1726_v36 = vadd.f32 %v7290_v43, %v7346_v24 }
 0x1ed   : > { %v7417_v2 = vpop.f32.mrf.mxu1  ;;  %v2103_v32 = vpop.f32.mrf.mxu0  ;;  %5980 = vmatpush3.bf16.msra.mxu1 %v6282_v46  ;;  %v2487_v3 = vpack.c.bf16 %v2304_v12, %v2301_v25  ;;  %v2317_v52 = vmax.f32 %v1728_v56, 0.0  ;;  %v2339_v13 = vmax.f32 %v2099_v34, 0.0  ;;  %v1722_v41 = vadd.f32 %v7284_v22, %v7346_v24 }
 0x1ee   : > { %5981 = vmatprep.subr.bf16.mxu1 %v6283_v23  ;;  %v2491_v32 = vpack.c.bf16 %v2311_v51, %v2308_v15  ;;  %v2342_v57 = vmax.f32 %v2102_v6, 0.0 }
 0x1ef   : > { %v7430_v29 = vpop.f32.mrf.mxu1  ;;  %v7432_v46 = vpop.f32.mrf.mxu0  ;;  %2817 = vmatmul.mubr.bf16.gmra.mxu1 %v2484_v44  ;;  %5918 = vmatmul.mubr.bf16.gmra.mxu0 %v2492_v42  ;;  %v2501_v42 = vpack.c.bf16 %v2330_v54, %v2327_v31 }
 0x1f0   : > { %2824 = vmatprep.mubr.bf16.mxu1 %v2488_v14  ;;  %5921 = vmatprep.mubr.bf16.mxu0 %v2495_v53  ;;  %v2507_v15 = vpack.c.bf16 %v2342_v57, %v2339_v13 }
 0x1f1   : > { %v7438_v0 = vpop.f32.mrf.mxu1  ;;  %v2108_v17 = vpop.f32.mrf.mxu0  ;;  %5982 = vmatpush3.bf16.msra.mxu1 %v6283_v23  ;;  %v2094_v23 = vadd.f32 %v7378_v7, %v7318_v11 }
 0x1f2   : > { %5983 = vmatprep.subr.bf16.mxu1 %v6284_v60  ;;  %v2490_v17 = vpack.c.bf16 %v2310_v47, %v2307_v27  ;;  %v1748_v27 = vadd.f32 %v7356_v37, %v7322_v62 }
 0x1f3   : > { %v7443_v20 = vpop.f32.mrf.mxu1  ;;  %v2109_v28 = vpop.f32.mrf.mxu0  ;;  %v2336_v14 = vmax.f32 %v2094_v23, 0.0 }
 0x1f4   : > { %v2110_v54 = vadd.f32 %v2109_v28, %v7318_v11  ;;  %v1734_v28 = vadd.f32 %v7312_v8, %v7322_v62  ;;  %v1736_v8 = vadd.f32 %v7314_v59, %v7346_v24  ;;  %v1744_v59 = vadd.f32 %v7342_v50, %v7322_v62 }
 0x1f5   : > { %v7449_v18 = vpop.f32.mrf.mxu1  ;;  %v2111_v44 = vpop.f32.mrf.mxu0  ;;  %5984 = vmatpush3.bf16.msra.mxu1 %v6284_v60  ;;  %v2504_v51 = vpack.c.bf16 %v2336_v14, %v2333_v58 }
 0x1f6   : > { %5985 = vmatprep.subr.bf16.mxu1 %v6285_v21  ;;  %v2316_v44 = vmax.f32 %v1726_v36, 0.0  ;;  %v2348_v56 = vmax.f32 %v2110_v54, 0.0  ;;  %v2320_v34 = vmax.f32 %v1734_v28, 0.0  ;;  %v2326_v50 = vmax.f32 %v1744_v59, 0.0 }
 0x1f7   : > { %v7458_v53 = vpop.f32.mrf.mxu1  ;;  %v2114_v7 = vpop.f32.mrf.mxu0  ;;  %2825 = vmatmul.mubr.bf16.gmra.mxu1 %v2487_v3  ;;  %5922 = vmatmul.mubr.bf16.gmra.mxu0 %v2498_v55  ;;  %v2494_v3 = vpack.c.bf16 %v2317_v52, %v2314_v40  ;;  %v2107_v55 = vadd.f32 %v7432_v46, %v7318_v11  ;;  %v2313_v46 = vmax.f32 %v1722_v41, 0.0  ;;  %v1732_v40 = vadd.f32 %v7304_v48, %v7346_v24 }
 0x1f8   : > { %2832 = vmatprep.mubr.bf16.mxu1 %v2491_v32  ;;  %5925 = vmatprep.mubr.bf16.mxu0 %v2501_v42 }
 0x1f9   : > { %v7464_v60 = vpop.f32.mrf.mxu1  ;;  %v2116_v35 = vpop.f32.mrf.mxu0  ;;  %5986 = vmatpush3.bf16.msra.mxu1 %v6285_v21  ;;  %v1738_v21 = vadd.f32 %v7328_v19, %v7322_v62  ;;  %v2115_v19 = vadd.f32 %v2114_v7, %v7318_v11  ;;  %v2345_v1 = vmax.f32 %v2107_v55, 0.0  ;;  %v2493_v14 = vpack.c.bf16 %v2316_v44, %v2313_v46  ;;  %v6286_v55 = vld [vmem:[%s8922_s7 + $0x10] sm:$0xff]  }
 0x1fa   : > { %5987 = vmatprep.subr.bf16.mxu1 %v6286_v55 }
 0x1fb   : > { %v7466_v10 = vpop.f32.mrf.mxu1  ;;  %v2117_v12 = vpop.f32.mrf.mxu0  ;;  %v2323_v6 = vmax.f32 %v1738_v21, 0.0  ;;  %v2351_v47 = vmax.f32 %v2115_v19, 0.0  ;;  %v2510_v7 = vpack.c.bf16 %v2348_v56, %v2345_v1  ;;  %v2329_v21 = vmax.f32 %v1748_v27, 0.0 }
 0x1fc   : > { %v2118_v31 = vadd.f32 %v2117_v12, %v7318_v11  ;;  %v1746_v19 = vadd.f32 %v7348_v5, %v7346_v24  ;;  %v1754_v5 = vadd.f32 %v7374_v4, %v7322_v62  ;;  %v1756_v4 = vadd.f32 %v7376_v30, %v7346_v24 }
 0x1fd   : > { %v7471_v25 = vpop.f32.mrf.mxu1  ;;  %v2119_v45 = vpop.f32.mrf.mxu0  ;;  %v2497_v12 = vpack.c.bf16 %v2323_v6, %v2320_v34  ;;  %v1758_v6 = vadd.f32 %v7384_v63, %v7322_v62  ;;  %v2500_v1 = vpack.c.bf16 %v2329_v21, %v2326_v50  ;;  %5988 = vmatpush3.bf16.msra.mxu1 %v6286_v55 }
 0x1fe   : > { %v2354_v32 = vmax.f32 %v2118_v31, 0.0  ;;  %v2334_v55 = vmax.f32 %v1756_v4, 0.0 }
 0x1ff   : > { %v7480_v43 = vpop.f32.mrf.mxu1  ;;  %v2122_v23 = vpop.f32.mrf.mxu0  ;;  %2833 = vmatmul.mubr.bf16.gmra.mxu1 %v2490_v17  ;;  %5926 = vmatmul.mubr.bf16.gmra.mxu0 %v2504_v51  ;;  %v2322_v51 = vmax.f32 %v1736_v8, 0.0  ;;  %v2328_v8 = vmax.f32 %v1746_v19, 0.0 }
 0x200   : > { %2840 = vmatprep.mubr.bf16.mxu1 %v2494_v3  ;;  %5929 = vmatprep.mubr.bf16.mxu0 %v2507_v15  ;;  %v2513_v58 = vpack.c.bf16 %v2354_v32, %v2351_v47  ;;  %v2123_v13 = vadd.f32 %v2122_v23, %v7318_v11  ;;  %v2319_v15 = vmax.f32 %v1732_v40, 0.0 }
 0x201   : > { %v7485_v42 = vpop.f32.mrf.mxu1  ;;  %v2124_v22 = vpop.f32.mrf.mxu0 }
 0x202   : > { %v2357_v31 = vmax.f32 %v2123_v13, 0.0  ;;  %v2496_v28 = vpack.c.bf16 %v2322_v51, %v2319_v15  ;;  %v1768_v51 = vadd.f32 %v7417_v2, %v7322_v62 }
 0x203   : > { %v7487_v49 = vpop.f32.mrf.mxu1  ;;  %v2125_v61 = vpop.f32.mrf.mxu0 }
 0x204   : > { %v2126_v35 = vadd.f32 %v2125_v61, %v7318_v11  ;;  %v1742_v61 = vadd.f32 %v7334_v39, %v7346_v24  ;;  %v2341_v2 = vmax.f32 %v1768_v51, 0.0 }
 0x205   : > { %v7492_v52 = vpop.f32.mrf.mxu1  ;;  %v2127_v57 = vpop.f32.mrf.mxu0 }
 0x206   : > { %v2360_v54 = vmax.f32 %v2126_v35, 0.0  ;;  %v2335_v35 = vmax.f32 %v1758_v6, 0.0  ;;  %v2325_v27 = vmax.f32 %v1742_v61, 0.0  ;;  %v1778_v61 = vadd.f32 %v7449_v18, %v7322_v62 }
 0x207   : > { %v7499_v17 = vpop.f32.mrf.mxu1  ;;  %v2130_v36 = vpop.f32.mrf.mxu0  ;;  %2841 = vmatmul.mubr.bf16.gmra.mxu1 %v2493_v14  ;;  %5930 = vmatmul.mubr.bf16.gmra.mxu0 %v2510_v7 }
 0x208   : > { %2848 = vmatprep.mubr.bf16.mxu1 %v2497_v12  ;;  %5933 = vmatprep.mubr.bf16.mxu0 %v2513_v58  ;;  %v2131_v48 = vadd.f32 %v2130_v36, %v7318_v11  ;;  %v2516_v44 = vpack.c.bf16 %v2360_v54, %v2357_v31  ;;  %v2332_v12 = vmax.f32 %v1754_v5, 0.0  ;;  %v2499_v13 = vpack.c.bf16 %v2328_v8, %v2325_v27 }
 0x209   : > { %v7503_v37 = vpop.f32.mrf.mxu1  ;;  %v2132_v45 = vpop.f32.mrf.mxu0  ;;  %v1762_v8 = vadd.f32 %v7397_v16, %v7346_v24  ;;  %v2347_v18 = vmax.f32 %v1778_v61, 0.0 }
 0x20a   : > { %v2363_v32 = vmax.f32 %v2131_v48, 0.0  ;;  %v2503_v21 = vpack.c.bf16 %v2335_v35, %v2332_v12  ;;  %v1752_v48 = vadd.f32 %v7366_v9, %v7346_v24 }
 0x20b   : > { %v7506_v3 = vpop.f32.mrf.mxu1  ;;  %v2133_v41 = vpop.f32.mrf.mxu0 }
 0x20c   : > { %v2134_v23 = vadd.f32 %v2133_v41, %v7318_v11  ;;  %v1764_v41 = vadd.f32 %v7406_v38, %v7322_v62  ;;  %v2331_v19 = vmax.f32 %v1752_v48, 0.0  ;;  %v1766_v38 = vadd.f32 %v7411_v33, %v7346_v24 }
 0x20d   : > { %v7514_v56 = vpop.f32.mrf.mxu1  ;;  %v2135_v22 = vpop.f32.mrf.mxu0  ;;  %v1788_v48 = vadd.f32 %v7471_v25, %v7322_v62 }
 0x20e   : > { %v2366_v46 = vmax.f32 %v2134_v23, 0.0  ;;  %v2338_v22 = vmax.f32 %v1764_v41, 0.0  ;;  %v2340_v27 = vmax.f32 %v1766_v38, 0.0 }
 0x20f   : > { %v7520_v34 = vpop.f32.mrf.mxu1  ;;  %v2138_v47 = vpop.f32.mrf.mxu0  ;;  %2849 = vmatmul.mubr.bf16.gmra.mxu1 %v2496_v28  ;;  %5934 = vmatmul.mubr.bf16.gmra.mxu0 %v2516_v44 }
 0x210   : > { %v2519_v14 = vpack.c.bf16 %v2366_v46, %v2363_v32  ;;  %2856 = vmatprep.mubr.bf16.mxu1 %v2500_v1  ;;  %v2139_v57 = vadd.f32 %v2138_v47, %v7318_v11  ;;  %v2502_v32 = vpack.c.bf16 %v2334_v55, %v2331_v19  ;;  %v1772_v55 = vadd.f32 %v7430_v29, %v7346_v24  ;;  %v6287_v19 = vld [vmem:[%s8922_s7 + $0x8] sm:$0xff]  }
 0x211   : > { %v7524_v7 = vpop.f32.mrf.mxu1  ;;  %v2140_v63 = vpop.f32.mrf.mxu0  ;;  %5989 = vmatprep.subr.bf16.mxu1 %v6287_v19 }
 0x212   : > { %5937 = vmatprep.mubr.bf16.mxu0 %v2519_v14  ;;  %v2369_v54 = vmax.f32 %v2139_v57, 0.0  ;;  %v2506_v14 = vpack.c.bf16 %v2341_v2, %v2338_v22  ;;  %v1774_v57 = vadd.f32 %v7438_v0, %v7322_v62  ;;  %v1776_v0 = vadd.f32 %v7443_v20, %v7346_v24  ;;  %5990 = vmatpush3.bf16.msra.mxu1 %v6287_v19 }
 0x213   : > { %v7527_v39 = vpop.f32.mrf.mxu1  ;;  %v2141_v58 = vpop.f32.mrf.mxu0 }
 0x214   : > { %v2142_v40 = vadd.f32 %v2141_v58, %v7318_v11  ;;  %v2346_v25 = vmax.f32 %v1776_v0, 0.0 }
 0x215   : > { %v7532_v36 = vpop.f32.mrf.mxu1  ;;  %v2143_v59 = vpop.f32.mrf.mxu0 }
 0x216   : > { %v2372_v45 = vmax.f32 %v2142_v40, 0.0  ;;  %v2344_v59 = vmax.f32 %v1774_v57, 0.0 }
 0x217   : > { %v7538_v15 = vpop.f32.mrf.mxu1  ;;  %v2146_v31 = vpop.f32.mrf.mxu0  ;;  %2857 = vmatmul.mubr.bf16.gmra.mxu1 %v2499_v13  ;;  %v2337_v13 = vmax.f32 %v1762_v8, 0.0 }
 0x218   : > { %v2522_v30 = vpack.c.bf16 %v2372_v45, %v2369_v54  ;;  %2864 = vmatprep.mubr.bf16.mxu1 %v2503_v21  ;;  %v2147_v28 = vadd.f32 %v2146_v31, %v7318_v11 }
 0x219   : > { %v7542_v50 = vpop.f32.mrf.mxu1  ;;  %v2148_v23 = vpop.f32.mrf.mxu0  ;;  %v2505_v54 = vpack.c.bf16 %v2340_v27, %v2337_v13  ;;  %v1794_v13 = vadd.f32 %v7485_v42, %v7322_v62  ;;  %v1796_v42 = vadd.f32 %v7487_v49, %v7346_v24 }
 0x21a   : > { %5938 = vmatmul.mubr.bf16.gmra.mxu0 %v2522_v30  ;;  %v2375_v47 = vmax.f32 %v2147_v28, 0.0  ;;  %v2509_v30 = vpack.c.bf16 %v2347_v18, %v2344_v59  ;;  %v1784_v28 = vadd.f32 %v7464_v60, %v7322_v62 }
 0x21b   : > { %v7545_v44 = vpop.f32.mrf.mxu1  ;;  %v2149_v9 = vpop.f32.mrf.mxu0 }
 0x21c   : > { %v2150_v6 = vadd.f32 %v2149_v9, %v7318_v11  ;;  %v2350_v60 = vmax.f32 %v1784_v28, 0.0 }
 0x21d   : > { %v7550_v46 = vpop.f32.mrf.mxu1  ;;  %v2151_v1 = vpop.f32.mrf.mxu0 }
 0x21e   : > { %v2378_v5 = vmax.f32 %v2150_v6, 0.0  ;;  %v2353_v6 = vmax.f32 %v1788_v48, 0.0  ;;  %v2356_v48 = vmax.f32 %v1794_v13, 0.0 }
 0x21f   : > { %v7556_v63 = vpop.f32.mrf.mxu1  ;;  %v2154_v35 = vpop.f32.mrf.mxu0  ;;  %2865 = vmatmul.mubr.bf16.gmra.mxu1 %v2502_v32  ;;  %v2343_v32 = vmax.f32 %v1772_v55, 0.0 }
 0x220   : > { %v2525_v33 = vpack.c.bf16 %v2378_v5, %v2375_v47  ;;  %2872 = vmatprep.mubr.bf16.mxu1 %v2506_v14  ;;  %v2155_v40 = vadd.f32 %v2154_v35, %v7318_v11  ;;  %v1786_v5 = vadd.f32 %v7466_v10, %v7346_v24  ;;  %v1798_v35 = vadd.f32 %v7492_v52, %v7322_v62 }
 0x221   : > { %v7560_v58 = vpop.f32.mrf.mxu1  ;;  %v2156_v12 = vpop.f32.mrf.mxu0  ;;  %v2508_v47 = vpack.c.bf16 %v2346_v25, %v2343_v32  ;;  %v2512_v27 = vpack.c.bf16 %v2353_v6, %v2350_v60  ;;  %v1792_v25 = vadd.f32 %v7480_v43, %v7346_v24  ;;  %v2358_v32 = vmax.f32 %v1796_v42, 0.0 }
 0x222   : > { %5941 = vmatprep.mubr.bf16.mxu0 %v2525_v33  ;;  %v2381_v31 = vmax.f32 %v2155_v40, 0.0  ;;  %v1782_v12 = vadd.f32 %v7458_v53, %v7346_v24  ;;  %v2359_v52 = vmax.f32 %v1798_v35, 0.0 }
 0x223   : > { %v7563_v4 = vpop.f32.mrf.mxu1  ;;  %v2157_v16 = vpop.f32.mrf.mxu0 }
 0x224   : > { %v2158_v51 = vadd.f32 %v2157_v16, %v7318_v11  ;;  %v2352_v16 = vmax.f32 %v1786_v5, 0.0  ;;  %v2349_v0 = vmax.f32 %v1782_v12, 0.0  ;;  %v2515_v19 = vpack.c.bf16 %v2359_v52, %v2356_v48 }
 0x225   : > { %v7568_v45 = vpop.f32.mrf.mxu1  ;;  %v2159_v21 = vpop.f32.mrf.mxu0  ;;  %v1818_v12 = vadd.f32 %v7532_v36, %v7322_v62 }
 0x226   : > { %v2384_v41 = vmax.f32 %v2158_v51, 0.0 }
 0x227   : > { %v7574_v23 = vpop.f32.mrf.mxu1  ;;  %v2162_v2 = vpop.f32.mrf.mxu0  ;;  %2873 = vmatmul.mubr.bf16.gmra.mxu1 %v2505_v54  ;;  %v2371_v36 = vmax.f32 %v1818_v12, 0.0 }
 0x228   : > { %v2528_v20 = vpack.c.bf16 %v2384_v41, %v2381_v31  ;;  %2880 = vmatprep.mubr.bf16.mxu1 %v2509_v30  ;;  %v2163_v29 = vadd.f32 %v2162_v2, %v7318_v11  ;;  %v2511_v41 = vpack.c.bf16 %v2352_v16, %v2349_v0  ;;  %v1808_v2 = vadd.f32 %v7514_v56, %v7322_v62 }
 0x229   : > { %v7581_v9 = vpop.f32.mrf.mxu1  ;;  %v2164_v22 = vpop.f32.mrf.mxu0  ;;  %v1802_v16 = vadd.f32 %v7499_v17, %v7346_v24 }
 0x22a   : > { %5942 = vmatmul.mubr.bf16.gmra.mxu0 %v2528_v20  ;;  %v2387_v57 = vmax.f32 %v2163_v29, 0.0  ;;  %v1804_v29 = vadd.f32 %v7503_v37, %v7322_v62  ;;  %v2365_v56 = vmax.f32 %v1808_v2, 0.0  ;;  %v1806_v37 = vadd.f32 %v7506_v3, %v7346_v24 }
 0x22b   : > { %v7584_v38 = vpop.f32.mrf.mxu1  ;;  %v2165_v1 = vpop.f32.mrf.mxu0 }
 0x22c   : > { %v2166_v61 = vadd.f32 %v2165_v1, %v7318_v11  ;;  %v2364_v0 = vmax.f32 %v1806_v37, 0.0 }
 0x22d   : > { %v7589_v14 = vpop.f32.mrf.mxu1  ;;  %v2167_v8 = vpop.f32.mrf.mxu0 }
 0x22e   : > { %v2390_v33 = vmax.f32 %v2166_v61, 0.0  ;;  %v2362_v8 = vmax.f32 %v1804_v29, 0.0 }
 0x22f   : > { %v7595_v18 = vpop.f32.mrf.mxu1  ;;  %v2170_v40 = vpop.f32.mrf.mxu0  ;;  %2881 = vmatmul.mubr.bf16.gmra.mxu1 %v2508_v47  ;;  %v2355_v47 = vmax.f32 %v1792_v25, 0.0  ;;  %v1828_v25 = vadd.f32 %v7550_v46, %v7322_v62 }
 0x230   : > { %v2531_v10 = vpack.c.bf16 %v2390_v33, %v2387_v57  ;;  %2888 = vmatprep.mubr.bf16.mxu1 %v2512_v27  ;;  %v2171_v54 = vadd.f32 %v2170_v40, %v7318_v11 }
 0x231   : > { %v7599_v59 = vpop.f32.mrf.mxu1  ;;  %v2172_v51 = vpop.f32.mrf.mxu0  ;;  %v2514_v57 = vpack.c.bf16 %v2358_v32, %v2355_v47  ;;  %v1812_v32 = vadd.f32 %v7520_v34, %v7346_v24  ;;  %v2377_v46 = vmax.f32 %v1828_v25, 0.0 }
 0x232   : > { %5945 = vmatprep.mubr.bf16.mxu0 %v2531_v10  ;;  %v2393_v28 = vmax.f32 %v2171_v54, 0.0  ;;  %v2518_v10 = vpack.c.bf16 %v2365_v56, %v2362_v8  ;;  %v1814_v54 = vadd.f32 %v7524_v7, %v7322_v62  ;;  %v1816_v7 = vadd.f32 %v7527_v39, %v7346_v24 }
 0x233   : > { %v7602_v21 = vpop.f32.mrf.mxu1  ;;  %v2173_v53 = vpop.f32.mrf.mxu0 }
 0x234   : > { %v2174_v31 = vadd.f32 %v2173_v53, %v7318_v11  ;;  %v2370_v47 = vmax.f32 %v1816_v7, 0.0 }
 0x235   : > { %v7607_v30 = vpop.f32.mrf.mxu1  ;;  %v2175_v55 = vpop.f32.mrf.mxu0 }
 0x236   : > { %v2396_v20 = vmax.f32 %v2174_v31, 0.0  ;;  %v2368_v55 = vmax.f32 %v1814_v54, 0.0 }
 0x237   : > { %v7613_v22 = vpop.f32.mrf.mxu1  ;;  %v2178_v6 = vpop.f32.mrf.mxu0  ;;  %2889 = vmatmul.mubr.bf16.gmra.mxu1 %v2511_v41  ;;  %v2361_v41 = vmax.f32 %v1802_v16, 0.0 }
 0x238   : > { %v2534_v49 = vpack.c.bf16 %v2396_v20, %v2393_v28  ;;  %2896 = vmatprep.mubr.bf16.mxu1 %v2515_v19  ;;  %v2179_v61 = vadd.f32 %v2178_v6, %v7318_v11 }
 0x239   : > { %v7617_v1 = vpop.f32.mrf.mxu1  ;;  %v2180_v60 = vpop.f32.mrf.mxu0  ;;  %v2517_v28 = vpack.c.bf16 %v2364_v0, %v2361_v41 }
 0x23a   : > { %5946 = vmatmul.mubr.bf16.gmra.mxu0 %v2534_v49  ;;  %v2399_v40 = vmax.f32 %v2179_v61, 0.0  ;;  %v2521_v49 = vpack.c.bf16 %v2371_v36, %v2368_v55  ;;  %v1824_v61 = vadd.f32 %v7542_v50, %v7322_v62  ;;  %v6288_v50 = vld [vmem:[%s8922_s7] sm:$0xff]  }
 0x23b   : > { %v7620_v5 = vpop.f32.mrf.mxu1  ;;  %v2181_v43 = vpop.f32.mrf.mxu0  ;;  %5991 = vmatprep.subr.bf16.mxu1 %v6288_v50 }
 0x23c   : > { %v2182_v35 = vadd.f32 %v2181_v43, %v7318_v11  ;;  %5992 = vmatpush3.bf16.msra.mxu1 %v6288_v50 }
 0x23d   : > { %v7625_v33 = vpop.f32.mrf.mxu1  ;;  %v2183_v27 = vpop.f32.mrf.mxu0 }
 0x23e   : > { %v2402_v13 = vmax.f32 %v2182_v35, 0.0  ;;  %v2374_v27 = vmax.f32 %v1824_v61, 0.0 }
 0x23f   : > { %v7631_v51 = vpop.f32.mrf.mxu1  ;;  %v2186_v52 = vpop.f32.mrf.mxu0  ;;  %2897 = vmatmul.mubr.bf16.gmra.mxu1 %v2514_v57  ;;  %v2367_v57 = vmax.f32 %v1812_v32, 0.0 }
 0x240   : > { %v2537_v3 = vpack.c.bf16 %v2402_v13, %v2399_v40  ;;  %2904 = vmatprep.mubr.bf16.mxu1 %v2518_v10  ;;  %v2187_v31 = vadd.f32 %v2186_v52, %v7318_v11  ;;  %v1826_v13 = vadd.f32 %v7545_v44, %v7346_v24  ;;  %v1838_v52 = vadd.f32 %v7568_v45, %v7322_v62 }
 0x241   : > { %v7635_v53 = vpop.f32.mrf.mxu1  ;;  %v2188_v48 = vpop.f32.mrf.mxu0  ;;  %v2520_v40 = vpack.c.bf16 %v2370_v47, %v2367_v57  ;;  %v2524_v0 = vpack.c.bf16 %v2377_v46, %v2374_v27  ;;  %v1834_v44 = vadd.f32 %v7560_v58, %v7322_v62  ;;  %v1836_v58 = vadd.f32 %v7563_v4, %v7346_v24 }
 0x242   : > { %5949 = vmatprep.mubr.bf16.mxu0 %v2537_v3  ;;  %v2405_v6 = vmax.f32 %v2187_v31, 0.0  ;;  %v1822_v48 = vadd.f32 %v7538_v15, %v7346_v24  ;;  %v1844_v57 = vadd.f32 %v7581_v9, %v7322_v62  ;;  %v1846_v9 = vadd.f32 %v7584_v38, %v7346_v24 }
 0x243   : > { %v7638_v42 = vpop.f32.mrf.mxu1  ;;  %v2189_v17 = vpop.f32.mrf.mxu0  ;;  %v2380_v25 = vmax.f32 %v1834_v44, 0.0 }
 0x244   : > { %v2190_v2 = vadd.f32 %v2189_v17, %v7318_v11  ;;  %v2376_v17 = vmax.f32 %v1826_v13, 0.0  ;;  %v2373_v7 = vmax.f32 %v1822_v48, 0.0  ;;  %v1858_v48 = vadd.f32 %v7607_v30, %v7322_v62 }
 0x245   : > { %v7643_v20 = vpop.f32.mrf.mxu1  ;;  %v2191_v19 = vpop.f32.mrf.mxu0 }
 0x246   : > { %v2408_v29 = vmax.f32 %v2190_v2, 0.0  ;;  %v2383_v2 = vmax.f32 %v1838_v52, 0.0  ;;  %v2395_v30 = vmax.f32 %v1858_v48, 0.0 }
 0x247   : > { %v7649_v60 = vpop.f32.mrf.mxu1  ;;  %v2194_v56 = vpop.f32.mrf.mxu0  ;;  %2905 = vmatmul.mubr.bf16.gmra.mxu1 %v2517_v28 }
 0x248   : > { %v2540_v39 = vpack.c.bf16 %v2408_v29, %v2405_v6  ;;  %2912 = vmatprep.mubr.bf16.mxu1 %v2521_v49  ;;  %v2195_v35 = vadd.f32 %v2194_v56, %v7318_v11  ;;  %v2523_v29 = vpack.c.bf16 %v2376_v17, %v2373_v7  ;;  %v1848_v56 = vadd.f32 %v7589_v14, %v7322_v62 }
 0x249   : > { %v7653_v43 = vpop.f32.mrf.mxu1  ;;  %v2196_v8 = vpop.f32.mrf.mxu0  ;;  %v2527_v47 = vpack.c.bf16 %v2383_v2, %v2380_v25  ;;  %v1842_v17 = vadd.f32 %v7574_v23, %v7346_v24  ;;  %v2388_v7 = vmax.f32 %v1846_v9, 0.0 }
 0x24a   : > { %5950 = vmatmul.mubr.bf16.gmra.mxu0 %v2540_v39  ;;  %v2411_v54 = vmax.f32 %v2195_v35, 0.0  ;;  %v1832_v8 = vadd.f32 %v7556_v63, %v7346_v24  ;;  %v2389_v14 = vmax.f32 %v1848_v56, 0.0 }
 0x24b   : > { %v7656_v37 = vpop.f32.mrf.mxu1  ;;  %v2197_v34 = vpop.f32.mrf.mxu0 }
 0x24c   : > { %v2198_v12 = vadd.f32 %v2197_v34, %v7318_v11  ;;  %v2382_v34 = vmax.f32 %v1836_v58, 0.0 }
 0x24d   : > { %v7664_v10 = vpop.f32.mrf.mxu1  ;;  %v2199_v16 = vpop.f32.mrf.mxu0 }
 0x24e   : > { %v2414_v3 = vmax.f32 %v2198_v12, 0.0  ;;  %v2386_v16 = vmax.f32 %v1844_v57, 0.0 }
 0x24f   : > { %v7670_v36 = vpop.f32.mrf.mxu1  ;;  %v2202_v31 = vpop.f32.mrf.mxu0  ;;  %2913 = vmatmul.mubr.bf16.gmra.mxu1 %v2520_v40  ;;  %v2379_v40 = vmax.f32 %v1832_v8, 0.0  ;;  %v1868_v8 = vadd.f32 %v7625_v33, %v7322_v62 }
 0x250   : > { %v2543_v41 = vpack.c.bf16 %v2414_v3, %v2411_v54  ;;  %2920 = vmatprep.mubr.bf16.mxu1 %v2524_v0  ;;  %v2203_v28 = vadd.f32 %v2202_v31, %v7318_v11 }
 0x251   : > { %v7674_v55 = vpop.f32.mrf.mxu1  ;;  %v2204_v45 = vpop.f32.mrf.mxu0  ;;  %v2526_v54 = vpack.c.bf16 %v2382_v34, %v2379_v40  ;;  %v1852_v34 = vadd.f32 %v7595_v18, %v7346_v24  ;;  %v2401_v33 = vmax.f32 %v1868_v8, 0.0 }
 0x252   : > { %5953 = vmatprep.mubr.bf16.mxu0 %v2543_v41  ;;  %v2417_v61 = vmax.f32 %v2203_v28, 0.0  ;;  %v2530_v41 = vpack.c.bf16 %v2389_v14, %v2386_v16  ;;  %v1854_v28 = vadd.f32 %v7599_v59, %v7322_v62  ;;  %v1856_v59 = vadd.f32 %v7602_v21, %v7346_v24 }
 0x253   : > { %v7677_v15 = vpop.f32.mrf.mxu1  ;;  %v2205_v19 = vpop.f32.mrf.mxu0 }
 0x254   : > { %v2206_v6 = vadd.f32 %v2205_v19, %v7318_v11  ;;  %v2394_v40 = vmax.f32 %v1856_v59, 0.0 }
 0x255   : > { %v7682_v49 = vpop.f32.mrf.mxu1  ;;  %v2207_v32 = vpop.f32.mrf.mxu0 }
 0x256   : > { %v2420_v39 = vmax.f32 %v2206_v6, 0.0  ;;  %v2392_v32 = vmax.f32 %v1854_v28, 0.0 }
 0x257   : > { %v7688_v46 = vpop.f32.mrf.mxu1  ;;  %v2210_v35 = vpop.f32.mrf.mxu0  ;;  %2921 = vmatmul.mubr.bf16.gmra.mxu1 %v2523_v29  ;;  %v2385_v29 = vmax.f32 %v1842_v17, 0.0  ;;  %v1878_v17 = vadd.f32 %v7643_v20, %v7322_v62 }
 0x258   : > { %v2546_v4 = vpack.c.bf16 %v2420_v39, %v2417_v61  ;;  %2928 = vmatprep.mubr.bf16.mxu1 %v2527_v47  ;;  %v2211_v50 = vadd.f32 %v2210_v35, %v7318_v11 }
 0x259   : > { %v7692_v27 = vpop.f32.mrf.mxu1  ;;  %v2212_v12 = vpop.f32.mrf.mxu0  ;;  %v2529_v61 = vpack.c.bf16 %v2388_v7, %v2385_v29  ;;  %v1862_v7 = vadd.f32 %v7613_v22, %v7346_v24  ;;  %v2407_v20 = vmax.f32 %v1878_v17, 0.0 }
 0x25a   : > { %5954 = vmatmul.mubr.bf16.gmra.mxu0 %v2546_v4  ;;  %v2423_v31 = vmax.f32 %v2211_v50, 0.0  ;;  %v2533_v4 = vpack.c.bf16 %v2395_v30, %v2392_v32  ;;  %v1864_v50 = vadd.f32 %v7617_v1, %v7322_v62  ;;  %v1866_v1 = vadd.f32 %v7620_v5, %v7346_v24 }
 0x25b   : > { %v7695_v13 = vpop.f32.mrf.mxu1  ;;  %v2213_v63 = vpop.f32.mrf.mxu0 }
 0x25c   : > { %v2214_v52 = vadd.f32 %v2213_v63, %v7318_v11  ;;  %v2400_v29 = vmax.f32 %v1866_v1, 0.0 }
 0x25d   : > { %v7700_v3 = vpop.f32.mrf.mxu1  ;;  %v2215_v0 = vpop.f32.mrf.mxu0 }
 0x25e   : > { %v2426_v44 = vmax.f32 %v2214_v52, 0.0  ;;  %v2398_v0 = vmax.f32 %v1864_v50, 0.0 }
 0x25f   : > { %v7706_v45 = vpop.f32.mrf.mxu1  ;;  %v2218_v2 = vpop.f32.mrf.mxu0  ;;  %2929 = vmatmul.mubr.bf16.gmra.mxu1 %v2526_v54  ;;  %v2391_v54 = vmax.f32 %v1852_v34, 0.0  ;;  %v1888_v34 = vadd.f32 %v7664_v10, %v7322_v62 }
 0x260   : > { %v2549_v38 = vpack.c.bf16 %v2426_v44, %v2423_v31  ;;  %2936 = vmatprep.mubr.bf16.mxu1 %v2530_v41  ;;  %v2219_v6 = vadd.f32 %v2218_v2, %v7318_v11 }
 0x261   : > { %v7710_v19 = vpop.f32.mrf.mxu1  ;;  %v2220_v25 = vpop.f32.mrf.mxu0  ;;  %v2532_v31 = vpack.c.bf16 %v2394_v40, %v2391_v54  ;;  %v1872_v40 = vadd.f32 %v7631_v51, %v7346_v24  ;;  %v2413_v10 = vmax.f32 %v1888_v34, 0.0 }
 0x262   : > { %5957 = vmatprep.mubr.bf16.mxu0 %v2549_v38  ;;  %v2429_v35 = vmax.f32 %v2219_v6, 0.0  ;;  %v2536_v38 = vpack.c.bf16 %v2401_v33, %v2398_v0  ;;  %v1874_v6 = vadd.f32 %v7635_v53, %v7322_v62  ;;  %v1876_v53 = vadd.f32 %v7638_v42, %v7346_v24 }
 0x263   : > { %v7713_v58 = vpop.f32.mrf.mxu1  ;;  %v2221_v23 = vpop.f32.mrf.mxu0 }
 0x264   : > { %v2222_v56 = vadd.f32 %v2221_v23, %v7318_v11  ;;  %v2406_v54 = vmax.f32 %v1876_v53, 0.0 }
 0x265   : > { %v7718_v39 = vpop.f32.mrf.mxu1  ;;  %v2223_v47 = vpop.f32.mrf.mxu0 }
 0x266   : > { %v2432_v57 = vmax.f32 %v2222_v56, 0.0  ;;  %v2404_v47 = vmax.f32 %v1874_v6, 0.0 }
 0x267   : > { %v7724_v12 = vpop.f32.mrf.mxu1  ;;  %v2226_v14 = vpop.f32.mrf.mxu0  ;;  %2937 = vmatmul.mubr.bf16.gmra.mxu1 %v2529_v61  ;;  %v2397_v61 = vmax.f32 %v1862_v7, 0.0  ;;  %v1898_v7 = vadd.f32 %v7682_v49, %v7322_v62 }
 0x268   : > { %v2552_v21 = vpack.c.bf16 %v2432_v57, %v2429_v35  ;;  %2944 = vmatprep.mubr.bf16.mxu1 %v2533_v4  ;;  %v2227_v52 = vadd.f32 %v2226_v14, %v7318_v11 }
 0x269   : > { %v7728_v63 = vpop.f32.mrf.mxu1  ;;  %v2228_v16 = vpop.f32.mrf.mxu0  ;;  %v2535_v35 = vpack.c.bf16 %v2400_v29, %v2397_v61  ;;  %v1882_v29 = vadd.f32 %v7649_v60, %v7346_v24  ;;  %v2419_v49 = vmax.f32 %v1898_v7, 0.0 }
 0x26a   : > { %5958 = vmatmul.mubr.bf16.gmra.mxu0 %v2552_v21  ;;  %v2435_v2 = vmax.f32 %v2227_v52, 0.0  ;;  %v2539_v21 = vpack.c.bf16 %v2407_v20, %v2404_v47  ;;  %v1884_v52 = vadd.f32 %v7653_v43, %v7322_v62  ;;  %v1886_v43 = vadd.f32 %v7656_v37, %v7346_v24 }
 0x26b   : > { %v7731_v9 = vpop.f32.mrf.mxu1  ;;  %v2229_v18 = vpop.f32.mrf.mxu0 }
 0x26c   : > { %v2230_v48 = vadd.f32 %v2229_v18, %v7318_v11  ;;  %v2412_v61 = vmax.f32 %v1886_v43, 0.0 }
 0x26d   : > { %v7736_v44 = vpop.f32.mrf.mxu1  ;;  %v2231_v41 = vpop.f32.mrf.mxu0 }
 0x26e   : > { %v2438_v28 = vmax.f32 %v2230_v48, 0.0  ;;  %v2410_v41 = vmax.f32 %v1884_v52, 0.0 }
 0x26f   : > { %v7742_v25 = vpop.f32.mrf.mxu1  ;;  %v2234_v30 = vpop.f32.mrf.mxu0  ;;  %2945 = vmatmul.mubr.bf16.gmra.mxu1 %v2532_v31  ;;  %v2403_v31 = vmax.f32 %v1872_v40, 0.0  ;;  %v1908_v40 = vadd.f32 %v7700_v3, %v7322_v62 }
 0x270   : > { %v2555_v5 = vpack.c.bf16 %v2438_v28, %v2435_v2  ;;  %2952 = vmatprep.mubr.bf16.mxu1 %v2536_v38  ;;  %v2235_v56 = vadd.f32 %v2234_v30, %v7318_v11 }
 0x271   : > { %v7746_v23 = vpop.f32.mrf.mxu1  ;;  %v2236_v32 = vpop.f32.mrf.mxu0  ;;  %v2538_v2 = vpack.c.bf16 %v2406_v54, %v2403_v31  ;;  %v1892_v54 = vadd.f32 %v7670_v36, %v7346_v24  ;;  %v2425_v3 = vmax.f32 %v1908_v40, 0.0 }
 0x272   : > { %5961 = vmatprep.mubr.bf16.mxu0 %v2555_v5  ;;  %v2441_v14 = vmax.f32 %v2235_v56, 0.0  ;;  %v2542_v5 = vpack.c.bf16 %v2413_v10, %v2410_v41  ;;  %v1894_v56 = vadd.f32 %v7674_v55, %v7322_v62  ;;  %v1896_v55 = vadd.f32 %v7677_v15, %v7346_v24 }
 0x273   : > { %v7749_v59 = vpop.f32.mrf.mxu1  ;;  %v2237_v22 = vpop.f32.mrf.mxu0 }
 0x274   : > { %v2238_v8 = vadd.f32 %v2237_v22, %v7318_v11  ;;  %v2418_v31 = vmax.f32 %v1896_v55, 0.0 }
 0x275   : > { %v7754_v57 = vpop.f32.mrf.mxu1  ;;  %v2239_v4 = vpop.f32.mrf.mxu0 }
 0x276   : > { %v2444_v50 = vmax.f32 %v2238_v8, 0.0  ;;  %v2416_v4 = vmax.f32 %v1894_v56, 0.0 }
 0x277   : > { %v7760_v16 = vpop.f32.mrf.mxu1  ;;  %v2242_v33 = vpop.f32.mrf.mxu0  ;;  %2953 = vmatmul.mubr.bf16.gmra.mxu1 %v2535_v35  ;;  %v2409_v35 = vmax.f32 %v1882_v29, 0.0  ;;  %v1918_v29 = vadd.f32 %v7718_v39, %v7322_v62 }
 0x278   : > { %v2558_v42 = vpack.c.bf16 %v2444_v50, %v2441_v14  ;;  %2960 = vmatprep.mubr.bf16.mxu1 %v2539_v21  ;;  %v2243_v48 = vadd.f32 %v2242_v33, %v7318_v11 }
 0x279   : > { %v7764_v18 = vpop.f32.mrf.mxu1  ;;  %v2244_v0 = vpop.f32.mrf.mxu0  ;;  %v2541_v14 = vpack.c.bf16 %v2412_v61, %v2409_v35  ;;  %v1902_v61 = vadd.f32 %v7688_v46, %v7346_v24  ;;  %v2431_v39 = vmax.f32 %v1918_v29, 0.0 }
 0x27a   : > { %5962 = vmatmul.mubr.bf16.gmra.mxu0 %v2558_v42  ;;  %v2447_v30 = vmax.f32 %v2243_v48, 0.0  ;;  %v2545_v42 = vpack.c.bf16 %v2419_v49, %v2416_v4  ;;  %v1904_v48 = vadd.f32 %v7692_v27, %v7322_v62  ;;  %v1906_v27 = vadd.f32 %v7695_v13, %v7346_v24 }
 0x27b   : > { %v7767_v1 = vpop.f32.mrf.mxu1  ;;  %v2245_v51 = vpop.f32.mrf.mxu0 }
 0x27c   : > { %v2246_v17 = vadd.f32 %v2245_v51, %v7318_v11  ;;  %v2424_v35 = vmax.f32 %v1906_v27, 0.0 }
 0x27d   : > { %v7772_v28 = vpop.f32.mrf.mxu1  ;;  %v2247_v38 = vpop.f32.mrf.mxu0 }
 0x27e   : > { %v2450_v6 = vmax.f32 %v2246_v17, 0.0  ;;  %v2422_v38 = vmax.f32 %v1904_v48, 0.0 }
 0x27f   : > { %v7778_v32 = vpop.f32.mrf.mxu1  ;;  %v2250_v20 = vpop.f32.mrf.mxu0  ;;  %2961 = vmatmul.mubr.bf16.gmra.mxu1 %v2538_v2  ;;  %v2415_v2 = vmax.f32 %v1892_v54, 0.0  ;;  %v1928_v54 = vadd.f32 %v7736_v44, %v7322_v62 }
 0x280   : > { %v2561_v37 = vpack.c.bf16 %v2450_v6, %v2447_v30  ;;  %2968 = vmatprep.mubr.bf16.mxu1 %v2542_v5  ;;  %v2251_v8 = vadd.f32 %v2250_v20, %v7318_v11 }
 0x281   : > { %v7782_v22 = vpop.f32.mrf.mxu1  ;;  %v2252_v47 = vpop.f32.mrf.mxu0  ;;  %v2544_v30 = vpack.c.bf16 %v2418_v31, %v2415_v2  ;;  %v1912_v31 = vadd.f32 %v7706_v45, %v7346_v24  ;;  %v2437_v44 = vmax.f32 %v1928_v54, 0.0 }
 0x282   : > { %5965 = vmatprep.mubr.bf16.mxu0 %v2561_v37  ;;  %v2453_v33 = vmax.f32 %v2251_v8, 0.0  ;;  %v2548_v37 = vpack.c.bf16 %v2425_v3, %v2422_v38  ;;  %v1914_v8 = vadd.f32 %v7710_v19, %v7322_v62  ;;  %v1916_v19 = vadd.f32 %v7713_v58, %v7346_v24 }
 0x283   : > { %v7785_v53 = vpop.f32.mrf.mxu1  ;;  %v2253_v60 = vpop.f32.mrf.mxu0 }
 0x284   : > { %v2254_v34 = vadd.f32 %v2253_v60, %v7318_v11  ;;  %v2430_v2 = vmax.f32 %v1916_v19, 0.0 }
 0x285   : > { %v7790_v50 = vpop.f32.mrf.mxu1  ;;  %v2255_v21 = vpop.f32.mrf.mxu0 }
 0x286   : > { %v2456_v52 = vmax.f32 %v2254_v34, 0.0  ;;  %v2428_v21 = vmax.f32 %v1914_v8, 0.0 }
 0x287   : > { %v7796_v0 = vpop.f32.mrf.mxu1  ;;  %v2258_v10 = vpop.f32.mrf.mxu0  ;;  %2969 = vmatmul.mubr.bf16.gmra.mxu1 %v2541_v14  ;;  %v2421_v14 = vmax.f32 %v1902_v61, 0.0  ;;  %v1938_v61 = vadd.f32 %v7754_v57, %v7322_v62 }
 0x288   : > { %v2564_v15 = vpack.c.bf16 %v2456_v52, %v2453_v33  ;;  %2976 = vmatprep.mubr.bf16.mxu1 %v2545_v42  ;;  %v2259_v17 = vadd.f32 %v2258_v10, %v7318_v11 }
 0x289   : > { %v7800_v51 = vpop.f32.mrf.mxu1  ;;  %v2260_v41 = vpop.f32.mrf.mxu0  ;;  %v2547_v33 = vpack.c.bf16 %v2424_v35, %v2421_v14  ;;  %v1922_v35 = vadd.f32 %v7724_v12, %v7346_v24  ;;  %v2443_v57 = vmax.f32 %v1938_v61, 0.0 }
 0x28a   : > { %5966 = vmatmul.mubr.bf16.gmra.mxu0 %v2564_v15  ;;  %v2459_v20 = vmax.f32 %v2259_v17, 0.0  ;;  %v2551_v15 = vpack.c.bf16 %v2431_v39, %v2428_v21  ;;  %v1924_v17 = vadd.f32 %v7728_v63, %v7322_v62  ;;  %v1926_v63 = vadd.f32 %v7731_v9, %v7346_v24 }
 0x28b   : > { %v7803_v43 = vpop.f32.mrf.mxu1  ;;  %v2261_v36 = vpop.f32.mrf.mxu0 }
 0x28c   : > { %v2262_v7 = vadd.f32 %v2261_v36, %v7318_v11  ;;  %v2436_v14 = vmax.f32 %v1926_v63, 0.0 }
 0x28d   : > { %v7808_v6 = vpop.f32.mrf.mxu1  ;;  %v2263_v5 = vpop.f32.mrf.mxu0 }
 0x28e   : > { %v2462_v56 = vmax.f32 %v2262_v7, 0.0  ;;  %v2434_v5 = vmax.f32 %v1924_v17, 0.0 }
 0x28f   : > { %v7814_v47 = vpop.f32.mrf.mxu1  ;;  %v2266_v49 = vpop.f32.mrf.mxu0  ;;  %2977 = vmatmul.mubr.bf16.gmra.mxu1 %v2544_v30  ;;  %v2427_v30 = vmax.f32 %v1912_v31, 0.0  ;;  %v1948_v31 = vadd.f32 %v7772_v28, %v7322_v62 }
 0x290   : > { %v2567_v13 = vpack.c.bf16 %v2462_v56, %v2459_v20  ;;  %2984 = vmatprep.mubr.bf16.mxu1 %v2548_v37  ;;  %v2267_v34 = vadd.f32 %v2266_v49, %v7318_v11 }
 0x291   : > { %v7818_v60 = vpop.f32.mrf.mxu1  ;;  %v2268_v4 = vpop.f32.mrf.mxu0  ;;  %v2550_v20 = vpack.c.bf16 %v2430_v2, %v2427_v30  ;;  %v1932_v2 = vadd.f32 %v7742_v25, %v7346_v24  ;;  %v2449_v28 = vmax.f32 %v1948_v31, 0.0 }
 0x292   : > { %5969 = vmatprep.mubr.bf16.mxu0 %v2567_v13  ;;  %v2465_v10 = vmax.f32 %v2267_v34, 0.0  ;;  %v2554_v13 = vpack.c.bf16 %v2437_v44, %v2434_v5  ;;  %v1934_v34 = vadd.f32 %v7746_v23, %v7322_v62  ;;  %v1936_v23 = vadd.f32 %v7749_v59, %v7346_v24 }
 0x293   : > { %v7821_v55 = vpop.f32.mrf.mxu1  ;;  %v2269_v46 = vpop.f32.mrf.mxu0  ;;  %v1944_v59 = vadd.f32 %v7764_v18, %v7322_v62  ;;  %v2439_v5 = vmax.f32 %v1932_v2, 0.0 }
 0x294   : > { %v2270_v40 = vadd.f32 %v2269_v46, %v7318_v11 }
 0x295   : > { %v7826_v52 = vpop.f32.mrf.mxu1  ;;  %v2271_v42 = vpop.f32.mrf.mxu0 }
 0x296   : > { %v2468_v48 = vmax.f32 %v2270_v40, 0.0  ;;  %v2440_v42 = vmax.f32 %v1934_v34, 0.0 }
 0x297   : > { %v7832_v41 = vpop.f32.mrf.mxu1  ;;  %v2274_v3 = vpop.f32.mrf.mxu0  ;;  %2985 = vmatmul.mubr.bf16.gmra.mxu1 %v2547_v33  ;;  %v2433_v33 = vmax.f32 %v1922_v35, 0.0 }
 0x298   : > { %v2570_v58 = vpack.c.bf16 %v2468_v48, %v2465_v10  ;;  %2992 = vmatprep.mubr.bf16.mxu1 %v2551_v15  ;;  %v2275_v7 = vadd.f32 %v2274_v3, %v7318_v11 }
 0x299   : > { %v7836_v36 = vpop.f32.mrf.mxu1  ;;  %v2276_v38 = vpop.f32.mrf.mxu0  ;;  %v2553_v10 = vpack.c.bf16 %v2436_v14, %v2433_v33 }
 0x29a   : > { %5970 = vmatmul.mubr.bf16.gmra.mxu0 %v2570_v58  ;;  %v2471_v49 = vmax.f32 %v2275_v7, 0.0  ;;  %v2557_v58 = vpack.c.bf16 %v2443_v57, %v2440_v42  ;;  %v2442_v7 = vmax.f32 %v1936_v23, 0.0  ;;  %v1964_v23 = vadd.f32 %v7800_v51, %v7322_v62 }
 0x29b   : > { %v7839_v27 = vpop.f32.mrf.mxu1  ;;  %v2277_v45 = vpop.f32.mrf.mxu0 }
 0x29c   : > { %v2278_v29 = vadd.f32 %v2277_v45, %v7318_v11  ;;  %v2556_v63 = vpack.c.bf16 %v2442_v7, %v2439_v5  ;;  %v1978_v7 = vadd.f32 %v7826_v52, %v7322_v62 }
 0x29d   : > { %v7844_v56 = vpop.f32.mrf.mxu1  ;;  %v2279_v37 = vpop.f32.mrf.mxu0 }
 0x29e   : > { %v2474_v8 = vmax.f32 %v2278_v29, 0.0  ;;  %v1946_v37 = vadd.f32 %v7767_v1, %v7346_v24 }
 0x29f   : > { %v7850_v4 = vpop.f32.mrf.mxu1  ;;  %v2282_v39 = vpop.f32.mrf.mxu0  ;;  %2993 = vmatmul.mubr.bf16.gmra.mxu1 %v2550_v20  ;;  %v2446_v20 = vmax.f32 %v1944_v59, 0.0  ;;  %v1966_v59 = vadd.f32 %v7803_v43, %v7346_v24 }
 0x2a0   : > { %v2573_v9 = vpack.c.bf16 %v2474_v8, %v2471_v49  ;;  %3000 = vmatprep.mubr.bf16.mxu1 %v2554_v13  ;;  %v2283_v40 = vadd.f32 %v2282_v39, %v7318_v11  ;;  %v1958_v49 = vadd.f32 %v7790_v50, %v7322_v62  ;;  %v1942_v13 = vadd.f32 %v7760_v16, %v7346_v24 }
 0x2a1   : > { %v7854_v46 = vpop.f32.mrf.mxu1  ;;  %v2284_v21 = vpop.f32.mrf.mxu0  ;;  %v2560_v8 = vpack.c.bf16 %v2449_v28, %v2446_v20  ;;  %v1954_v39 = vadd.f32 %v7782_v22, %v7322_v62  ;;  %v2448_v34 = vmax.f32 %v1946_v37, 0.0  ;;  %v1956_v16 = vadd.f32 %v7785_v53, %v7346_v24 }
 0x2a2   : > { %5973 = vmatprep.mubr.bf16.mxu0 %v2573_v9  ;;  %v2477_v3 = vmax.f32 %v2283_v40, 0.0  ;;  %v2455_v14 = vmax.f32 %v1958_v49, 0.0  ;;  %v2445_v21 = vmax.f32 %v1942_v13, 0.0  ;;  %v1968_v22 = vadd.f32 %v7808_v6, %v7322_v62  ;;  %v6289_v6 = vld [vmem:[%s8924_s9 + $0x38] sm:$0xff]  }
 0x2a3   : > { %v7857_v19 = vpop.f32.mrf.mxu1  ;;  %v2285_v12 = vpop.f32.mrf.mxu0  ;;  %v2452_v50 = vmax.f32 %v1954_v39, 0.0  ;;  %6057 = vmatprep.subr.bf16.mxu0 %v6289_v6  ;;  %v1962_v28 = vadd.f32 %v7796_v0, %v7346_v24  ;;  %v1974_v20 = vadd.f32 %v7818_v60, %v7322_v62  ;;  %v1976_v0 = vadd.f32 %v7821_v55, %v7346_v24 }
 0x2a4   : > { %v2286_v54 = vadd.f32 %v2285_v12, %v7318_v11  ;;  %v2559_v40 = vpack.c.bf16 %v2448_v34, %v2445_v21  ;;  %6058 = vmatpush3.bf16.msra.mxu0 %v6289_v6  ;;  %v1988_v60 = vadd.f32 %v7844_v56, %v7322_v62  ;;  %v6290_v56 = vld [vmem:[%s8924_s9 + $0x30] sm:$0xff]   ;;  %v1982_v6 = vadd.f32 %v7832_v41, %v7346_v24 }
 0x2a5   : > { %v7862_v48 = vpop.f32.mrf.mxu1  ;;  %v2287_v15 = vpop.f32.mrf.mxu0  ;;  %v2563_v42 = vpack.c.bf16 %v2455_v14, %v2452_v50  ;;  %v2457_v49 = vmax.f32 %v1962_v28, 0.0  ;;  %v2464_v52 = vmax.f32 %v1974_v20, 0.0  ;;  %v1972_v14 = vadd.f32 %v7814_v47, %v7346_v24  ;;  %6059 = vmatprep.subr.bf16.mxu0 %v6290_v56 }
 0x2a6   : > { %v2480_v17 = vmax.f32 %v2286_v54, 0.0  ;;  %v1952_v54 = vadd.f32 %v7778_v32, %v7346_v24  ;;  %v2454_v15 = vmax.f32 %v1956_v16, 0.0  ;;  %v2458_v32 = vmax.f32 %v1964_v23, 0.0 }
 0x2a7   : > { %v7868_v38 = vpop.f32.mrf.mxu1  ;;  %3001 = vmatmul.mubr.bf16.gmra.mxu1 %v2553_v10  ;;  %v7870_v11 = vpop.f32.mrf.mxu0  ;;  %v1984_v50 = vadd.f32 %v7836_v36, %v7322_v62  ;;  %v1986_v23 = vadd.f32 %v7839_v27, %v7346_v24  ;;  %v7965_v27 = vld [vmem:[%s8921_s6] ss:$0 sm:$0xff]  ;;  %v1996_v20 = vadd.f32 %v7857_v19, %v7346_v24 }
 0x2a8   : > { %v2576_v44 = vpack.c.bf16 %v2480_v17, %v2477_v3  ;;  %3008 = vmatprep.mubr.bf16.mxu1 %v2557_v58  ;;  %v2461_v3 = vmax.f32 %v1968_v22, 0.0  ;;  %v2451_v17 = vmax.f32 %v1952_v54, 0.0  ;;  %v2463_v22 = vmax.f32 %v1972_v14, 0.0  ;;  %6060 = vmatpush3.bf16.msra.mxu0 %v6290_v56 }
 0x2a9   : > { %v2812_v30 = vpop.f32.mrf.mxu1  ;;  %v7874_v45 = vpop.f32.mrf.mxu0  ;;  %v2470_v47 = vmax.f32 %v1984_v50, 0.0 }
 0x2aa   : > { %5974 = vmatmul.mubr.bf16.gmra.mxu0 %v2576_v44  ;;  %v2562_v2 = vpack.c.bf16 %v2454_v15, %v2451_v17  ;;  %v2566_v30 = vpack.c.bf16 %v2461_v3, %v2458_v32  ;;  %v1994_v32 = vadd.f32 %v7854_v46, %v7322_v62 }
 0x2ab   : > { %v7876_v29 = vpop.f32.mrf.mxu1  ;;  %v7878_v25 = vpop.f32.mrf.mxu0 }
 0x2ac   : > { %v2814_v41 = vadd.f32 %v7965_v27, %v7876_v29  ;;  %v2476_v28 = vmax.f32 %v1994_v32, 0.0  ;;  %v1992_v29 = vadd.f32 %v7850_v4, %v7346_v24  ;;  %v6291_v24 = vld [vmem:[%s8924_s9 + $0x28] sm:$0xff]  }
 0x2ad   : > { %v2815_v61 = vpop.f32.mrf.mxu1  ;;  %v7882_v18 = vpop.f32.mrf.mxu0  ;;  %6061 = vmatprep.subr.bf16.mxu0 %v6291_v24 }
 0x2ae   : > { %v2467_v61 = vmax.f32 %v1978_v7, 0.0  ;;  %v2469_v7 = vmax.f32 %v1982_v6, 0.0  ;;  %v2475_v4 = vmax.f32 %v1992_v29, 0.0  ;;  %6062 = vmatpush3.bf16.msra.mxu0 %v6291_v24 }
 0x2af   : > { %v7888_v35 = vpop.f32.mrf.mxu1  ;;  %3009 = vmatmul.mubr.bf16.gmra.mxu1 %v2556_v63  ;;  %v7892_v9 = vpop.f32.mrf.mxu0  ;;  %v2460_v63 = vmax.f32 %v1966_v59, 0.0 }
 0x2b0   : > { %3016 = vmatprep.mubr.bf16.mxu1 %v2560_v8 }
 0x2b1   : > { %v2820_v1 = vpop.f32.mrf.mxu1  ;;  %v7898_v33 = vpop.f32.mrf.mxu0  ;;  %v2565_v13 = vpack.c.bf16 %v2460_v63, %v2457_v49 }
 0x2b2   : > { %v2569_v1 = vpack.c.bf16 %v2467_v61, %v2464_v52  ;;  %v3103_v61 = vadd.f32 %v7882_v18, %v2814_v41 }
 0x2b3   : > { %v7894_v57 = vpop.f32.mrf.mxu1  ;;  %v7908_v31 = vpop.f32.mrf.mxu0 }
 0x2b5   : > { %v2823_v12 = vpop.f32.mrf.mxu1  ;;  %v7917_v51 = vpop.f32.mrf.mxu0 }
 0x2b6   : > { %v2473_v12 = vmax.f32 %v1988_v60, 0.0  ;;  %v3355_v60 = vmax.f32 %v3103_v61, 0.0 }
 0x2b7   : > { %v7904_v10 = vpop.f32.mrf.mxu1  ;;  %3017 = vmatmul.mubr.bf16.gmra.mxu1 %v2559_v40  ;;  %v7927_v43 = vpop.f32.mrf.mxu0  ;;  %v2466_v40 = vmax.f32 %v1976_v0, 0.0  ;;  %v2478_v0 = vmax.f32 %v1996_v20, 0.0 }
 0x2b8   : > { %3024 = vmatprep.mubr.bf16.mxu1 %v2563_v42  ;;  %v2572_v3 = vpack.c.bf16 %v2473_v12, %v2470_v47 }
 0x2b9   : > { %v2828_v53 = vpop.f32.mrf.mxu1  ;;  %v7933_v39 = vpop.f32.mrf.mxu0  ;;  %v2568_v54 = vpack.c.bf16 %v2466_v40, %v2463_v22  ;;  %v2574_v50 = vpack.c.bf16 %v2478_v0, %v2475_v4 }
 0x2ba   : > { %v1998_v53 = vadd.f32 %v7862_v48, %v7322_v62  ;;  %v2811_v62 = vadd.f32 %v7965_v27, %v7868_v38  ;;  %v2822_v38 = vadd.f32 %v7965_v27, %v7894_v57  ;;  %v2827_v57 = vadd.f32 %v7965_v27, %v7904_v10 }
 0x2bb   : > { %v7913_v58 = vpop.f32.mrf.mxu1  ;;  %v7943_v16 = vpop.f32.mrf.mxu0 }
 0x2bc   : > { %v2830_v18 = vadd.f32 %v7965_v27, %v7913_v58  ;;  %v3111_v40 = vadd.f32 %v7878_v25, %v2822_v38 }
 0x2bd   : > { %v2831_v44 = vpop.f32.mrf.mxu1  ;;  %v7952_v36 = vpop.f32.mrf.mxu0 }
 0x2be   : > { %v2479_v44 = vmax.f32 %v1998_v53, 0.0  ;;  %v3119_v58 = vadd.f32 %v7917_v51, %v2830_v18 }
 0x2bf   : > { %v7923_v5 = vpop.f32.mrf.mxu1  ;;  %3025 = vmatmul.mubr.bf16.gmra.mxu1 %v2562_v2  ;;  %v2472_v2 = vmax.f32 %v1986_v23, 0.0  ;;  %v7967_v59 = vpop.f32.mrf.mxu0 }
 0x2c0   : > { %3032 = vmatprep.mubr.bf16.mxu1 %v2566_v30  ;;  %v2575_v49 = vpack.c.bf16 %v2479_v44, %v2476_v28 }
 0x2c1   : > { %v2836_v37 = vpop.f32.mrf.mxu1  ;;  %v2571_v46 = vpack.c.bf16 %v2472_v2, %v2469_v7  ;;  %v7977_v63 = vpop.f32.mrf.mxu0 }
 0x2c3   : > { %v7929_v8 = vpop.f32.mrf.mxu1 }
 0x2c4   : > { %v2838_v10 = vadd.f32 %v7965_v27, %v7929_v8 }
 0x2c5   : > { %v2839_v34 = vpop.f32.mrf.mxu1 }
 0x2c6   : > { %v7985_v34 = vpop.f32.mrf.mxu0  ;;  %v3127_v2 = vadd.f32 %v7908_v31, %v2838_v10 }
 0x2c7   : > { %v7939_v21 = vpop.f32.mrf.mxu1  ;;  %3033 = vmatmul.mubr.bf16.gmra.mxu1 %v2565_v13  ;;  %v3100_v13 = vadd.f32 %v7874_v45, %v2811_v62  ;;  %v2819_v45 = vadd.f32 %v7965_v27, %v7888_v35  ;;  %v3116_v35 = vadd.f32 %v7898_v33, %v2827_v57 }
 0x2c8   : > { %3040 = vmatprep.mubr.bf16.mxu1 %v2569_v1  ;;  %v2843_v33 = vadd.f32 %v7965_v27, %v7939_v21 }
 0x2c9   : > { %v2844_v55 = vpop.f32.mrf.mxu1  ;;  %v3354_v14 = vmax.f32 %v3100_v13, 0.0  ;;  %v3108_v22 = vadd.f32 %v7870_v11, %v2819_v45  ;;  %v2835_v11 = vadd.f32 %v7965_v27, %v7923_v5  ;;  %v3358_v6 = vmax.f32 %v3116_v35, 0.0 }
 0x2ca   : > { %v3150_v55 = vpop.f32.mrf.mxu0  ;;  %v3132_v28 = vadd.f32 %v7933_v39, %v2843_v33  ;;  %v3361_v5 = vmax.f32 %v3127_v2, 0.0 }
 0x2cb   : > { %v7948_v42 = vpop.f32.mrf.mxu1  ;;  %v3418_v56 = vpack.c.bf16 %v3355_v60, %v3354_v14  ;;  %v3356_v51 = vmax.f32 %v3108_v22, 0.0  ;;  %v3124_v7 = vadd.f32 %v7892_v9, %v2835_v11  ;;  %v6293_v11 = vld [vmem:[%s8924_s9 + $0x18] sm:$0xff]  }
 0x2cc   : > { %v8002_v23 = vpop.f32.mrf.mxu0  ;;  %v2846_v53 = vadd.f32 %v7965_v27, %v7948_v42  ;;  %v3362_v39 = vmax.f32 %v3132_v28, 0.0 }
 0x2cd   : > { %v2847_v15 = vpop.f32.mrf.mxu1 }
 0x2ce   : > { %v3359_v15 = vmax.f32 %v3119_v58, 0.0  ;;  %v3163_v8 = vpop.f32.mrf.mxu0  ;;  %v3135_v44 = vadd.f32 %v7952_v36, %v2846_v53  ;;  %v6292_v36 = vld [vmem:[%s8924_s9 + $0x20] sm:$0xff]  }
 0x2cf   : > { %v7958_v17 = vpop.f32.mrf.mxu1  ;;  %3041 = vmatmul.mubr.bf16.gmra.mxu1 %v2568_v54  ;;  %v3357_v54 = vmax.f32 %v3111_v40, 0.0  ;;  %6063 = vmatprep.subr.bf16.mxu0 %v6292_v36 }
 0x2d0   : > { %3048 = vmatprep.mubr.bf16.mxu1 %v2572_v3  ;;  %v3420_v41 = vpack.c.bf16 %v3359_v15, %v3358_v6  ;;  %v5932_v62 = vpop.f32.mrf.mxu0  ;;  %v3363_v20 = vmax.f32 %v3135_v44, 0.0  ;;  %v2851_v9 = vadd.f32 %v7965_v27, %v7958_v17  ;;  %6064 = vmatpush3.bf16.msra.mxu0 %v6292_v36 }
 0x2d1   : > { %v2852_v48 = vpop.f32.mrf.mxu1  ;;  %v3419_v32 = vpack.c.bf16 %v3357_v54, %v3356_v51  ;;  %6065 = vmatprep.subr.bf16.mxu0 %v6293_v11 }
 0x2d2   : > { %v3166_v13 = vpop.f32.mrf.mxu0  ;;  %v3140_v60 = vadd.f32 %v7927_v43, %v2851_v9 }
 0x2d3   : > { %v7971_v30 = vpop.f32.mrf.mxu1 }
 0x2d4   : > { %v2854_v21 = vadd.f32 %v7965_v27, %v7971_v30  ;;  %v5935_v17 = vpop.f32.mrf.mxu0  ;;  %6066 = vmatpush3.bf16.msra.mxu0 %v6293_v11 }
 0x2d5   : > { %v2855_v37 = vpop.f32.mrf.mxu1 }
 0x2d6   : > { %v3360_v37 = vmax.f32 %v3124_v7, 0.0  ;;  %v3143_v30 = vadd.f32 %v7943_v16, %v2854_v21  ;;  %v3364_v16 = vmax.f32 %v3140_v60, 0.0 }
 0x2d7   : > { %v2858_v52 = vpop.f32.mrf.mxu1  ;;  %3049 = vmatmul.mubr.bf16.gmra.mxu1 %v2571_v46 }
 0x2d8   : > { %3056 = vmatprep.mubr.bf16.mxu1 %v2575_v49  ;;  %v2859_v49 = vadd.f32 %v7965_v27, %v2858_v52  ;;  %v3421_v29 = vpack.c.bf16 %v3361_v5, %v3360_v37  ;;  %v3365_v4 = vmax.f32 %v3143_v30, 0.0 }
 0x2d9   : > { %v2860_v19 = vpop.f32.mrf.mxu1 }
 0x2da   : > { %v3422_v19 = vpack.c.bf16 %v3363_v20, %v3362_v39  ;;  %v3148_v24 = vadd.f32 %v7977_v63, %v2859_v49 }
 0x2db   : > { %v2861_v1 = vpop.f32.mrf.mxu1 }
 0x2dc   : > { %v2862_v31 = vadd.f32 %v7965_v27, %v2861_v1  ;;  %v3366_v40 = vmax.f32 %v3148_v24, 0.0  ;;  %v6294_v24 = vld [vmem:[%s8924_s9 + $0x10] sm:$0xff]  }
 0x2dd   : > { %v2863_v12 = vpop.f32.mrf.mxu1  ;;  %6067 = vmatprep.subr.bf16.mxu0 %v6294_v24 }
 0x2de   : > { %v3151_v38 = vadd.f32 %v3150_v55, %v2862_v31  ;;  %v3179_v55 = vpop.f32.mrf.mxu0  ;;  %v3423_v12 = vpack.c.bf16 %v3365_v4, %v3364_v16  ;;  %6068 = vmatpush3.bf16.msra.mxu0 %v6294_v24 }
 0x2df   : > { %v2866_v47 = vpop.f32.mrf.mxu1  ;;  %3057 = vmatmul.mubr.bf16.gmra.mxu1 %v2574_v50 }
 0x2e0   : > { %5993 = vmatprep.mubr.bf16.mxu1 %v3418_v56  ;;  %v3367_v1 = vmax.f32 %v3151_v38, 0.0  ;;  %v2867_v57 = vadd.f32 %v7965_v27, %v2866_v47 }
 0x2e1   : > { %v2868_v25 = vpop.f32.mrf.mxu1 }
 0x2e2   : > { %v3424_v22 = vpack.c.bf16 %v3367_v1, %v3366_v40  ;;  %v3156_v35 = vadd.f32 %v7967_v59, %v2867_v57  ;;  %v5936_v25 = vpop.f32.mrf.mxu0 }
 0x2e3   : > { %v2869_v3 = vpop.f32.mrf.mxu1 }
 0x2e4   : > { %v2870_v52 = vadd.f32 %v7965_v27, %v2869_v3  ;;  %v3182_v2 = vpop.f32.mrf.mxu0 }
 0x2e5   : > { %v2871_v48 = vpop.f32.mrf.mxu1 }
 0x2e6   : > { %v3159_v63 = vadd.f32 %v7985_v34, %v2870_v52  ;;  %v3368_v34 = vmax.f32 %v3156_v35, 0.0  ;;  %v5939_v21 = vpop.f32.mrf.mxu0 }
 0x2e7   : > { %v2874_v42 = vpop.f32.mrf.mxu1  ;;  %5994 = vmatmul.mubr.bf16.vlgmr.msra.gmra.mxu1 %v3419_v32 }
 0x2e8   : > { %5997 = vmatprep.mubr.bf16.mxu1 %v3420_v41  ;;  %v2875_v43 = vadd.f32 %v7965_v27, %v2874_v42  ;;  %v3369_v15 = vmax.f32 %v3159_v63, 0.0  ;;  %v3195_v39 = vpop.f32.mrf.mxu0 }
 0x2e9   : > { %v2876_v46 = vpop.f32.mrf.mxu1 }
 0x2ea   : > { %v3164_v10 = vadd.f32 %v3163_v8, %v2875_v43  ;;  %v3425_v8 = vpack.c.bf16 %v3369_v15, %v3368_v34 }
 0x2eb   : > { %v2877_v61 = vpop.f32.mrf.mxu1 }
 0x2ec   : > { %v2878_v14 = vadd.f32 %v7965_v27, %v2877_v61  ;;  %v3370_v33 = vmax.f32 %v3164_v10, 0.0 }
 0x2ed   : > { %v2879_v0 = vpop.f32.mrf.mxu1 }
 0x2ee   : > { %v3167_v56 = vadd.f32 %v3166_v13, %v2878_v14 }
 0x2ef   : > { %v2882_v18 = vpop.f32.mrf.mxu1  ;;  %5998 = vmatmul.mubr.bf16.gmra.mxu1 %v3421_v29 }
 0x2f0   : > { %6001 = vmatprep.mubr.bf16.mxu1 %v3422_v19  ;;  %v3371_v51 = vmax.f32 %v3167_v56, 0.0  ;;  %v2883_v3 = vadd.f32 %v7965_v27, %v2882_v18  ;;  %v5940_v19 = vpop.f32.mrf.mxu0 }
 0x2f1   : > { %v2884_v45 = vpop.f32.mrf.mxu1 }
 0x2f2   : > { %v3426_v7 = vpack.c.bf16 %v3371_v51, %v3370_v33  ;;  %v3172_v42 = vadd.f32 %v8002_v23, %v2883_v3  ;;  %v3198_v14 = vpop.f32.mrf.mxu0 }
 0x2f3   : > { %v2885_v50 = vpop.f32.mrf.mxu1 }
 0x2f4   : > { %v2886_v47 = vadd.f32 %v7965_v27, %v2885_v50  ;;  %v3372_v36 = vmax.f32 %v3172_v42, 0.0 }
 0x2f5   : > { %v2887_v58 = vpop.f32.mrf.mxu1 }
 0x2f6   : > { %v3175_v48 = vadd.f32 %v5932_v62, %v2886_v47 }
 0x2f7   : > { %v2890_v54 = vpop.f32.mrf.mxu1  ;;  %6002 = vmatmul.mubr.bf16.gmra.mxu1 %v3423_v12  ;;  %v5943_v12 = vpop.f32.mrf.mxu0 }
 0x2f8   : > { %6005 = vmatprep.mubr.bf16.mxu1 %v3424_v22  ;;  %v2891_v59 = vadd.f32 %v7965_v27, %v2890_v54  ;;  %v3373_v46 = vmax.f32 %v3175_v48, 0.0 }
 0x2f9   : > { %v2892_v53 = vpop.f32.mrf.mxu1  ;;  %v3211_v54 = vpop.f32.mrf.mxu0 }
 0x2fa   : > { %v3180_v5 = vadd.f32 %v3179_v55, %v2891_v59  ;;  %v3427_v49 = vpack.c.bf16 %v3373_v46, %v3372_v36 }
 0x2fb   : > { %v2893_v6 = vpop.f32.mrf.mxu1  ;;  %v5944_v11 = vpop.f32.mrf.mxu0 }
 0x2fc   : > { %v2894_v32 = vadd.f32 %v7965_v27, %v2893_v6  ;;  %v3374_v61 = vmax.f32 %v3180_v5, 0.0  ;;  %v6295_v6 = vld [vmem:[%s8924_s9 + $0x8] sm:$0xff]  }
 0x2fd   : > { %v2895_v44 = vpop.f32.mrf.mxu1  ;;  %6069 = vmatprep.subr.bf16.mxu0 %v6295_v6 }
 0x2fe   : > { %v3183_v41 = vadd.f32 %v3182_v2, %v2894_v32  ;;  %v3214_v2 = vpop.f32.mrf.mxu0  ;;  %6070 = vmatpush3.bf16.msra.mxu0 %v6295_v6 }
 0x2ff   : > { %v2898_v28 = vpop.f32.mrf.mxu1  ;;  %6006 = vmatmul.mubr.bf16.gmra.mxu1 %v3425_v8 }
 0x300   : > { %6009 = vmatprep.mubr.bf16.mxu1 %v3426_v7  ;;  %v3375_v31 = vmax.f32 %v3183_v41, 0.0  ;;  %v2899_v37 = vadd.f32 %v7965_v27, %v2898_v28  ;;  %v5947_v28 = vpop.f32.mrf.mxu0 }
 0x301   : > { %v2900_v20 = vpop.f32.mrf.mxu1 }
 0x302   : > { %v3428_v23 = vpack.c.bf16 %v3375_v31, %v3374_v61  ;;  %v3188_v30 = vadd.f32 %v5935_v17, %v2899_v37  ;;  %v3227_v36 = vpop.f32.mrf.mxu0 }
 0x303   : > { %v2901_v9 = vpop.f32.mrf.mxu1 }
 0x304   : > { %v2902_v62 = vadd.f32 %v7965_v27, %v2901_v9  ;;  %v3376_v4 = vmax.f32 %v3188_v30, 0.0  ;;  %v6296_v30 = vld [vmem:[%s8924_s9] sm:$0xff]  }
 0x305   : > { %v2903_v29 = vpop.f32.mrf.mxu1  ;;  %6071 = vmatprep.subr.bf16.mxu0 %v6296_v30 }
 0x306   : > { %v3191_v13 = vadd.f32 %v5936_v25, %v2902_v62  ;;  %v5948_v29 = vpop.f32.mrf.mxu0  ;;  %6072 = vmatpush3.bf16.msra.mxu0 %v6296_v30 }
 0x307   : > { %v2906_v0 = vpop.f32.mrf.mxu1  ;;  %6010 = vmatmul.mubr.bf16.gmra.mxu1 %v3427_v49 }
 0x308   : > { %v2907_v38 = vadd.f32 %v7965_v27, %v2906_v0  ;;  %6013 = vmatprep.mubr.bf16.mxu1 %v3428_v23  ;;  %v3377_v60 = vmax.f32 %v3191_v13, 0.0 }
 0x309   : > { %v2908_v18 = vpop.f32.mrf.mxu1 }
 0x30a   : > { %v3196_v45 = vadd.f32 %v3195_v39, %v2907_v38  ;;  %v3429_v17 = vpack.c.bf16 %v3377_v60, %v3376_v4  ;;  %v3230_v60 = vpop.f32.mrf.mxu0 }
 0x30b   : > { %v2909_v52 = vpop.f32.mrf.mxu1 }
 0x30c   : > { %v2910_v1 = vadd.f32 %v7965_v27, %v2909_v52  ;;  %v3378_v40 = vmax.f32 %v3196_v45, 0.0 }
 0x30d   : > { %v2911_v16 = vpop.f32.mrf.mxu1 }
 0x30e   : > { %v3199_v57 = vadd.f32 %v3198_v14, %v2910_v1  ;;  %v5951_v14 = vpop.f32.mrf.mxu0 }
 0x30f   : > { %v2914_v50 = vpop.f32.mrf.mxu1  ;;  %6014 = vmatmul.mubr.bf16.gmra.mxu1 %v3429_v17 }
 0x310   : > { %v3379_v43 = vmax.f32 %v3199_v57, 0.0  ;;  %v2915_v55 = vadd.f32 %v7965_v27, %v2914_v50 }
 0x311   : > { %v2916_v63 = vpop.f32.mrf.mxu1 }
 0x312   : > { %v3430_v58 = vpack.c.bf16 %v3379_v43, %v3378_v40  ;;  %v3204_v22 = vadd.f32 %v5939_v21, %v2915_v55  ;;  %v3243_v43 = vpop.f32.mrf.mxu0 }
 0x313   : > { %v2917_v56 = vpop.f32.mrf.mxu1 }
 0x314   : > { %v2918_v35 = vadd.f32 %v7965_v27, %v2917_v56  ;;  %6017 = vmatprep.mubr.bf16.mxu1 %v3430_v58  ;;  %v3380_v47 = vmax.f32 %v3204_v22, 0.0 }
 0x315   : > { %v2919_v10 = vpop.f32.mrf.mxu1 }
 0x316   : > { %v3207_v25 = vadd.f32 %v5940_v19, %v2918_v35  ;;  %v5952_v35 = vpop.f32.mrf.mxu0 }
 0x317   : > { %v2922_v15 = vpop.f32.mrf.mxu1 }
 0x318   : > { %v3381_v53 = vmax.f32 %v3207_v25, 0.0  ;;  %v2923_v51 = vadd.f32 %v7965_v27, %v2922_v15 }
 0x319   : > { %v2924_v34 = vpop.f32.mrf.mxu1 }
 0x31a   : > { %v3431_v3 = vpack.c.bf16 %v3381_v53, %v3380_v47  ;;  %v3212_v59 = vadd.f32 %v3211_v54, %v2923_v51  ;;  %v3246_v53 = vpop.f32.mrf.mxu0 }
 0x31b   : > { %v2925_v33 = vpop.f32.mrf.mxu1 }
 0x31c   : > { %v2926_v32 = vadd.f32 %v7965_v27, %v2925_v33  ;;  %6018 = vmatmul.mubr.bf16.gmra.mxu1 %v3431_v3  ;;  %v3382_v41 = vmax.f32 %v3212_v59, 0.0  ;;  %v5955_v59 = vpop.f32.mrf.mxu0 }
 0x31d   : > { %v2927_v8 = vpop.f32.mrf.mxu1 }
 0x31e   : > { %v3215_v48 = vadd.f32 %v3214_v2, %v2926_v32 }
 0x31f   : > { %v2930_v44 = vpop.f32.mrf.mxu1 }
 0x320   : > { %v3383_v7 = vmax.f32 %v3215_v48, 0.0  ;;  %v2931_v42 = vadd.f32 %v7965_v27, %v2930_v44 }
 0x321   : > { %v2932_v5 = vpop.f32.mrf.mxu1 }
 0x322   : > { %v3432_v21 = vpack.c.bf16 %v3383_v7, %v3382_v41  ;;  %v3220_v20 = vadd.f32 %v5943_v12, %v2931_v42  ;;  %v3259_v41 = vpop.f32.mrf.mxu0 }
 0x323   : > { %v2933_v46 = vpop.f32.mrf.mxu1 }
 0x324   : > { %v2934_v31 = vadd.f32 %v7965_v27, %v2933_v46  ;;  %6021 = vmatprep.mubr.bf16.mxu1 %v3432_v21  ;;  %v3384_v62 = vmax.f32 %v3220_v20, 0.0  ;;  %v5956_v20 = vpop.f32.mrf.mxu0 }
 0x325   : > { %v2935_v37 = vpop.f32.mrf.mxu1 }
 0x326   : > { %v3223_v9 = vadd.f32 %v5944_v11, %v2934_v31 }
 0x327   : > { %v2938_v61 = vpop.f32.mrf.mxu1 }
 0x328   : > { %v3385_v39 = vmax.f32 %v3223_v9, 0.0  ;;  %v2939_v49 = vadd.f32 %v7965_v27, %v2938_v61 }
 0x329   : > { %v2940_v13 = vpop.f32.mrf.mxu1 }
 0x32a   : > { %v3433_v23 = vpack.c.bf16 %v3385_v39, %v3384_v62  ;;  %v3228_v38 = vadd.f32 %v3227_v36, %v2939_v49  ;;  %v3262_v62 = vpop.f32.mrf.mxu0 }
 0x32b   : > { %v2941_v0 = vpop.f32.mrf.mxu1 }
 0x32c   : > { %v2942_v19 = vadd.f32 %v7965_v27, %v2941_v0  ;;  %6022 = vmatmul.mubr.bf16.gmra.mxu1 %v3433_v23  ;;  %v3386_v52 = vmax.f32 %v3228_v38, 0.0  ;;  %v5959_v0 = vpop.f32.mrf.mxu0 }
 0x32d   : > { %v2943_v18 = vpop.f32.mrf.mxu1 }
 0x32e   : > { %v3231_v24 = vadd.f32 %v3230_v60, %v2942_v19 }
 0x32f   : > { %v2946_v4 = vpop.f32.mrf.mxu1 }
 0x330   : > { %v3387_v45 = vmax.f32 %v3231_v24, 0.0  ;;  %v2947_v1 = vadd.f32 %v7965_v27, %v2946_v4  ;;  %v3275_v4 = vpop.f32.mrf.mxu0 }
 0x331   : > { %v2948_v17 = vpop.f32.mrf.mxu1 }
 0x332   : > { %v3434_v16 = vpack.c.bf16 %v3387_v45, %v3386_v52  ;;  %v3236_v50 = vadd.f32 %v5947_v28, %v2947_v1 }
 0x333   : > { %v2949_v57 = vpop.f32.mrf.mxu1 }
 0x334   : > { %v2950_v40 = vadd.f32 %v7965_v27, %v2949_v57  ;;  %6025 = vmatprep.mubr.bf16.mxu1 %v3434_v16  ;;  %v3388_v58 = vmax.f32 %v3236_v50, 0.0  ;;  %v5960_v57 = vpop.f32.mrf.mxu0 }
 0x335   : > { %v2951_v55 = vpop.f32.mrf.mxu1 }
 0x336   : > { %v3239_v12 = vadd.f32 %v5948_v29, %v2950_v40 }
 0x337   : > { %v2954_v63 = vpop.f32.mrf.mxu1 }
 0x338   : > { %v3389_v56 = vmax.f32 %v3239_v12, 0.0  ;;  %v2955_v22 = vadd.f32 %v7965_v27, %v2954_v63  ;;  %v3278_v63 = vpop.f32.mrf.mxu0 }
 0x339   : > { %v2956_v54 = vpop.f32.mrf.mxu1 }
 0x33a   : > { %v3435_v10 = vpack.c.bf16 %v3389_v56, %v3388_v58  ;;  %v3244_v15 = vadd.f32 %v3243_v43, %v2955_v22 }
 0x33b   : > { %v2957_v25 = vpop.f32.mrf.mxu1 }
 0x33c   : > { %v2958_v47 = vadd.f32 %v7965_v27, %v2957_v25  ;;  %6026 = vmatmul.mubr.bf16.gmra.mxu1 %v3435_v10  ;;  %v3390_v3 = vmax.f32 %v3244_v15, 0.0  ;;  %v5963_v25 = vpop.f32.mrf.mxu0 }
 0x33d   : > { %v2959_v51 = vpop.f32.mrf.mxu1 }
 0x33e   : > { %v3247_v11 = vadd.f32 %v3246_v53, %v2958_v47 }
 0x33f   : > { %v2962_v34 = vpop.f32.mrf.mxu1 }
 0x340   : > { %v3391_v6 = vmax.f32 %v3247_v11, 0.0  ;;  %v2963_v33 = vadd.f32 %v7965_v27, %v2962_v34  ;;  %v3291_v34 = vpop.f32.mrf.mxu0 }
 0x341   : > { %v2964_v32 = vpop.f32.mrf.mxu1 }
 0x342   : > { %v3436_v2 = vpack.c.bf16 %v3391_v6, %v3390_v3  ;;  %v3252_v48 = vadd.f32 %v5951_v14, %v2963_v33 }
 0x343   : > { %v2965_v8 = vpop.f32.mrf.mxu1 }
 0x344   : > { %v2966_v44 = vadd.f32 %v7965_v27, %v2965_v8  ;;  %6029 = vmatprep.mubr.bf16.mxu1 %v3436_v2  ;;  %v3392_v5 = vmax.f32 %v3252_v48, 0.0  ;;  %v5964_v8 = vpop.f32.mrf.mxu0 }
 0x345   : > { %v2967_v7 = vpop.f32.mrf.mxu1 }
 0x346   : > { %v3255_v42 = vadd.f32 %v5952_v35, %v2966_v44 }
 0x347   : > { %v2970_v28 = vpop.f32.mrf.mxu1 }
 0x348   : > { %v3393_v21 = vmax.f32 %v3255_v42, 0.0  ;;  %v2971_v46 = vadd.f32 %v7965_v27, %v2970_v28  ;;  %v3294_v28 = vpop.f32.mrf.mxu0 }
 0x349   : > { %v2972_v31 = vpop.f32.mrf.mxu1 }
 0x34a   : > { %v3437_v36 = vpack.c.bf16 %v3393_v21, %v3392_v5  ;;  %v3260_v9 = vadd.f32 %v3259_v41, %v2971_v46 }
 0x34b   : > { %v2973_v37 = vpop.f32.mrf.mxu1 }
 0x34c   : > { %v2974_v61 = vadd.f32 %v7965_v27, %v2973_v37  ;;  %6030 = vmatmul.mubr.bf16.gmra.mxu1 %v3437_v36  ;;  %v3394_v13 = vmax.f32 %v3260_v9, 0.0  ;;  %v5967_v37 = vpop.f32.mrf.mxu0 }
 0x34d   : > { %v2975_v39 = vpop.f32.mrf.mxu1 }
 0x34e   : > { %v3263_v49 = vadd.f32 %v3262_v62, %v2974_v61 }
 0x34f   : > { %v2978_v29 = vpop.f32.mrf.mxu1 }
 0x350   : > { %v3395_v23 = vmax.f32 %v3263_v49, 0.0  ;;  %v2979_v30 = vadd.f32 %v7965_v27, %v2978_v29  ;;  %v3307_v29 = vpop.f32.mrf.mxu0 }
 0x351   : > { %v2980_v38 = vpop.f32.mrf.mxu1 }
 0x352   : > { %v3438_v19 = vpack.c.bf16 %v3395_v23, %v3394_v13  ;;  %v3268_v18 = vadd.f32 %v5955_v59, %v2979_v30 }
 0x353   : > { %v2981_v60 = vpop.f32.mrf.mxu1 }
 0x354   : > { %v2982_v24 = vadd.f32 %v7965_v27, %v2981_v60  ;;  %6033 = vmatprep.mubr.bf16.mxu1 %v3438_v19  ;;  %v3396_v14 = vmax.f32 %v3268_v18, 0.0  ;;  %v5968_v60 = vpop.f32.mrf.mxu0 }
 0x355   : > { %v2983_v52 = vpop.f32.mrf.mxu1 }
 0x356   : > { %v3271_v45 = vadd.f32 %v5956_v20, %v2982_v24 }
 0x357   : > { %v2986_v1 = vpop.f32.mrf.mxu1 }
 0x358   : > { %v3397_v17 = vmax.f32 %v3271_v45, 0.0  ;;  %v2987_v16 = vadd.f32 %v7965_v27, %v2986_v1  ;;  %v3310_v1 = vpop.f32.mrf.mxu0 }
 0x359   : > { %v2988_v50 = vpop.f32.mrf.mxu1 }
 0x35a   : > { %v3439_v40 = vpack.c.bf16 %v3397_v17, %v3396_v14  ;;  %v3276_v55 = vadd.f32 %v3275_v4, %v2987_v16 }
 0x35b   : > { %v2989_v43 = vpop.f32.mrf.mxu1 }
 0x35c   : > { %v2990_v12 = vadd.f32 %v7965_v27, %v2989_v43  ;;  %6034 = vmatmul.mubr.bf16.gmra.mxu1 %v3439_v40  ;;  %v3398_v35 = vmax.f32 %v3276_v55, 0.0  ;;  %v5971_v43 = vpop.f32.mrf.mxu0 }
 0x35d   : > { %v2991_v58 = vpop.f32.mrf.mxu1 }
 0x35e   : > { %v3279_v56 = vadd.f32 %v3278_v63, %v2990_v12 }
 0x35f   : > { %v2994_v22 = vpop.f32.mrf.mxu1 }
 0x360   : > { %v3399_v54 = vmax.f32 %v3279_v56, 0.0  ;;  %v2995_v10 = vadd.f32 %v7965_v27, %v2994_v22  ;;  %v3323_v22 = vpop.f32.mrf.mxu0 }
 0x361   : > { %v2996_v15 = vpop.f32.mrf.mxu1 }
 0x362   : > { %v3440_v47 = vpack.c.bf16 %v3399_v54, %v3398_v35  ;;  %v3284_v51 = vadd.f32 %v5959_v0, %v2995_v10 }
 0x363   : > { %v2997_v53 = vpop.f32.mrf.mxu1 }
 0x364   : > { %v2998_v11 = vadd.f32 %v7965_v27, %v2997_v53  ;;  %6037 = vmatprep.mubr.bf16.mxu1 %v3440_v47  ;;  %v3400_v59 = vmax.f32 %v3284_v51, 0.0  ;;  %v5972_v53 = vpop.f32.mrf.mxu0 }
 0x365   : > { %v2999_v3 = vpop.f32.mrf.mxu1 }
 0x366   : > { %v3287_v6 = vadd.f32 %v5960_v57, %v2998_v11 }
 0x367   : > { %v3002_v33 = vpop.f32.mrf.mxu1 }
 0x368   : > { %v3401_v32 = vmax.f32 %v3287_v6, 0.0  ;;  %v3003_v2 = vadd.f32 %v7965_v27, %v3002_v33  ;;  %v3326_v33 = vpop.f32.mrf.mxu0 }
 0x369   : > { %v3004_v48 = vpop.f32.mrf.mxu1 }
 0x36a   : > { %v3441_v44 = vpack.c.bf16 %v3401_v32, %v3400_v59  ;;  %v3292_v7 = vadd.f32 %v3291_v34, %v3003_v2 }
 0x36b   : > { %v3005_v41 = vpop.f32.mrf.mxu1 }
 0x36c   : > { %v3006_v42 = vadd.f32 %v7965_v27, %v3005_v41  ;;  %6038 = vmatmul.mubr.bf16.gmra.mxu1 %v3441_v44  ;;  %v3402_v20 = vmax.f32 %v3292_v7, 0.0  ;;  %v5975_v41 = vpop.f32.mrf.mxu0 }
 0x36d   : > { %v3007_v5 = vpop.f32.mrf.mxu1 }
 0x36e   : > { %v3295_v21 = vadd.f32 %v3294_v28, %v3006_v42 }
 0x36f   : > { %v3010_v46 = vpop.f32.mrf.mxu1 }
 0x370   : > { %v3403_v31 = vmax.f32 %v3295_v21, 0.0  ;;  %v3011_v36 = vadd.f32 %v7965_v27, %v3010_v46  ;;  %v3339_v46 = vpop.f32.mrf.mxu0 }
 0x371   : > { %v3012_v9 = vpop.f32.mrf.mxu1 }
 0x372   : > { %v3442_v61 = vpack.c.bf16 %v3403_v31, %v3402_v20  ;;  %v3300_v39 = vadd.f32 %v5963_v25, %v3011_v36 }
 0x373   : > { %v3013_v62 = vpop.f32.mrf.mxu1 }
 0x374   : > { %v3014_v49 = vadd.f32 %v7965_v27, %v3013_v62  ;;  %6041 = vmatprep.mubr.bf16.mxu1 %v3442_v61  ;;  %v3404_v0 = vmax.f32 %v3300_v39, 0.0  ;;  %v5976_v62 = vpop.f32.mrf.mxu0 }
 0x375   : > { %v3015_v13 = vpop.f32.mrf.mxu1 }
 0x376   : > { %v3303_v23 = vadd.f32 %v5964_v8, %v3014_v49 }
 0x377   : > { %v3018_v30 = vpop.f32.mrf.mxu1 }
 0x378   : > { %v3405_v38 = vmax.f32 %v3303_v23, 0.0  ;;  %v3019_v19 = vadd.f32 %v7965_v27, %v3018_v30  ;;  %v3342_v30 = vpop.f32.mrf.mxu0 }
 0x379   : > { %v3020_v18 = vpop.f32.mrf.mxu1 }
 0x37a   : > { %v3443_v24 = vpack.c.bf16 %v3405_v38, %v3404_v0  ;;  %v3308_v52 = vadd.f32 %v3307_v29, %v3019_v19 }
 0x37b   : > { %v3021_v4 = vpop.f32.mrf.mxu1 }
 0x37c   : > { %v3022_v45 = vadd.f32 %v7965_v27, %v3021_v4  ;;  %6042 = vmatmul.mubr.bf16.gmra.mxu1 %v3443_v24  ;;  %v3406_v57 = vmax.f32 %v3308_v52, 0.0 }
 0x37d   : > { %v3023_v14 = vpop.f32.mrf.mxu1 }
 0x37e   : > { %v3311_v17 = vadd.f32 %v3310_v1, %v3022_v45 }
 0x37f   : > { %v3026_v16 = vpop.f32.mrf.mxu1 }
 0x380   : > { %v3407_v50 = vmax.f32 %v3311_v17, 0.0  ;;  %v3027_v40 = vadd.f32 %v7965_v27, %v3026_v16 }
 0x381   : > { %v3028_v55 = vpop.f32.mrf.mxu1 }
 0x382   : > { %v3444_v12 = vpack.c.bf16 %v3407_v50, %v3406_v57  ;;  %v3316_v58 = vadd.f32 %v5967_v37, %v3027_v40 }
 0x383   : > { %v3029_v63 = vpop.f32.mrf.mxu1 }
 0x384   : > { %v3030_v56 = vadd.f32 %v7965_v27, %v3029_v63  ;;  %6045 = vmatprep.mubr.bf16.mxu1 %v3444_v12  ;;  %v3408_v25 = vmax.f32 %v3316_v58, 0.0  ;;  %v8094_v12 = vld [vmem:[%s8923_s8] ss:$0 sm:$0xff] }
 0x385   : > { %v3031_v35 = vpop.f32.mrf.mxu1 }
 0x386   : > { %v3319_v54 = vadd.f32 %v5968_v60, %v3030_v56 }
 0x387   : > { %v3034_v10 = vpop.f32.mrf.mxu1 }
 0x388   : > { %v3409_v15 = vmax.f32 %v3319_v54, 0.0  ;;  %v3035_v47 = vadd.f32 %v7965_v27, %v3034_v10 }
 0x389   : > { %v3036_v51 = vpop.f32.mrf.mxu1 }
 0x38a   : > { %v3445_v11 = vpack.c.bf16 %v3409_v15, %v3408_v25  ;;  %v3324_v3 = vadd.f32 %v3323_v22, %v3035_v47 }
 0x38b   : > { %v3037_v34 = vpop.f32.mrf.mxu1 }
 0x38c   : > { %v3038_v6 = vadd.f32 %v7965_v27, %v3037_v34  ;;  %6046 = vmatmul.mubr.bf16.gmra.mxu1 %v3445_v11  ;;  %v3410_v8 = vmax.f32 %v3324_v3, 0.0 }
 0x38d   : > { %v3039_v59 = vpop.f32.mrf.mxu1 }
 0x38e   : > { %v3327_v32 = vadd.f32 %v3326_v33, %v3038_v6 }
 0x38f   : > { %v3042_v2 = vpop.f32.mrf.mxu1 }
 0x390   : > { %v3411_v48 = vmax.f32 %v3327_v32, 0.0  ;;  %v3043_v44 = vadd.f32 %v7965_v27, %v3042_v2 }
 0x391   : > { %v3044_v7 = vpop.f32.mrf.mxu1 }
 0x392   : > { %v3446_v42 = vpack.c.bf16 %v3411_v48, %v3410_v8  ;;  %v3332_v5 = vadd.f32 %v5971_v43, %v3043_v44 }
 0x393   : > { %v3045_v28 = vpop.f32.mrf.mxu1 }
 0x394   : > { %v3046_v21 = vadd.f32 %v7965_v27, %v3045_v28  ;;  %6049 = vmatprep.mubr.bf16.mxu1 %v3446_v42  ;;  %v3412_v37 = vmax.f32 %v3332_v5, 0.0 }
 0x395   : > { %v3047_v20 = vpop.f32.mrf.mxu1 }
 0x396   : > { %v3335_v31 = vadd.f32 %v5972_v53, %v3046_v21 }
 0x397   : > { %v3050_v36 = vpop.f32.mrf.mxu1 }
 0x398   : > { %v3413_v9 = vmax.f32 %v3335_v31, 0.0  ;;  %v3051_v61 = vadd.f32 %v7965_v27, %v3050_v36 }
 0x399   : > { %v3052_v39 = vpop.f32.mrf.mxu1 }
 0x39a   : > { %v3447_v49 = vpack.c.bf16 %v3413_v9, %v3412_v37  ;;  %v3340_v13 = vadd.f32 %v3339_v46, %v3051_v61 }
 0x39b   : > { %v3053_v29 = vpop.f32.mrf.mxu1 }
 0x39c   : > { %v3054_v23 = vadd.f32 %v7965_v27, %v3053_v29  ;;  %6050 = vmatmul.mubr.bf16.gmra.mxu1 %v3447_v49  ;;  %v3414_v60 = vmax.f32 %v3340_v13, 0.0 }
 0x39d   : > { %v3055_v0 = vpop.f32.mrf.mxu1 }
 0x39e   : > { %v3343_v38 = vadd.f32 %v3342_v30, %v3054_v23 }
 0x39f   : > { %v3058_v19 = vpop.f32.mrf.mxu1 }
 0x3a0   : > { %v3415_v18 = vmax.f32 %v3343_v38, 0.0  ;;  %v3059_v24 = vadd.f32 %v7965_v27, %v3058_v19 }
 0x3a1   : > { %v3060_v4 = vpop.f32.mrf.mxu1 }
 0x3a2   : > { %v3448_v52 = vpack.c.bf16 %v3415_v18, %v3414_v60  ;;  %v3348_v1 = vadd.f32 %v5975_v41, %v3059_v24 }
 0x3a3   : > { %v3061_v45 = vpop.f32.mrf.mxu1 }
 0x3a4   : > { %v3062_v14 = vadd.f32 %v7965_v27, %v3061_v45  ;;  %6053 = vmatprep.mubr.bf16.mxu1 %v3448_v52  ;;  %v3416_v50 = vmax.f32 %v3348_v1, 0.0 }
 0x3a5   : > { %v3063_v17 = vpop.f32.mrf.mxu1 }
 0x3a6   : > { %v3351_v16 = vadd.f32 %v5976_v62, %v3062_v14 }
 0x3a7   : > { %v5995_v57 = vpop.f32.mrf.mxu1 }
 0x3a8   : > { %v3417_v40 = vmax.f32 %v3351_v16, 0.0  ;;  %v3564_v27 = vadd.f32 %v5995_v57, %v8094_v12 }
 0x3a9   : > { %v3555_v43 = vpop.f32.mrf.mxu1 }
 0x3aa   : > { %v3449_v55 = vpack.c.bf16 %v3417_v40, %v3416_v50  ;;  %v3556_v58 = vadd.f32 %v8094_v12, %v3555_v43  ;;  %v3812_v47 = vmax.f32 %v3564_v27, 0.0 }
 0x3ab   : > { %v5996_v63 = vpop.f32.mrf.mxu1 }
 0x3ac   : > { %v3567_v56 = vadd.f32 %v5996_v63, %v8094_v12  ;;  %6054 = vmatmul.mubr.bf16.gmra.mxu1 %v3449_v55  ;;  %v3810_v25 = vmax.f32 %v3556_v58, 0.0 }
 0x3ad   : > { %v3558_v22 = vpop.f32.mrf.mxu1 }
 0x3ae   : > { %v3559_v35 = vadd.f32 %v8094_v12, %v3558_v22  ;;  %v3813_v54 = vmax.f32 %v3567_v56, 0.0 }
 0x3af   : > { %v5999_v10 = vpop.f32.mrf.mxu1 }
 0x3b0   : > { %v3811_v15 = vmax.f32 %v3559_v35, 0.0  ;;  %v3875_v11 = vpack.c.bf16 %v3813_v54, %v3812_v47  ;;  %v3580_v33 = vadd.f32 %v5999_v10, %v8094_v12 }
 0x3b1   : > { %v3571_v53 = vpop.f32.mrf.mxu1 }
 0x3b2   : > { %v3874_v51 = vpack.c.bf16 %v3811_v15, %v3810_v25  ;;  %v3572_v3 = vadd.f32 %v8094_v12, %v3571_v53  ;;  %v3816_v41 = vmax.f32 %v3580_v33, 0.0 }
 0x3b3   : > { %v6000_v34 = vpop.f32.mrf.mxu1 }
 0x3b4   : > { %v3583_v6 = vadd.f32 %v6000_v34, %v8094_v12  ;;  %6073 = vmatprep.mubr.bf16.mxu0 %v3874_v51  ;;  %v3814_v48 = vmax.f32 %v3572_v3, 0.0 }
 0x3b5   : > { %v3574_v59 = vpop.f32.mrf.mxu1  ;;  %6074 = vmatmul.mubr.bf16.vlgmr.msra.gmra.mxu0 %v3875_v11 }
 0x3b6   : > { %v3575_v32 = vadd.f32 %v8094_v12, %v3574_v59  ;;  %v3817_v2 = vmax.f32 %v3583_v6, 0.0 }
 0x3b7   : > { %v6003_v8 = vpop.f32.mrf.mxu1 }
 0x3b8   : > { %v3815_v44 = vmax.f32 %v3575_v32, 0.0  ;;  %v3877_v28 = vpack.c.bf16 %v3817_v2, %v3816_v41  ;;  %v3596_v20 = vadd.f32 %v6003_v8, %v8094_v12 }
 0x3b9   : > { %v3587_v7 = vpop.f32.mrf.mxu1 }
 0x3ba   : > { %v3876_v42 = vpack.c.bf16 %v3815_v44, %v3814_v48  ;;  %v3588_v21 = vadd.f32 %v8094_v12, %v3587_v7  ;;  %v3820_v39 = vmax.f32 %v3596_v20, 0.0 }
 0x3bb   : > { %v6004_v5 = vpop.f32.mrf.mxu1 }
 0x3bc   : > { %v3599_v46 = vadd.f32 %v6004_v5, %v8094_v12  ;;  %6077 = vmatprep.mubr.bf16.mxu0 %v3876_v42  ;;  %v3818_v61 = vmax.f32 %v3588_v21, 0.0 }
 0x3bd   : > { %v3590_v31 = vpop.f32.mrf.mxu1  ;;  %6078 = vmatmul.mubr.bf16.gmra.mxu0 %v3877_v28 }
 0x3be   : > { %v3591_v36 = vadd.f32 %v8094_v12, %v3590_v31  ;;  %v3821_v37 = vmax.f32 %v3599_v46, 0.0 }
 0x3bf   : > { %v6007_v9 = vpop.f32.mrf.mxu1 }
 0x3c0   : > { %v3819_v62 = vmax.f32 %v3591_v36, 0.0  ;;  %v3879_v13 = vpack.c.bf16 %v3821_v37, %v3820_v39  ;;  %v3612_v38 = vadd.f32 %v6007_v9, %v8094_v12 }
 0x3c1   : > { %v3603_v49 = vpop.f32.mrf.mxu1 }
 0x3c2   : > { %v3878_v29 = vpack.c.bf16 %v3819_v62, %v3818_v61  ;;  %v3604_v30 = vadd.f32 %v8094_v12, %v3603_v49  ;;  %v3824_v45 = vmax.f32 %v3612_v38, 0.0 }
 0x3c3   : > { %v6008_v23 = vpop.f32.mrf.mxu1 }
 0x3c4   : > { %v3615_v0 = vadd.f32 %v6008_v23, %v8094_v12  ;;  %6081 = vmatprep.mubr.bf16.mxu0 %v3878_v29  ;;  %v3822_v4 = vmax.f32 %v3604_v30, 0.0 }
 0x3c5   : > { %v3606_v19 = vpop.f32.mrf.mxu1  ;;  %6082 = vmatmul.mubr.bf16.gmra.mxu0 %v3879_v13 }
 0x3c6   : > { %v3607_v60 = vadd.f32 %v8094_v12, %v3606_v19  ;;  %v3825_v18 = vmax.f32 %v3615_v0, 0.0 }
 0x3c7   : > { %v6011_v24 = vpop.f32.mrf.mxu1 }
 0x3c8   : > { %v3823_v52 = vmax.f32 %v3607_v60, 0.0  ;;  %v3881_v17 = vpack.c.bf16 %v3825_v18, %v3824_v45  ;;  %v3628_v40 = vadd.f32 %v6011_v24, %v8094_v12 }
 0x3c9   : > { %v3619_v1 = vpop.f32.mrf.mxu1 }
 0x3ca   : > { %v3880_v14 = vpack.c.bf16 %v3823_v52, %v3822_v4  ;;  %v3620_v57 = vadd.f32 %v8094_v12, %v3619_v1  ;;  %v3828_v22 = vmax.f32 %v3628_v40, 0.0 }
 0x3cb   : > { %v6012_v16 = vpop.f32.mrf.mxu1 }
 0x3cc   : > { %v3631_v50 = vadd.f32 %v6012_v16, %v8094_v12  ;;  %6085 = vmatprep.mubr.bf16.mxu0 %v3880_v14  ;;  %v3826_v56 = vmax.f32 %v3620_v57, 0.0 }
 0x3cd   : > { %v3622_v43 = vpop.f32.mrf.mxu1  ;;  %6086 = vmatmul.mubr.bf16.gmra.mxu0 %v3881_v17 }
 0x3ce   : > { %v3623_v55 = vadd.f32 %v8094_v12, %v3622_v43  ;;  %v3829_v63 = vmax.f32 %v3631_v50, 0.0 }
 0x3cf   : > { %v6015_v58 = vpop.f32.mrf.mxu1 }
 0x3d0   : > { %v3827_v27 = vmax.f32 %v3623_v55, 0.0  ;;  %v3883_v10 = vpack.c.bf16 %v3829_v63, %v3828_v22  ;;  %v3644_v53 = vadd.f32 %v6015_v58, %v8094_v12 }
 0x3d1   : > { %v3635_v35 = vpop.f32.mrf.mxu1 }
 0x3d2   : > { %v3882_v54 = vpack.c.bf16 %v3827_v27, %v3826_v56  ;;  %v3636_v15 = vadd.f32 %v8094_v12, %v3635_v35  ;;  %v3832_v33 = vmax.f32 %v3644_v53, 0.0 }
 0x3d3   : > { %v6016_v25 = vpop.f32.mrf.mxu1 }
 0x3d4   : > { %v3647_v47 = vadd.f32 %v6016_v25, %v8094_v12  ;;  %6089 = vmatprep.mubr.bf16.mxu0 %v3882_v54  ;;  %v3830_v3 = vmax.f32 %v3636_v15, 0.0 }
 0x3d5   : > { %v3638_v51 = vpop.f32.mrf.mxu1  ;;  %6090 = vmatmul.mubr.bf16.gmra.mxu0 %v3883_v10 }
 0x3d6   : > { %v3639_v11 = vadd.f32 %v8094_v12, %v3638_v51  ;;  %v3833_v34 = vmax.f32 %v3647_v47, 0.0 }
 0x3d8   : > { %v3831_v6 = vmax.f32 %v3639_v11, 0.0  ;;  %v3885_v32 = vpack.c.bf16 %v3833_v34, %v3832_v33 }
 0x3da   : > { %v3884_v59 = vpack.c.bf16 %v3831_v6, %v3830_v3 }
 0x3dc   : > { %v6019_v2 = vpop.f32.mrf.mxu1  ;;  %6093 = vmatprep.mubr.bf16.mxu0 %v3884_v59 }
 0x3dd   : > { %6094 = vmatmul.mubr.bf16.gmra.mxu0 %v3885_v32  ;;  %v3660_v7 = vadd.f32 %v6019_v2, %v8094_v12 }
 0x3de   : > { %v3651_v8 = vpop.f32.mrf.mxu1 }
 0x3df   : > { %v3652_v44 = vadd.f32 %v8094_v12, %v3651_v8  ;;  %v3836_v20 = vmax.f32 %v3660_v7, 0.0 }
 0x3e0   : > { %v6020_v48 = vpop.f32.mrf.mxu1 }
 0x3e1   : > { %v3663_v41 = vadd.f32 %v6020_v48, %v8094_v12  ;;  %v3834_v21 = vmax.f32 %v3652_v44, 0.0 }
 0x3e2   : > { %v3654_v42 = vpop.f32.mrf.mxu1 }
 0x3e3   : > { %v3655_v28 = vadd.f32 %v8094_v12, %v3654_v42  ;;  %v3837_v5 = vmax.f32 %v3663_v41, 0.0 }
 0x3e5   : > { %v3835_v46 = vmax.f32 %v3655_v28, 0.0  ;;  %v3887_v36 = vpack.c.bf16 %v3837_v5, %v3836_v20 }
 0x3e7   : > { %v3886_v31 = vpack.c.bf16 %v3835_v46, %v3834_v21 }
 0x3e9   : > { %6097 = vmatprep.mubr.bf16.mxu0 %v3886_v31 }
 0x3ea   : > { %6098 = vmatmul.mubr.bf16.gmra.mxu0 %v3887_v36 }
 0x3ec   : > { %v6023_v37 = vpop.f32.mrf.mxu1 }
 0x3ed   : > { %v3676_v49 = vadd.f32 %v6023_v37, %v8094_v12 }
 0x3ee   : > { %v3667_v9 = vpop.f32.mrf.mxu1 }
 0x3ef   : > { %v3668_v62 = vadd.f32 %v8094_v12, %v3667_v9  ;;  %v3840_v38 = vmax.f32 %v3676_v49, 0.0 }
 0x3f0   : > { %v6024_v61 = vpop.f32.mrf.mxu1 }
 0x3f1   : > { %v3679_v39 = vadd.f32 %v6024_v61, %v8094_v12  ;;  %v3838_v30 = vmax.f32 %v3668_v62, 0.0 }
 0x3f2   : > { %v3670_v29 = vpop.f32.mrf.mxu1 }
 0x3f3   : > { %v3671_v13 = vadd.f32 %v8094_v12, %v3670_v29  ;;  %v3841_v23 = vmax.f32 %v3679_v39, 0.0 }
 0x3f5   : > { %v3839_v0 = vmax.f32 %v3671_v13, 0.0  ;;  %v3889_v60 = vpack.c.bf16 %v3841_v23, %v3840_v38 }
 0x3f7   : > { %v3888_v19 = vpack.c.bf16 %v3839_v0, %v3838_v30 }
 0x3f9   : > { %6101 = vmatprep.mubr.bf16.mxu0 %v3888_v19 }
 0x3fa   : > { %6102 = vmatmul.mubr.bf16.gmra.mxu0 %v3889_v60 }
 0x3fc   : > { %v6027_v18 = vpop.f32.mrf.mxu1 }
 0x3fd   : > { %v3692_v1 = vadd.f32 %v6027_v18, %v8094_v12 }
 0x3fe   : > { %v3683_v24 = vpop.f32.mrf.mxu1 }
 0x3ff   : > { %v3684_v52 = vadd.f32 %v8094_v12, %v3683_v24  ;;  %v3844_v40 = vmax.f32 %v3692_v1, 0.0 }
 0x400   : > { %v6028_v4 = vpop.f32.mrf.mxu1 }
 0x401   : > { %v3695_v45 = vadd.f32 %v6028_v4, %v8094_v12  ;;  %v3842_v57 = vmax.f32 %v3684_v52, 0.0 }
 0x402   : > { %v3686_v14 = vpop.f32.mrf.mxu1 }
 0x403   : > { %v3687_v17 = vadd.f32 %v8094_v12, %v3686_v14  ;;  %v3845_v16 = vmax.f32 %v3695_v45, 0.0 }
 0x405   : > { %v3843_v50 = vmax.f32 %v3687_v17, 0.0  ;;  %v3891_v55 = vpack.c.bf16 %v3845_v16, %v3844_v40 }
 0x407   : > { %v3890_v43 = vpack.c.bf16 %v3843_v50, %v3842_v57 }
 0x409   : > { %6105 = vmatprep.mubr.bf16.mxu0 %v3890_v43 }
 0x40a   : > { %6106 = vmatmul.mubr.bf16.gmra.mxu0 %v3891_v55 }
 0x40c   : > { %v6031_v63 = vpop.f32.mrf.mxu1 }
 0x40d   : > { %v3708_v35 = vadd.f32 %v6031_v63, %v8094_v12 }
 0x40e   : > { %v3699_v58 = vpop.f32.mrf.mxu1 }
 0x40f   : > { %v3700_v27 = vadd.f32 %v8094_v12, %v3699_v58  ;;  %v3848_v53 = vmax.f32 %v3708_v35, 0.0 }
 0x410   : > { %v6032_v56 = vpop.f32.mrf.mxu1 }
 0x411   : > { %v3711_v22 = vadd.f32 %v6032_v56, %v8094_v12  ;;  %v3846_v15 = vmax.f32 %v3700_v27, 0.0 }
 0x412   : > { %v3702_v54 = vpop.f32.mrf.mxu1 }
 0x413   : > { %v3703_v10 = vadd.f32 %v8094_v12, %v3702_v54  ;;  %v3849_v25 = vmax.f32 %v3711_v22, 0.0 }
 0x415   : > { %v3847_v47 = vmax.f32 %v3703_v10, 0.0  ;;  %v3893_v11 = vpack.c.bf16 %v3849_v25, %v3848_v53 }
 0x417   : > { %v3892_v51 = vpack.c.bf16 %v3847_v47, %v3846_v15 }
 0x419   : > { %6109 = vmatprep.mubr.bf16.mxu0 %v3892_v51 }
 0x41a   : > { %6110 = vmatmul.mubr.bf16.gmra.mxu0 %v3893_v11 }
 0x41c   : > { %v6035_v34 = vpop.f32.mrf.mxu1 }
 0x41d   : > { %v3724_v32 = vadd.f32 %v6035_v34, %v8094_v12 }
 0x41e   : > { %v3715_v3 = vpop.f32.mrf.mxu1 }
 0x41f   : > { %v3716_v33 = vadd.f32 %v8094_v12, %v3715_v3  ;;  %v3852_v7 = vmax.f32 %v3724_v32, 0.0 }
 0x420   : > { %v6036_v6 = vpop.f32.mrf.mxu1 }
 0x421   : > { %v3727_v59 = vadd.f32 %v6036_v6, %v8094_v12  ;;  %v3850_v44 = vmax.f32 %v3716_v33, 0.0 }
 0x422   : > { %v3718_v2 = vpop.f32.mrf.mxu1 }
 0x423   : > { %v3719_v8 = vadd.f32 %v8094_v12, %v3718_v2  ;;  %v3853_v48 = vmax.f32 %v3727_v59, 0.0 }
 0x425   : > { %v3851_v41 = vmax.f32 %v3719_v8, 0.0  ;;  %v3895_v28 = vpack.c.bf16 %v3853_v48, %v3852_v7 }
 0x427   : > { %v3894_v42 = vpack.c.bf16 %v3851_v41, %v3850_v44 }
 0x429   : > { %6113 = vmatprep.mubr.bf16.mxu0 %v3894_v42 }
 0x42a   : > { %6114 = vmatmul.mubr.bf16.gmra.mxu0 %v3895_v28  ;;  %v8159_v28 = vand.u32 127, %v463_v26 }
 0x42c   : > { %v6039_v5 = vpop.f32.mrf.mxu1  ;;  %vm4268_vm2 = vcmp.lt.s32.totalorder %v8159_v28, 7 }
 0x42d   : > { %v3740_v36 = vadd.f32 %v6039_v5, %v8094_v12 }
 0x42e   : > { %v3731_v21 = vpop.f32.mrf.mxu1 }
 0x42f   : > { %v3732_v20 = vadd.f32 %v8094_v12, %v3731_v21  ;;  %v3856_v49 = vmax.f32 %v3740_v36, 0.0 }
 0x430   : > { %v6040_v46 = vpop.f32.mrf.mxu1 }
 0x431   : > { %v3743_v31 = vadd.f32 %v6040_v46, %v8094_v12  ;;  %v3854_v62 = vmax.f32 %v3732_v20, 0.0  ;;  %v8166_v20 = vld [vmem:[%s8925_s10] ss:$0 sm:$0xff] }
 0x432   : > { %v3734_v37 = vpop.f32.mrf.mxu1 }
 0x433   : > { %v3735_v9 = vadd.f32 %v8094_v12, %v3734_v37  ;;  %v3857_v61 = vmax.f32 %v3743_v31, 0.0 }
 0x435   : > { %v3855_v39 = vmax.f32 %v3735_v9, 0.0  ;;  %v3897_v13 = vpack.c.bf16 %v3857_v61, %v3856_v49 }
 0x437   : > { %v3896_v29 = vpack.c.bf16 %v3855_v39, %v3854_v62 }
 0x439   : > { %6117 = vmatprep.mubr.bf16.mxu0 %v3896_v29 }
 0x43a   : > { %6118 = vmatmul.mubr.bf16.gmra.mxu0 %v3897_v13 }
 0x43c   : > { %v6043_v23 = vpop.f32.mrf.mxu1 }
 0x43d   : > { %v3756_v60 = vadd.f32 %v6043_v23, %v8094_v12 }
 0x43e   : > { %v3747_v30 = vpop.f32.mrf.mxu1 }
 0x43f   : > { %v3748_v38 = vadd.f32 %v8094_v12, %v3747_v30  ;;  %v3860_v1 = vmax.f32 %v3756_v60, 0.0 }
 0x440   : > { %v6044_v0 = vpop.f32.mrf.mxu1 }
 0x441   : > { %v3759_v19 = vadd.f32 %v6044_v0, %v8094_v12  ;;  %v3858_v52 = vmax.f32 %v3748_v38, 0.0 }
 0x442   : > { %v3750_v18 = vpop.f32.mrf.mxu1 }
 0x443   : > { %v3751_v24 = vadd.f32 %v8094_v12, %v3750_v18  ;;  %v3861_v4 = vmax.f32 %v3759_v19, 0.0 }
 0x445   : > { %v3859_v45 = vmax.f32 %v3751_v24, 0.0  ;;  %v3899_v17 = vpack.c.bf16 %v3861_v4, %v3860_v1 }
 0x447   : > { %v3898_v14 = vpack.c.bf16 %v3859_v45, %v3858_v52 }
 0x449   : > { %6121 = vmatprep.mubr.bf16.mxu0 %v3898_v14 }
 0x44a   : > { %6122 = vmatmul.mubr.bf16.gmra.mxu0 %v3899_v17 }
 0x44c   : > { %v6047_v16 = vpop.f32.mrf.mxu1 }
 0x44d   : > { %v3772_v55 = vadd.f32 %v6047_v16, %v8094_v12 }
 0x44e   : > { %v3763_v57 = vpop.f32.mrf.mxu1 }
 0x44f   : > { %v3764_v40 = vadd.f32 %v8094_v12, %v3763_v57  ;;  %v3864_v35 = vmax.f32 %v3772_v55, 0.0 }
 0x450   : > { %v6048_v50 = vpop.f32.mrf.mxu1 }
 0x451   : > { %v3775_v43 = vadd.f32 %v6048_v50, %v8094_v12  ;;  %v3862_v27 = vmax.f32 %v3764_v40, 0.0 }
 0x452   : > { %v3766_v63 = vpop.f32.mrf.mxu1 }
 0x453   : > { %v3767_v58 = vadd.f32 %v8094_v12, %v3766_v63  ;;  %v3865_v56 = vmax.f32 %v3775_v43, 0.0 }
 0x455   : > { %v3863_v22 = vmax.f32 %v3767_v58, 0.0  ;;  %v3901_v10 = vpack.c.bf16 %v3865_v56, %v3864_v35 }
 0x457   : > { %v3900_v54 = vpack.c.bf16 %v3863_v22, %v3862_v27 }
 0x459   : > { %6125 = vmatprep.mubr.bf16.mxu0 %v3900_v54 }
 0x45a   : > { %6126 = vmatmul.mubr.bf16.gmra.mxu0 %v3901_v10 }
 0x45c   : > { %v6051_v25 = vpop.f32.mrf.mxu1 }
 0x45d   : > { %v3788_v11 = vadd.f32 %v6051_v25, %v8094_v12 }
 0x45e   : > { %v3779_v15 = vpop.f32.mrf.mxu1 }
 0x45f   : > { %v3780_v53 = vadd.f32 %v8094_v12, %v3779_v15  ;;  %v3868_v32 = vmax.f32 %v3788_v11, 0.0 }
 0x460   : > { %v6052_v47 = vpop.f32.mrf.mxu1 }
 0x461   : > { %v3791_v51 = vadd.f32 %v6052_v47, %v8094_v12  ;;  %v3866_v33 = vmax.f32 %v3780_v53, 0.0 }
 0x462   : > { %v3782_v34 = vpop.f32.mrf.mxu1 }
 0x463   : > { %v3783_v3 = vadd.f32 %v8094_v12, %v3782_v34  ;;  %v3869_v6 = vmax.f32 %v3791_v51, 0.0 }
 0x465   : > { %v3867_v59 = vmax.f32 %v3783_v3, 0.0  ;;  %v3903_v8 = vpack.c.bf16 %v3869_v6, %v3868_v32 }
 0x467   : > { %v3902_v2 = vpack.c.bf16 %v3867_v59, %v3866_v33 }
 0x469   : > { %6129 = vmatprep.mubr.bf16.mxu0 %v3902_v2 }
 0x46a   : > { %6130 = vmatmul.mubr.bf16.gmra.mxu0 %v3903_v8 }
 0x46c   : > { %v6055_v48 = vpop.f32.mrf.mxu1 }
 0x46d   : > { %v3804_v5 = vadd.f32 %v6055_v48, %v8094_v12 }
 0x46e   : > { %v3795_v44 = vpop.f32.mrf.mxu1 }
 0x46f   : > { %v3796_v7 = vadd.f32 %v8094_v12, %v3795_v44  ;;  %v3872_v61 = vmax.f32 %v3804_v5, 0.0 }
 0x470   : > { %v6056_v41 = vpop.f32.mrf.mxu1 }
 0x471   : > { %v3807_v42 = vadd.f32 %v6056_v41, %v8094_v12  ;;  %v3870_v36 = vmax.f32 %v3796_v7, 0.0 }
 0x472   : > { %v3798_v21 = vpop.f32.mrf.mxu1 }
 0x473   : > { %v3799_v46 = vadd.f32 %v8094_v12, %v3798_v21  ;;  %v3873_v31 = vmax.f32 %v3807_v42, 0.0 }
 0x475   : > { %v3871_v37 = vmax.f32 %v3799_v46, 0.0  ;;  %v6075_v9 = vpop.f32.mrf.mxu0  ;;  %v3905_v49 = vpack.c.bf16 %v3873_v31, %v3872_v61 }
 0x476   : > { %v4020_v26 = vadd.f32 %v6075_v9, %v8166_v20 }
 0x477   : > { %v3904_v62 = vpack.c.bf16 %v3871_v37, %v3870_v36  ;;  %v4011_v39 = vpop.f32.mrf.mxu0 }
 0x478   : > { %v4012_v29 = vadd.f32 %v8166_v20, %v4011_v39  ;;  %v8173_v12 = vsel %vm4268_vm2, %v4020_v26, -inf }
 0x479   : > { %6133 = vmatprep.mubr.bf16.mxu0 %v3904_v62  ;;  %4337 = vmax.xlane.f32.xlu1 %v8173_v12  ;;  %v6076_v13 = vpop.f32.mrf.mxu0 }
 0x47a   : > { %v4023_v23 = vadd.f32 %v6076_v13, %v8166_v20  ;;  %6134 = vmatmul.mubr.bf16.gmra.mxu0 %v3905_v49  ;;  %v8179_v30 = vsel %vm4268_vm2, %v4012_v29, -inf }
 0x47b   : > { %v4014_v0 = vpop.f32.mrf.mxu0  ;;  %4333 = vmax.xlane.f32.xlu0 %v8179_v30 }
 0x47c   : > { %v4015_v38 = vadd.f32 %v8166_v20, %v4014_v0  ;;  %v8185_v19 = vsel %vm4268_vm2, %v4023_v23, -inf }
 0x47d   : > { %4339 = vmax.xlane.f32.xlu1 %v8185_v19  ;;  %v6079_v60 = vpop.f32.mrf.mxu0 }
 0x47e   : > { %v4036_v18 = vadd.f32 %v6079_v60, %v8166_v20  ;;  %v8191_v24 = vsel %vm4268_vm2, %v4015_v38, -inf }
 0x47f   : > { %v4027_v4 = vpop.f32.mrf.mxu0  ;;  %4335 = vmax.xlane.f32.xlu0 %v8191_v24 }
 0x480   : > { %v4028_v45 = vadd.f32 %v8166_v20, %v4027_v4  ;;  %v8198_v14 = vsel %vm4268_vm2, %v4036_v18, -inf }
 0x481   : > { %v6080_v52 = vpop.f32.mrf.mxu0 }
 0x482   : > { %v4039_v1 = vadd.f32 %v6080_v52, %v8166_v20  ;;  %v8210_v43 = vsel %vm4268_vm2, %v4028_v45, -inf }
 0x483   : > { %v4030_v17 = vpop.f32.mrf.mxu0  ;;  %4345 = vmax.xlane.f32.xlu0 %v8198_v14 }
 0x484   : > { %v4031_v16 = vadd.f32 %v8166_v20, %v4030_v17  ;;  %v8204_v57 = vsel %vm4268_vm2, %v4039_v1, -inf }
 0x485   : > { %4347 = vmax.xlane.f32.xlu1 %v8204_v57  ;;  %v6083_v50 = vpop.f32.mrf.mxu0 }
 0x486   : > { %v4052_v40 = vadd.f32 %v6083_v50, %v8166_v20  ;;  %v8215_v63 = vsel %vm4268_vm2, %v4031_v16, -inf }
 0x487   : > { %v4043_v55 = vpop.f32.mrf.mxu0  ;;  %4341 = vmax.xlane.f32.xlu0 %v8210_v43 }
 0x488   : > { %v4044_v56 = vadd.f32 %v8166_v20, %v4043_v55  ;;  %v8222_v22 = vsel %vm4268_vm2, %v4052_v40, -inf }
 0x489   : > { %v6084_v58 = vpop.f32.mrf.mxu0  ;;  %4343 = vmax.xlane.f32.xlu1 %v8215_v63 }
 0x48a   : > { %v4055_v27 = vadd.f32 %v6084_v58, %v8166_v20  ;;  %v8234_v47 = vsel %vm4268_vm2, %v4044_v56, -inf }
 0x48b   : > { %v4046_v35 = vpop.f32.mrf.mxu0  ;;  %4353 = vmax.xlane.f32.xlu0 %v8222_v22 }
 0x48c   : > { %v4047_v54 = vadd.f32 %v8166_v20, %v4046_v35  ;;  %v8228_v10 = vsel %vm4268_vm2, %v4055_v27, -inf }
 0x48d   : > { %v6087_v25 = vpop.f32.mrf.mxu0  ;;  %4355 = vmax.xlane.f32.xlu1 %v8228_v10 }
 0x48e   : > { %v4068_v15 = vadd.f32 %v6087_v25, %v8166_v20  ;;  %v8239_v51 = vsel %vm4268_vm2, %v4047_v54, -inf }
 0x48f   : > { %v4059_v53 = vpop.f32.mrf.mxu0  ;;  %4349 = vmax.xlane.f32.xlu0 %v8234_v47 }
 0x490   : > { %v4060_v34 = vadd.f32 %v8166_v20, %v4059_v53  ;;  %v8246_v6 = vsel %vm4268_vm2, %v4068_v15, -inf }
 0x491   : > { %v6088_v11 = vpop.f32.mrf.mxu0  ;;  %4351 = vmax.xlane.f32.xlu1 %v8239_v51 }
 0x492   : > { %v4071_v3 = vadd.f32 %v6088_v11, %v8166_v20  ;;  %v8258_v48 = vsel %vm4268_vm2, %v4060_v34, -inf }
 0x493   : > { %v4062_v33 = vpop.f32.mrf.mxu0  ;;  %4361 = vmax.xlane.f32.xlu0 %v8246_v6 }
 0x494   : > { %v4063_v59 = vadd.f32 %v8166_v20, %v4062_v33  ;;  %v8252_v32 = vsel %vm4268_vm2, %v4071_v3, -inf }
 0x495   : > { %v6091_v2 = vpop.f32.mrf.mxu0  ;;  %4363 = vmax.xlane.f32.xlu1 %v8252_v32 }
 0x496   : > { %v4084_v8 = vadd.f32 %v6091_v2, %v8166_v20  ;;  %v8263_v41 = vsel %vm4268_vm2, %v4063_v59, -inf }
 0x497   : > { %v4075_v44 = vpop.f32.mrf.mxu0  ;;  %4357 = vmax.xlane.f32.xlu0 %v8258_v48 }
 0x498   : > { %v4076_v42 = vadd.f32 %v8166_v20, %v4075_v44  ;;  %v8270_v21 = vsel %vm4268_vm2, %v4084_v8, -inf }
 0x499   : > { %v6092_v7 = vpop.f32.mrf.mxu0  ;;  %4359 = vmax.xlane.f32.xlu1 %v8263_v41 }
 0x49a   : > { %v4087_v5 = vadd.f32 %v6092_v7, %v8166_v20  ;;  %v8282_v61 = vsel %vm4268_vm2, %v4076_v42, -inf }
 0x49b   : > { %v4078_v46 = vpop.f32.mrf.mxu0  ;;  %4369 = vmax.xlane.f32.xlu0 %v8270_v21 }
 0x49c   : > { %v4079_v31 = vadd.f32 %v8166_v20, %v4078_v46  ;;  %v8276_v36 = vsel %vm4268_vm2, %v4087_v5, -inf }
 0x49d   : > { %v6095_v37 = vpop.f32.mrf.mxu0  ;;  %4371 = vmax.xlane.f32.xlu1 %v8276_v36 }
 0x49e   : > { %v4100_v9 = vadd.f32 %v6095_v37, %v8166_v20  ;;  %v8287_v62 = vsel %vm4268_vm2, %v4079_v31, -inf }
 0x49f   : > { %v4091_v26 = vpop.f32.mrf.mxu0  ;;  %4365 = vmax.xlane.f32.xlu0 %v8282_v61 }
 0x4a0   : > { %v4092_v49 = vadd.f32 %v8166_v20, %v4091_v26  ;;  %v8294_v13 = vsel %vm4268_vm2, %v4100_v9, -inf }
 0x4a1   : > { %v6096_v39 = vpop.f32.mrf.mxu0  ;;  %4367 = vmax.xlane.f32.xlu1 %v8287_v62 }
 0x4a2   : > { %v4103_v29 = vadd.f32 %v6096_v39, %v8166_v20  ;;  %v8305_v60 = vsel %vm4268_vm2, %v4092_v49, -inf }
 0x4a3   : > { %v4094_v23 = vpop.f32.mrf.mxu0  ;;  %4377 = vmax.xlane.f32.xlu0 %v8294_v13 }
 0x4a4   : > { %v4095_v0 = vadd.f32 %v8166_v20, %v4094_v23  ;;  %v8300_v38 = vsel %vm4268_vm2, %v4103_v29, -inf }
 0x4a5   : > { %4379 = vmax.xlane.f32.xlu1 %v8300_v38 }
 0x4a6   : > { %v8310_v18 = vsel %vm4268_vm2, %v4095_v0, -inf }
 0x4a7   : > { %4373 = vmax.xlane.f32.xlu0 %v8305_v60 }
 0x4a9   : > { %4375 = vmax.xlane.f32.xlu1 %v8310_v18 }
 0x4aa   : > { %v6099_v4 = vpop.f32.mrf.mxu0 }
 0x4ab   : > { %v4116_v52 = vadd.f32 %v6099_v4, %v8166_v20 }
 0x4ac   : > { %v4107_v45 = vpop.f32.mrf.mxu0 }
 0x4ad   : > { %v4108_v1 = vadd.f32 %v8166_v20, %v4107_v45  ;;  %v8317_v17 = vsel %vm4268_vm2, %v4116_v52, -inf }
 0x4ae   : > { %v6100_v16 = vpop.f32.mrf.mxu0  ;;  %4385 = vmax.xlane.f32.xlu0 %v8317_v17 }
 0x4af   : > { %v4119_v50 = vadd.f32 %v6100_v16, %v8166_v20  ;;  %v8328_v56 = vsel %vm4268_vm2, %v4108_v1, -inf }
 0x4b0   : > { %v4110_v40 = vpop.f32.mrf.mxu0 }
 0x4b1   : > { %v4111_v55 = vadd.f32 %v8166_v20, %v4110_v40  ;;  %v8324_v58 = vsel %vm4268_vm2, %v4119_v50, -inf }
 0x4b2   : > { %4387 = vmax.xlane.f32.xlu1 %v8324_v58  ;;  %4381 = vmax.xlane.f32.xlu0 %v8328_v56 }
 0x4b3   : > { %v8334_v27 = vsel %vm4268_vm2, %v4111_v55, -inf }
 0x4b6   : > { %4383 = vmax.xlane.f32.xlu1 %v8334_v27 }
 0x4ba   : > { %v6103_v35 = vpop.f32.mrf.mxu0 }
 0x4bb   : > { %v4132_v54 = vadd.f32 %v6103_v35, %v8166_v20 }
 0x4bc   : > { %v4123_v25 = vpop.f32.mrf.mxu0 }
 0x4bd   : > { %v4124_v15 = vadd.f32 %v8166_v20, %v4123_v25  ;;  %v8341_v53 = vsel %vm4268_vm2, %v4132_v54, -inf }
 0x4be   : > { %v6104_v11 = vpop.f32.mrf.mxu0  ;;  %4393 = vmax.xlane.f32.xlu0 %v8341_v53 }
 0x4bf   : > { %v4135_v34 = vadd.f32 %v6104_v11, %v8166_v20  ;;  %v8352_v2 = vsel %vm4268_vm2, %v4124_v15, -inf }
 0x4c0   : > { %v4126_v3 = vpop.f32.mrf.mxu0 }
 0x4c1   : > { %v4127_v33 = vadd.f32 %v8166_v20, %v4126_v3  ;;  %v8348_v59 = vsel %vm4268_vm2, %v4135_v34, -inf }
 0x4c2   : > { %4395 = vmax.xlane.f32.xlu1 %v8348_v59  ;;  %4389 = vmax.xlane.f32.xlu0 %v8352_v2 }
 0x4c3   : > { %v8358_v8 = vsel %vm4268_vm2, %v4127_v33, -inf }
 0x4c6   : > { %4391 = vmax.xlane.f32.xlu1 %v8358_v8 }
 0x4ca   : > { %v6107_v44 = vpop.f32.mrf.mxu0 }
 0x4cb   : > { %v4148_v7 = vadd.f32 %v6107_v44, %v8166_v20 }
 0x4cc   : > { %v4139_v42 = vpop.f32.mrf.mxu0 }
 0x4cd   : > { %v4140_v5 = vadd.f32 %v8166_v20, %v4139_v42  ;;  %v8365_v46 = vsel %vm4268_vm2, %v4148_v7, -inf }
 0x4ce   : > { %v6108_v31 = vpop.f32.mrf.mxu0  ;;  %4401 = vmax.xlane.f32.xlu0 %v8365_v46 }
 0x4cf   : > { %v4151_v37 = vadd.f32 %v6108_v31, %v8166_v20  ;;  %v8376_v49 = vsel %vm4268_vm2, %v4140_v5, -inf }
 0x4d0   : > { %v4142_v9 = vpop.f32.mrf.mxu0 }
 0x4d1   : > { %v4143_v26 = vadd.f32 %v8166_v20, %v4142_v9  ;;  %v8372_v39 = vsel %vm4268_vm2, %v4151_v37, -inf }
 0x4d2   : > { %4403 = vmax.xlane.f32.xlu1 %v8372_v39  ;;  %4397 = vmax.xlane.f32.xlu0 %v8376_v49 }
 0x4d3   : > { %v8382_v29 = vsel %vm4268_vm2, %v4143_v26, -inf }
 0x4d6   : > { %4399 = vmax.xlane.f32.xlu1 %v8382_v29 }
 0x4da   : > { %v6111_v23 = vpop.f32.mrf.mxu0 }
 0x4db   : > { %v4164_v0 = vadd.f32 %v6111_v23, %v8166_v20 }
 0x4dc   : > { %v4155_v4 = vpop.f32.mrf.mxu0 }
 0x4dd   : > { %v4156_v52 = vadd.f32 %v8166_v20, %v4155_v4  ;;  %v8389_v45 = vsel %vm4268_vm2, %v4164_v0, -inf }
 0x4de   : > { %v6112_v1 = vpop.f32.mrf.mxu0  ;;  %4409 = vmax.xlane.f32.xlu0 %v8389_v45 }
 0x4df   : > { %v4167_v16 = vadd.f32 %v6112_v1, %v8166_v20  ;;  %v8400_v35 = vsel %vm4268_vm2, %v4156_v52, -inf }
 0x4e0   : > { %v4158_v50 = vpop.f32.mrf.mxu0 }
 0x4e1   : > { %v4159_v40 = vadd.f32 %v8166_v20, %v4158_v50  ;;  %v8396_v55 = vsel %vm4268_vm2, %v4167_v16, -inf }
 0x4e2   : > { %4411 = vmax.xlane.f32.xlu1 %v8396_v55  ;;  %4405 = vmax.xlane.f32.xlu0 %v8400_v35 }
 0x4e3   : > { %v8406_v54 = vsel %vm4268_vm2, %v4159_v40, -inf }
 0x4e6   : > { %4407 = vmax.xlane.f32.xlu1 %v8406_v54 }
 0x4ea   : > { %v6115_v25 = vpop.f32.mrf.mxu0 }
 0x4eb   : > { %v4180_v15 = vadd.f32 %v6115_v25, %v8166_v20 }
 0x4ec   : > { %v4171_v11 = vpop.f32.mrf.mxu0 }
 0x4ed   : > { %v4172_v34 = vadd.f32 %v8166_v20, %v4171_v11  ;;  %v8413_v3 = vsel %vm4268_vm2, %v4180_v15, -inf }
 0x4ee   : > { %v6116_v33 = vpop.f32.mrf.mxu0  ;;  %4417 = vmax.xlane.f32.xlu0 %v8413_v3 }
 0x4ef   : > { %v4183_v44 = vadd.f32 %v6116_v33, %v8166_v20  ;;  %v8424_v31 = vsel %vm4268_vm2, %v4172_v34, -inf }
 0x4f0   : > { %v4174_v7 = vpop.f32.mrf.mxu0 }
 0x4f1   : > { %v4175_v42 = vadd.f32 %v8166_v20, %v4174_v7  ;;  %v8420_v5 = vsel %vm4268_vm2, %v4183_v44, -inf }
 0x4f2   : > { %4419 = vmax.xlane.f32.xlu1 %v8420_v5  ;;  %4413 = vmax.xlane.f32.xlu0 %v8424_v31 }
 0x4f3   : > { %v8430_v37 = vsel %vm4268_vm2, %v4175_v42, -inf }
 0x4f6   : > { %4415 = vmax.xlane.f32.xlu1 %v8430_v37 }
 0x4fa   : > { %v6119_v9 = vpop.f32.mrf.mxu0 }
 0x4fb   : > { %v4196_v26 = vadd.f32 %v6119_v9, %v8166_v20 }
 0x4fc   : > { %v4187_v23 = vpop.f32.mrf.mxu0 }
 0x4fd   : > { %v4188_v0 = vadd.f32 %v8166_v20, %v4187_v23  ;;  %v8437_v4 = vsel %vm4268_vm2, %v4196_v26, -inf }
 0x4fe   : > { %v6120_v52 = vpop.f32.mrf.mxu0  ;;  %4425 = vmax.xlane.f32.xlu0 %v8437_v4 }
 0x4ff   : > { %v4199_v1 = vadd.f32 %v6120_v52, %v8166_v20  ;;  %v8448_v25 = vsel %vm4268_vm2, %v4188_v0, -inf }
 0x500   : > { %v4190_v16 = vpop.f32.mrf.mxu0 }
 0x501   : > { %v4191_v50 = vadd.f32 %v8166_v20, %v4190_v16  ;;  %v8444_v40 = vsel %vm4268_vm2, %v4199_v1, -inf }
 0x502   : > { %v4338_v15 = vpop.xlane.xlu1 %4337  ;;  %4427 = vmax.xlane.f32.xlu1 %v8444_v40  ;;  %4421 = vmax.xlane.f32.xlu0 %v8448_v25 }
 0x503   : > { %v4463_v11 = vsub.f32 %v8173_v12, %v4338_v15  ;;  %v8456_v7 = vsel %vm4268_vm2, %v4191_v50, -inf }
 0x504   : > { %v4334_v34 = vpop.xlane.xlu0 %4333 }
 0x505   : > { %v4529_v33 = vmul.f32 1.442695, %v4463_v11  ;;  %v4461_v44 = vsub.f32 %v8179_v30, %v4334_v34 }
 0x506   : > { %v4340_v42 = vpop.xlane.xlu1 %4339  ;;  %4423 = vmax.xlane.f32.xlu1 %v8456_v7 }
 0x507   : > { %6297 = vpow2.f32 %v4529_v33  ;;  %v4464_v9 = vsub.f32 %v8185_v19, %v4340_v42  ;;  %v4525_v26 = vmul.f32 1.442695, %v4461_v44 }
 0x508   : > { %v4336_v23 = vpop.xlane.xlu0 %4335 }
 0x509   : > { %v4531_v0 = vmul.f32 1.442695, %v4464_v9  ;;  %v4462_v52 = vsub.f32 %v8191_v24, %v4336_v23 }
 0x50a   : > { %v6123_v12 = vpop.f32.mrf.mxu0 }
 0x50b   : > { %6299 = vpow2.f32 %v4531_v0  ;;  %v4212_v1 = vadd.f32 %v6123_v12, %v8166_v20  ;;  %v4527_v30 = vmul.f32 1.442695, %v4462_v52 }
 0x50c   : > { %6301 = vpow2.f32 %v4525_v26  ;;  %v4203_v16 = vpop.f32.mrf.mxu0  ;;  %v4346_v50 = vpop.xlane.xlu0 %4345 }
 0x50d   : > { %v4204_v15 = vadd.f32 %v8166_v20, %v4203_v16  ;;  %v4467_v11 = vsub.f32 %v8198_v14, %v4346_v50  ;;  %v8466_v19 = vsel %vm4268_vm2, %v4212_v1, -inf  ;;  %6303 = vpow2.f32 %v4527_v30 }
 0x50e   : > { %v4348_v34 = vpop.xlane.xlu1 %4347  ;;  %v6124_v33 = vpop.f32.mrf.mxu0  ;;  %4433 = vmax.xlane.f32.xlu0 %v8466_v19 }
 0x50f   : > { %v4537_v24 = vmul.f32 1.442695, %v4467_v11  ;;  %v4468_v44 = vsub.f32 %v8204_v57, %v4348_v34  ;;  %v4215_v42 = vadd.f32 %v6124_v33, %v8166_v20  ;;  %v8474_v0 = vsel %vm4268_vm2, %v4204_v15, -inf }
 0x510   : > { %v4206_v9 = vpop.f32.mrf.mxu0  ;;  %v4342_v26 = vpop.xlane.xlu0 %4341 }
 0x511   : > { %6305 = vpow2.f32 %v4537_v24  ;;  %v4539_v23 = vmul.f32 1.442695, %v4468_v44  ;;  %v4465_v14 = vsub.f32 %v8210_v43, %v4342_v26  ;;  %v4207_v52 = vadd.f32 %v8166_v20, %v4206_v9 }
 0x512   : > { %v8479_v12 = vsel %vm4268_vm2, %v4215_v42, -inf  ;;  %v4344_v57 = vpop.xlane.xlu1 %4343  ;;  %4429 = vmax.xlane.f32.xlu0 %v8474_v0 }
 0x513   : > { %6307 = vpow2.f32 %v4539_v23  ;;  %4435 = vmax.xlane.f32.xlu1 %v8479_v12  ;;  %v4533_v43 = vmul.f32 1.442695, %v4465_v14  ;;  %v4466_v16 = vsub.f32 %v8215_v63, %v4344_v57  ;;  %v8488_v50 = vsel %vm4268_vm2, %v4207_v52, -inf }
 0x514   : > { %v8483_v1 = vpop.eup %6297  ;;  %v4354_v30 = vpop.xlane.xlu0 %4353 }
 0x515   : > { %6309 = vpow2.f32 %v4533_v43  ;;  %v4535_v24 = vmul.f32 1.442695, %v4466_v16  ;;  %v4471_v44 = vsub.f32 %v8222_v22, %v4354_v30 }
 0x516   : > { %v4356_v15 = vpop.xlane.xlu1 %4355  ;;  %4657 = vadd.xlane.f32.xlu0 %v8483_v1 }
 0x517   : > { %4431 = vmax.xlane.f32.xlu1 %v8488_v50  ;;  %v4472_v63 = vsub.f32 %v8228_v10, %v4356_v15  ;;  %6311 = vpow2.f32 %v4535_v24  ;;  %v4545_v14 = vmul.f32 1.442695, %v4471_v44 }
 0x518   : > { %v8492_v11 = vpop.eup %6299  ;;  %v4350_v34 = vpop.xlane.xlu0 %4349 }
 0x519   : > { %v8494_v33 = vpop.eup %6301  ;;  %v4469_v52 = vsub.f32 %v8234_v47, %v4350_v34  ;;  %v4547_v10 = vmul.f32 1.442695, %v4472_v63  ;;  %6313 = vpow2.f32 %v4545_v14 }
 0x51a   : > { %v6127_v42 = vpop.f32.mrf.mxu0  ;;  %4653 = vadd.xlane.f32.xlu0 %v8494_v33  ;;  %v4352_v9 = vpop.xlane.xlu1 %4351 }
 0x51b   : > { %4659 = vadd.xlane.f32.xlu1 %v8492_v11  ;;  %v8500_v23 = vpop.eup %6303  ;;  %v4228_v43 = vadd.f32 %v6127_v42, %v8166_v20  ;;  %v4470_v15 = vsub.f32 %v8239_v51, %v4352_v9  ;;  %v4541_v24 = vmul.f32 1.442695, %v4469_v52  ;;  %6315 = vpow2.f32 %v4547_v10 }
 0x51c   : > { %v4219_v26 = vpop.f32.mrf.mxu0  ;;  %v4362_v22 = vpop.xlane.xlu0 %4361 }
 0x51d   : > { %v4475_v44 = vsub.f32 %v8246_v6, %v4362_v22  ;;  %v8515_v42 = vsel %vm4268_vm2, %v4228_v43, -inf  ;;  %6317 = vpow2.f32 %v4541_v24  ;;  %v4220_v6 = vadd.f32 %v8166_v20, %v4219_v26 }
 0x51e   : > { %v8503_v57 = vpop.eup %6305  ;;  %v6128_v30 = vpop.f32.mrf.mxu0 }
 0x51f   : > { %8940 = vst [vmem:[#allocation2_spill] sm:$0xff] %v8503_v57  ;;  %4655 = vadd.xlane.f32.xlu1 %v8500_v23  ;;  %4665 = vadd.xlane.f32.xlu0 %v8503_v57  ;;  %v4231_v47 = vadd.f32 %v6128_v30, %v8166_v20  ;;  %v4364_v34 = vpop.xlane.xlu1 %4363  ;;  %v4543_v57 = vmul.f32 1.442695, %v4470_v15  ;;  %v4553_v63 = vmul.f32 1.442695, %v4475_v44  ;;  %v8535_v15 = vsel %vm4268_vm2, %v4220_v6, -inf }
 0x520   : > { %v8508_v16 = vpop.eup %6307  ;;  %v4476_v51 = vsub.f32 %v8252_v32, %v4364_v34  ;;  %v4358_v14 = vpop.xlane.xlu0 %4357 }
 0x521   : > { %v8525_v52 = vsel %vm4268_vm2, %v4231_v47, -inf  ;;  %v4222_v43 = vpop.f32.mrf.mxu0  ;;  %6319 = vpow2.f32 %v4543_v57  ;;  %v4473_v30 = vsub.f32 %v8258_v48, %v4358_v14 }
 0x522   : > { %v8520_v9 = vpop.eup %6309  ;;  %6321 = vpow2.f32 %v4553_v63  ;;  %v4555_v22 = vmul.f32 1.442695, %v4476_v51  ;;  %v4223_v26 = vadd.f32 %v8166_v20, %v4222_v43 }
 0x523   : > { %4667 = vadd.xlane.f32.xlu1 %v8508_v16  ;;  %4441 = vmax.xlane.f32.xlu0 %v8515_v42  ;;  %v4360_v32 = vpop.xlane.xlu1 %4359  ;;  %v4549_v57 = vmul.f32 1.442695, %v4473_v30 }
 0x524   : > { %v8530_v10 = vpop.eup %6311  ;;  %v4370_v24 = vpop.xlane.xlu0 %4369  ;;  %6323 = vpow2.f32 %v4555_v22  ;;  %v4474_v44 = vsub.f32 %v8263_v41, %v4360_v32  ;;  %v8544_v48 = vsel %vm4268_vm2, %v4223_v26, -inf }
 0x525   : > { %6325 = vpow2.f32 %v4549_v57  ;;  %v4479_v14 = vsub.f32 %v8270_v21, %v4370_v24 }
 0x526   : > { %v8540_v47 = vpop.eup %6313  ;;  %v4551_v6 = vmul.f32 1.442695, %v4474_v44 }
 0x527   : > { %4443 = vmax.xlane.f32.xlu1 %v8525_v52  ;;  %4661 = vadd.xlane.f32.xlu0 %v8520_v9  ;;  %8941 = vst [vmem:[#allocation3_spill] sm:$0xff] %v8540_v47  ;;  %v4372_v34 = vpop.xlane.xlu1 %4371  ;;  %v4561_v26 = vmul.f32 1.442695, %v4479_v14 }
 0x528   : > { %v8548_v51 = vpop.eup %6315  ;;  %v4366_v41 = vpop.xlane.xlu0 %4365  ;;  %v4480_v30 = vsub.f32 %v8276_v36, %v4372_v34  ;;  %6327 = vpow2.f32 %v4551_v6 }
 0x529   : > { %8942 = vst [vmem:[#allocation4_spill] sm:$0xff] %v8548_v51  ;;  %6329 = vpow2.f32 %v4561_v26 }
 0x52a   : > { %v6131_v63 = vpop.f32.mrf.mxu0  ;;  %v8551_v43 = vpop.eup %6317 }
 0x52b   : > { %4663 = vadd.xlane.f32.xlu1 %v8530_v10  ;;  %4437 = vmax.xlane.f32.xlu0 %v8535_v15  ;;  %8943 = vst [vmem:[#allocation5_spill] sm:$0xff] %v8551_v43  ;;  %v4368_v57 = vpop.xlane.xlu1 %4367  ;;  %v4244_v21 = vadd.f32 %v6131_v63, %v8166_v20 }
 0x52c   : > { %v4235_v22 = vpop.f32.mrf.mxu0  ;;  %v4478_v34 = vsub.f32 %v8287_v62, %v4368_v57 }
 0x52d   : > { %v8570_v14 = vsel %vm4268_vm2, %v4244_v21, -inf  ;;  %v4236_v62 = vadd.f32 %v8166_v20, %v4235_v22 }
 0x52e   : > { %v8556_v32 = vpop.eup %6319  ;;  %v6132_v24 = vpop.f32.mrf.mxu0 }
 0x52f   : > { %4439 = vmax.xlane.f32.xlu1 %v8544_v48  ;;  %4673 = vadd.xlane.f32.xlu0 %v8540_v47  ;;  %8944 = vst [vmem:[#allocation6_spill] sm:$0xff] %v8556_v32  ;;  %v4477_v47 = vsub.f32 %v8282_v61, %v4366_v41  ;;  %v8559_v44 = vpop.eup %6321  ;;  %v4247_v61 = vadd.f32 %v6132_v24, %v8166_v20  ;;  %v4380_v63 = vpop.xlane.xlu1 %4379  ;;  %v4559_v41 = vmul.f32 1.442695, %v4478_v34  ;;  %v8589_v22 = vsel %vm4268_vm2, %v4236_v62, -inf }
 0x530   : > { %8945 = vst [vmem:[#allocation7_spill] sm:$0xff] %v8559_v44  ;;  %v4238_v57 = vpop.f32.mrf.mxu0  ;;  %8949 = vst [vmem:[#allocation11_spill] sm:$0xff] %v8589_v22 }
 0x531   : > { %v4557_v36 = vmul.f32 1.442695, %v4477_v47  ;;  %v8565_v6 = vpop.eup %6323  ;;  %v8579_v26 = vsel %vm4268_vm2, %v4247_v61, -inf }
 0x532   : > { %8946 = vst [vmem:[#allocation8_spill] sm:$0xff] %v8565_v6 }
 0x533   : > { %4675 = vadd.xlane.f32.xlu1 %v8548_v51  ;;  %4669 = vadd.xlane.f32.xlu0 %v8551_v43  ;;  %v4563_v51 = vmul.f32 1.442695, %v4480_v30  ;;  %v4378_v43 = vpop.xlane.xlu0 %4377  ;;  %v8574_v30 = vpop.eup %6325 }
 0x534   : > { %8947 = vst [vmem:[#allocation9_spill] sm:$0xff] %v8574_v30 }
 0x535   : > { %6331 = vpow2.f32 %v4563_v51  ;;  %v4376_v51 = vpop.xlane.xlu1 %4375  ;;  %v8584_v24 = vpop.eup %6327 }
 0x536   : > { %6333 = vpow2.f32 %v4557_v36  ;;  %8948 = vst [vmem:[#allocation10_spill] sm:$0xff] %v8584_v24  ;;  %v4239_v36 = vadd.f32 %v8166_v20, %v4238_v57 }
 0x537   : > { %4671 = vadd.xlane.f32.xlu1 %v8556_v32  ;;  %4681 = vadd.xlane.f32.xlu0 %v8559_v44  ;;  %v4374_v47 = vpop.xlane.xlu0 %4373  ;;  %6335 = vpow2.f32 %v4559_v41 }
 0x538   : > { %v4481_v21 = vsub.f32 %v8305_v60, %v4374_v47  ;;  %v4482_v60 = vsub.f32 %v8310_v18, %v4376_v51  ;;  %v8599_v57 = vsel %vm4268_vm2, %v4239_v36, -inf }
 0x53a   : > { %v6135_v61 = vpop.f32.mrf.mxu0  ;;  %v4565_v41 = vmul.f32 1.442695, %v4481_v21  ;;  %v4567_v18 = vmul.f32 1.442695, %v4482_v60 }
 0x53b   : > { %4683 = vadd.xlane.f32.xlu1 %v8565_v6  ;;  %4449 = vmax.xlane.f32.xlu0 %v8570_v14  ;;  %v4386_v34 = vpop.xlane.xlu0 %4385  ;;  %v4388_v47 = vpop.xlane.xlu1 %4387  ;;  %v4260_v51 = vadd.f32 %v6135_v61, %v8166_v20 }
 0x53c   : > { %v8595_v6 = vpop.eup %6329  ;;  %v4251_v44 = vpop.f32.mrf.mxu0  ;;  %6337 = vpow2.f32 %v4565_v41 }
 0x53e   : > { %v6136_v36 = vpop.f32.mrf.mxu0 }
 0x53f   : > { %4451 = vmax.xlane.f32.xlu1 %v8579_v26  ;;  %4677 = vadd.xlane.f32.xlu0 %v8574_v30  ;;  %v4483_v30 = vsub.f32 %v8294_v13, %v4378_v43  ;;  %v4382_v32 = vpop.xlane.xlu0 %4381  ;;  %v4487_v43 = vsub.f32 %v8317_v17, %v4386_v34  ;;  %v4252_v34 = vadd.f32 %v8166_v20, %v4251_v44 }
 0x540   : > { %v4485_v60 = vsub.f32 %v8328_v56, %v4382_v32  ;;  %v4263_v61 = vadd.f32 %v6136_v36, %v8166_v20 }
 0x541   : > { %v4569_v62 = vmul.f32 1.442695, %v4483_v30  ;;  %v4577_v41 = vmul.f32 1.442695, %v4487_v43  ;;  %v8633_v43 = vsel %vm4268_vm2, %v4252_v34, -inf }
 0x542   : > { %v8604_v13 = vpop.eup %6331  ;;  %v4573_v32 = vmul.f32 1.442695, %v4485_v60 }
 0x543   : > { %4679 = vadd.xlane.f32.xlu1 %v8584_v24  ;;  %4445 = vmax.xlane.f32.xlu0 %v8589_v22  ;;  %v4484_v24 = vsub.f32 %v8300_v38, %v4380_v63  ;;  %8950 = vst [vmem:[#allocation12_spill] sm:$0xff] %v8604_v13  ;;  %v8607_v21 = vpop.eup %6333  ;;  %v4384_v22 = vpop.xlane.xlu1 %4383  ;;  %6339 = vpow2.f32 %v4569_v62  ;;  %v4488_v38 = vsub.f32 %v8324_v58, %v4388_v47 }
 0x544   : > { %8951 = vst [vmem:[#allocation13_spill] sm:$0xff] %v8607_v21  ;;  %6341 = vpow2.f32 %v4567_v18  ;;  %v8614_v17 = vpop.eup %6335  ;;  %v4486_v56 = vsub.f32 %v8334_v27, %v4384_v22  ;;  %v8629_v18 = vsel %vm4268_vm2, %v4263_v61, -inf }
 0x545   : > { %v4571_v30 = vmul.f32 1.442695, %v4484_v24  ;;  %v4579_v58 = vmul.f32 1.442695, %v4488_v38 }
 0x546   : > { %v4575_v27 = vmul.f32 1.442695, %v4486_v56 }
 0x547   : > { %4447 = vmax.xlane.f32.xlu1 %v8599_v57  ;;  %4689 = vadd.xlane.f32.xlu0 %v8595_v6  ;;  %v4394_v63 = vpop.xlane.xlu0 %4393  ;;  %6343 = vpow2.f32 %v4571_v30 }
 0x548   : > { %6345 = vpow2.f32 %v4577_v41  ;;  %v4491_v44 = vsub.f32 %v8341_v53, %v4394_v63 }
 0x549   : > { %6347 = vpow2.f32 %v4579_v58 }
 0x54a   : > { %6349 = vpow2.f32 %v4573_v32  ;;  %v4585_v53 = vmul.f32 1.442695, %v4491_v44 }
 0x54b   : > { %4691 = vadd.xlane.f32.xlu1 %v8604_v13  ;;  %4685 = vadd.xlane.f32.xlu0 %v8607_v21  ;;  %v8620_v13 = vsel %vm4268_vm2, %v4260_v51, -inf  ;;  %v4254_v21 = vpop.f32.mrf.mxu0  ;;  %v4396_v62 = vpop.xlane.xlu1 %4395  ;;  %6351 = vpow2.f32 %v4575_v27 }
 0x54c   : > { %v4255_v24 = vadd.f32 %v8166_v20, %v4254_v21  ;;  %v4390_v47 = vpop.xlane.xlu0 %4389  ;;  %v4492_v22 = vsub.f32 %v8348_v59, %v4396_v62  ;;  %v8639_v51 = vpop.eup %6337  ;;  %6353 = vpow2.f32 %v4585_v53 }
 0x54d   : > { %v4489_v20 = vsub.f32 %v8352_v2, %v4390_v47 }
 0x54e   : > { %v8643_v36 = vsel %vm4268_vm2, %v4255_v24, -inf  ;;  %v4587_v38 = vmul.f32 1.442695, %v4492_v22 }
 0x54f   : > { %4687 = vadd.xlane.f32.xlu1 %v8614_v17  ;;  %4457 = vmax.xlane.f32.xlu0 %v8620_v13  ;;  %v4392_v21 = vpop.xlane.xlu1 %4391  ;;  %v4581_v2 = vmul.f32 1.442695, %v4489_v20 }
 0x550   : > { %v4490_v59 = vsub.f32 %v8358_v8, %v4392_v21  ;;  %v8648_v63 = vpop.eup %6339  ;;  %6355 = vpow2.f32 %v4587_v38 }
 0x551   : > { %v8651_v60 = vpop.eup %6341  ;;  %6357 = vpow2.f32 %v4581_v2 }
 0x552   : > { %v4583_v61 = vmul.f32 1.442695, %v4490_v59 }
 0x553   : > { %4459 = vmax.xlane.f32.xlu1 %v8629_v18  ;;  %4453 = vmax.xlane.f32.xlu0 %v8633_v43 }
 0x554   : > { %v8656_v58 = vpop.eup %6343  ;;  %6359 = vpow2.f32 %v4583_v61 }
 0x555   : > { %v8659_v32 = vpop.eup %6345 }
 0x556   : > { %v8663_v24 = vpop.eup %6347 }
 0x557   : > { %4455 = vmax.xlane.f32.xlu1 %v8643_v36  ;;  %4693 = vadd.xlane.f32.xlu0 %v8639_v51  ;;  %v4402_v30 = vpop.xlane.xlu0 %4401  ;;  %v8666_v27 = vpop.eup %6349 }
 0x558   : > { %v4495_v41 = vsub.f32 %v8365_v46, %v4402_v30 }
 0x55a   : > { %v4593_v8 = vmul.f32 1.442695, %v4495_v41 }
 0x55b   : > { %4695 = vadd.xlane.f32.xlu1 %v8651_v60  ;;  %v4404_v28 = vpop.xlane.xlu1 %4403  ;;  %4697 = vadd.xlane.f32.xlu0 %v8648_v63  ;;  %v4398_v34 = vpop.xlane.xlu0 %4397 }
 0x55c   : > { %v4496_v62 = vsub.f32 %v8372_v39, %v4404_v28  ;;  %v4493_v56 = vsub.f32 %v8376_v49, %v4398_v34  ;;  %6361 = vpow2.f32 %v4593_v8  ;;  %v8670_v49 = vpop.eup %6351 }
 0x55d   : > { %v8672_v53 = vpop.eup %6353 }
 0x55e   : > { %v4595_v44 = vmul.f32 1.442695, %v4496_v62  ;;  %v4589_v47 = vmul.f32 1.442695, %v4493_v56  ;;  %v8677_v21 = vpop.eup %6355 }
 0x55f   : > { %4699 = vadd.xlane.f32.xlu1 %v8656_v58  ;;  %v4400_v46 = vpop.xlane.xlu1 %4399  ;;  %4705 = vadd.xlane.f32.xlu0 %v8659_v32  ;;  %v8679_v30 = vpop.eup %6357 }
 0x560   : > { %v4494_v39 = vsub.f32 %v8382_v29, %v4400_v46  ;;  %6363 = vpow2.f32 %v4595_v44 }
 0x561   : > { %6365 = vpow2.f32 %v4589_v47  ;;  %v8685_v34 = vpop.eup %6359 }
 0x562   : > { %v4591_v22 = vmul.f32 1.442695, %v4494_v39 }
 0x563   : > { %4707 = vadd.xlane.f32.xlu1 %v8663_v24  ;;  %4701 = vadd.xlane.f32.xlu0 %v8666_v27 }
 0x564   : > { %6367 = vpow2.f32 %v4591_v22 }
 0x567   : > { %4703 = vadd.xlane.f32.xlu1 %v8670_v49  ;;  %4713 = vadd.xlane.f32.xlu0 %v8672_v53  ;;  %v4410_v20 = vpop.xlane.xlu0 %4409 }
 0x568   : > { %v4499_v29 = vsub.f32 %v8389_v45, %v4410_v20 }
 0x569   : > { %v8687_v45 = vpop.eup %6361 }
 0x56a   : > { %v4601_v38 = vmul.f32 1.442695, %v4499_v29 }
 0x56b   : > { %4715 = vadd.xlane.f32.xlu1 %v8677_v21  ;;  %v4412_v59 = vpop.xlane.xlu1 %4411  ;;  %4709 = vadd.xlane.f32.xlu0 %v8679_v30  ;;  %v4406_v2 = vpop.xlane.xlu0 %4405 }
 0x56c   : > { %6369 = vpow2.f32 %v4601_v38  ;;  %v4500_v41 = vsub.f32 %v8396_v55, %v4412_v59  ;;  %v4497_v28 = vsub.f32 %v8400_v35, %v4406_v2 }
 0x56d   : > { %v8692_v46 = vpop.eup %6363 }
 0x56e   : > { %v4603_v61 = vmul.f32 1.442695, %v4500_v41  ;;  %v4597_v62 = vmul.f32 1.442695, %v4497_v28  ;;  %v8694_v55 = vpop.eup %6365 }
 0x56f   : > { %4711 = vadd.xlane.f32.xlu1 %v8685_v34  ;;  %v4408_v8 = vpop.xlane.xlu1 %4407  ;;  %4721 = vadd.xlane.f32.xlu0 %v8687_v45 }
 0x570   : > { %6371 = vpow2.f32 %v4603_v61  ;;  %v4498_v56 = vsub.f32 %v8406_v54, %v4408_v8 }
 0x571   : > { %6373 = vpow2.f32 %v4597_v62  ;;  %v8698_v44 = vpop.eup %6367 }
 0x572   : > { %v4599_v35 = vmul.f32 1.442695, %v4498_v56 }
 0x573   : > { %4723 = vadd.xlane.f32.xlu1 %v8692_v46  ;;  %4717 = vadd.xlane.f32.xlu0 %v8694_v55 }
 0x574   : > { %6375 = vpow2.f32 %v4599_v35 }
 0x577   : > { %4719 = vadd.xlane.f32.xlu1 %v8698_v44  ;;  %v4418_v47 = vpop.xlane.xlu0 %4417 }
 0x578   : > { %v4503_v39 = vsub.f32 %v8413_v3, %v4418_v47 }
 0x579   : > { %v8702_v22 = vpop.eup %6369 }
 0x57a   : > { %v4609_v54 = vmul.f32 1.442695, %v4503_v39  ;;  %4729 = vadd.xlane.f32.xlu0 %v8702_v22 }
 0x57b   : > { %v4420_v20 = vpop.xlane.xlu1 %4419  ;;  %v4414_v29 = vpop.xlane.xlu0 %4413 }
 0x57c   : > { %6377 = vpow2.f32 %v4609_v54  ;;  %v4504_v38 = vsub.f32 %v8420_v5, %v4420_v20  ;;  %v4501_v59 = vsub.f32 %v8424_v31, %v4414_v29 }
 0x57d   : > { %v8707_v2 = vpop.eup %6371 }
 0x57e   : > { %v8709_v41 = vpop.eup %6373  ;;  %v4611_v28 = vmul.f32 1.442695, %v4504_v38  ;;  %v4605_v61 = vmul.f32 1.442695, %v4501_v59  ;;  %4731 = vadd.xlane.f32.xlu1 %v8707_v2 }
 0x57f   : > { %4725 = vadd.xlane.f32.xlu0 %v8709_v41  ;;  %v4416_v3 = vpop.xlane.xlu1 %4415 }
 0x580   : > { %6379 = vpow2.f32 %v4611_v28  ;;  %v4502_v62 = vsub.f32 %v8430_v37, %v4416_v3 }
 0x581   : > { %v8714_v8 = vpop.eup %6375  ;;  %6381 = vpow2.f32 %v4605_v61 }
 0x582   : > { %v4607_v5 = vmul.f32 1.442695, %v4502_v62  ;;  %4727 = vadd.xlane.f32.xlu1 %v8714_v8 }
 0x584   : > { %6383 = vpow2.f32 %v4607_v5 }
 0x587   : > { %v4426_v31 = vpop.xlane.xlu0 %4425 }
 0x588   : > { %v4507_v56 = vsub.f32 %v8437_v4, %v4426_v31 }
 0x589   : > { %v8718_v35 = vpop.eup %6377 }
 0x58a   : > { %v4617_v47 = vmul.f32 1.442695, %v4507_v56  ;;  %4737 = vadd.xlane.f32.xlu0 %v8718_v35 }
 0x58b   : > { %v4428_v39 = vpop.xlane.xlu1 %4427  ;;  %v4422_v54 = vpop.xlane.xlu0 %4421 }
 0x58c   : > { %6385 = vpow2.f32 %v4617_v47  ;;  %v4508_v37 = vsub.f32 %v8444_v40, %v4428_v39  ;;  %v4505_v20 = vsub.f32 %v8448_v25, %v4422_v54 }
 0x58d   : > { %v8723_v29 = vpop.eup %6379 }
 0x58e   : > { %v8725_v38 = vpop.eup %6381  ;;  %v4619_v59 = vmul.f32 1.442695, %v4508_v37  ;;  %v4613_v28 = vmul.f32 1.442695, %v4505_v20  ;;  %4739 = vadd.xlane.f32.xlu1 %v8723_v29 }
 0x58f   : > { %4733 = vadd.xlane.f32.xlu0 %v8725_v38  ;;  %v4424_v4 = vpop.xlane.xlu1 %4423 }
 0x590   : > { %6387 = vpow2.f32 %v4619_v59  ;;  %v4506_v61 = vsub.f32 %v8456_v7, %v4424_v4 }
 0x591   : > { %v8730_v3 = vpop.eup %6383  ;;  %6389 = vpow2.f32 %v4613_v28 }
 0x592   : > { %v4615_v40 = vmul.f32 1.442695, %v4506_v61  ;;  %4735 = vadd.xlane.f32.xlu1 %v8730_v3 }
 0x594   : > { %6391 = vpow2.f32 %v4615_v40 }
 0x597   : > { %v4434_v25 = vpop.xlane.xlu0 %4433 }
 0x598   : > { %v4511_v62 = vsub.f32 %v8466_v19, %v4434_v25 }
 0x599   : > { %v8734_v5 = vpop.eup %6385 }
 0x59a   : > { %v4625_v31 = vmul.f32 1.442695, %v4511_v62  ;;  %4745 = vadd.xlane.f32.xlu0 %v8734_v5 }
 0x59b   : > { %v4430_v56 = vpop.xlane.xlu0 %4429 }
 0x59c   : > { %6393 = vpow2.f32 %v4625_v31  ;;  %v4436_v47 = vpop.xlane.xlu1 %4435  ;;  %v4509_v7 = vsub.f32 %v8474_v0, %v4430_v56 }
 0x59d   : > { %v8738_v39 = vpop.eup %6387  ;;  %v4512_v54 = vsub.f32 %v8479_v12, %v4436_v47 }
 0x59e   : > { %v8741_v37 = vpop.eup %6389  ;;  %v4621_v20 = vmul.f32 1.442695, %v4509_v7  ;;  %4747 = vadd.xlane.f32.xlu1 %v8738_v39 }
 0x59f   : > { %v4627_v19 = vmul.f32 1.442695, %v4512_v54  ;;  %4741 = vadd.xlane.f32.xlu0 %v8741_v37  ;;  %v4658_v59 = vpop.xlane.xlu0 %4657 }
 0x5a0   : > { %6395 = vpow2.f32 %v4621_v20  ;;  %v4432_v28 = vpop.xlane.xlu1 %4431 }
 0x5a1   : > { %v8745_v4 = vpop.eup %6391  ;;  %6397 = vpow2.f32 %v4627_v19  ;;  %v4510_v0 = vsub.f32 %v8488_v50, %v4432_v28 }
 0x5a2   : > { %4743 = vadd.xlane.f32.xlu1 %v8745_v4  ;;  %6399 = vrcp.f32 %v4658_v59 }
 0x5a3   : > { %v4623_v61 = vmul.f32 1.442695, %v4510_v0  ;;  %v4654_v12 = vpop.xlane.xlu0 %4653 }
 0x5a4   : > { %v4660_v40 = vpop.xlane.xlu1 %4659 }
 0x5a5   : > { %6401 = vpow2.f32 %v4623_v61 }
 0x5a6   : > { %6403 = vrcp.f32 %v4660_v40 }
 0x5a7   : > { %6405 = vrcp.f32 %v4654_v12 }
 0x5a8   : > { %v4656_v25 = vpop.xlane.xlu1 %4655  ;;  %v4666_v62 = vpop.xlane.xlu0 %4665 }
 0x5a9   : > { %v8749_v31 = vpop.eup %6393  ;;  %6407 = vrcp.f32 %v4656_v25 }
 0x5aa   : > { %4753 = vadd.xlane.f32.xlu0 %v8749_v31  ;;  %6409 = vrcp.f32 %v4666_v62 }
 0x5ac   : > { %v4668_v56 = vpop.xlane.xlu1 %4667  ;;  %v4442_v47 = vpop.xlane.xlu0 %4441 }
 0x5ad   : > { %v8752_v50 = vpop.eup %6395  ;;  %6411 = vrcp.f32 %v4668_v56  ;;  %v4515_v7 = vsub.f32 %v8515_v42, %v4442_v47 }
 0x5ae   : > { %v8755_v54 = vpop.eup %6397  ;;  %4749 = vadd.xlane.f32.xlu0 %v8752_v50 }
 0x5af   : > { %v4633_v20 = vmul.f32 1.442695, %v4515_v7  ;;  %4755 = vadd.xlane.f32.xlu1 %v8755_v54  ;;  %v6400_v28 = vpop.eup %6399 }
 0x5b0   : > { %v4444_v19 = vpop.xlane.xlu1 %4443  ;;  %v4662_v59 = vpop.xlane.xlu0 %4661  ;;  %v4847_v25 = vmul.f32 %v6400_v28, %v8483_v1 }
 0x5b1   : > { %6413 = vpow2.f32 %v4633_v20  ;;  %v4516_v0 = vsub.f32 %v8525_v52, %v4444_v19 }
 0x5b2   : > { %v8760_v61 = vpop.eup %6401  ;;  %6415 = vrcp.f32 %v4662_v59 }
 0x5b3   : > { %8952 = vst [vmem:[#allocation14_spill] sm:$0xff] %v8760_v61  ;;  %v6404_v12 = vpop.eup %6403  ;;  %v4635_v40 = vmul.f32 1.442695, %v4516_v0  ;;  %4751 = vadd.xlane.f32.xlu1 %v8760_v61 }
 0x5b4   : > { %v6406_v42 = vpop.eup %6405  ;;  %v4848_v62 = vmul.f32 %v6404_v12, %v8492_v11  ;;  %v4664_v56 = vpop.xlane.xlu1 %4663 }
 0x5b5   : > { %v4438_v47 = vpop.xlane.xlu0 %4437  ;;  %6417 = vpow2.f32 %v4635_v40  ;;  %v4845_v1 = vmul.f32 %v6406_v42, %v8494_v33 }
 0x5b6   : > { %v4513_v52 = vsub.f32 %v8535_v15, %v4438_v47  ;;  %v6408_v7 = vpop.eup %6407  ;;  %v5594_v20 = vpack.c.bf16 %v4848_v62, %v4847_v25  ;;  %6419 = vrcp.f32 %v4664_v56  ;;  %v8953_v15 = vld [vmem:[#allocation2_spill] sm:$0xff] }
 0x5b7   : > { %v4846_v11 = vmul.f32 %v6408_v7, %v8500_v23  ;;  %v6410_v59 = vpop.eup %6409 }
 0x5b8   : > { %v4629_v19 = vmul.f32 1.442695, %v4513_v52  ;;  %5746 = vst [vmem:[%s8770_s20 + $0x8] sm:$0xff] %v5594_v20   ;;  %v4440_v28 = vpop.xlane.xlu1 %4439  ;;  %v4851_v47 = vmul.f32 %v6410_v59, %v8953_v15 }
 0x5b9   : > { %v4674_v0 = vpop.xlane.xlu0 %4673  ;;  %v5589_v12 = vpack.c.bf16 %v4846_v11, %v4845_v1  ;;  %v4514_v40 = vsub.f32 %v8544_v48, %v4440_v28 }
 0x5ba   : > { %6421 = vpow2.f32 %v4629_v19  ;;  %v6412_v61 = vpop.eup %6411 }
 0x5bb   : > { %5590 = vst [vmem:[%s8770_s20] sm:$0xff] %v5589_v12   ;;  %v4852_v25 = vmul.f32 %v6412_v61, %v8508_v16  ;;  %v4631_v62 = vmul.f32 1.442695, %v4514_v40  ;;  %6423 = vrcp.f32 %v4674_v0 }
 0x5bc   : > { %v4676_v33 = vpop.xlane.xlu1 %4675 }
 0x5bd   : > { %v4670_v23 = vpop.xlane.xlu0 %4669  ;;  %v5604_v42 = vpack.c.bf16 %v4852_v25, %v4851_v47  ;;  %6425 = vpow2.f32 %v4631_v62 }
 0x5be   : > { %v8780_v56 = vpop.eup %6413  ;;  %6427 = vrcp.f32 %v4676_v33  ;;  %v8954_v33 = vld [vmem:[#allocation3_spill] sm:$0xff] }
 0x5bf   : > { %5748 = vst [vmem:[%s8770_s20 + $0x18] sm:$0xff] %v5604_v42   ;;  %6429 = vrcp.f32 %v4670_v23  ;;  %4761 = vadd.xlane.f32.xlu0 %v8780_v56  ;;  %v6416_v7 = vpop.eup %6415  ;;  %v8955_v42 = vld [vmem:[#allocation4_spill] sm:$0xff] }
 0x5c0   : > { %v4672_v48 = vpop.xlane.xlu1 %4671  ;;  %v4849_v61 = vmul.f32 %v6416_v7, %v8520_v9 }
 0x5c1   : > { %v4682_v52 = vpop.xlane.xlu0 %4681  ;;  %6431 = vrcp.f32 %v4672_v48 }
 0x5c2   : > { %v8784_v20 = vpop.eup %6417  ;;  %6433 = vrcp.f32 %v4682_v52 }
 0x5c3   : > { %v6420_v16 = vpop.eup %6419  ;;  %4763 = vadd.xlane.f32.xlu1 %v8784_v20 }
 0x5c4   : > { %v4850_v1 = vmul.f32 %v6420_v16, %v8530_v10  ;;  %v4684_v11 = vpop.xlane.xlu1 %4683  ;;  %v8956_v16 = vld [vmem:[#allocation11_spill] sm:$0xff] }
 0x5c5   : > { %v4450_v19 = vpop.xlane.xlu0 %4449  ;;  %6435 = vrcp.f32 %v4684_v11  ;;  %v8957_v11 = vld [vmem:[#allocation5_spill] sm:$0xff] }
 0x5c6   : > { %v4519_v59 = vsub.f32 %v8570_v14, %v4450_v19  ;;  %v5599_v0 = vpack.c.bf16 %v4850_v1, %v4849_v61 }
 0x5c7   : > { %v8790_v28 = vpop.eup %6421 }
 0x5c8   : > { %v4641_v12 = vmul.f32 1.442695, %v4519_v59  ;;  %4757 = vadd.xlane.f32.xlu0 %v8790_v28  ;;  %5747 = vst [vmem:[%s8770_s20 + $0x10] sm:$0xff] %v5599_v0   ;;  %v4452_v40 = vpop.xlane.xlu1 %4451  ;;  %v6424_v47 = vpop.eup %6423  ;;  %v8958_v59 = vld [vmem:[#allocation6_spill] sm:$0xff] }
 0x5c9   : > { %v4678_v15 = vpop.xlane.xlu0 %4677  ;;  %v4520_v9 = vsub.f32 %v8579_v26, %v4452_v40  ;;  %v4855_v23 = vmul.f32 %v6424_v47, %v8954_v33  ;;  %v8959_v33 = vld [vmem:[#allocation7_spill] sm:$0xff] }
 0x5ca   : > { %6437 = vpow2.f32 %v4641_v12  ;;  %v8795_v25 = vpop.eup %6425 }
 0x5cb   : > { %v6428_v10 = vpop.eup %6427  ;;  %v4643_v62 = vmul.f32 1.442695, %v4520_v9  ;;  %4759 = vadd.xlane.f32.xlu1 %v8795_v25  ;;  %6439 = vrcp.f32 %v4678_v15 }
 0x5cc   : > { %v6430_v14 = vpop.eup %6429  ;;  %v4856_v48 = vmul.f32 %v6428_v10, %v8955_v42  ;;  %v4680_v52 = vpop.xlane.xlu1 %4679 }
 0x5cd   : > { %v4446_v7 = vpop.xlane.xlu0 %4445  ;;  %6441 = vpow2.f32 %v4643_v62  ;;  %v4853_v19 = vmul.f32 %v6430_v14, %v8957_v11 }
 0x5ce   : > { %v4517_v61 = vsub.f32 %v8956_v16, %v4446_v7  ;;  %v6432_v26 = vpop.eup %6431  ;;  %v5614_v1 = vpack.c.bf16 %v4856_v48, %v4855_v23  ;;  %6443 = vrcp.f32 %v4680_v52  ;;  %v8960_v23 = vld [vmem:[#allocation8_spill] sm:$0xff] }
 0x5cf   : > { %v4854_v0 = vmul.f32 %v6432_v26, %v8958_v59  ;;  %v6434_v40 = vpop.eup %6433 }
 0x5d0   : > { %v4637_v12 = vmul.f32 1.442695, %v4517_v61  ;;  %5750 = vst [vmem:[%s8770_s20 + $0x28] sm:$0xff] %v5614_v1   ;;  %v4448_v47 = vpop.xlane.xlu1 %4447  ;;  %v4859_v42 = vmul.f32 %v6434_v40, %v8959_v33  ;;  %v8962_v40 = vld [vmem:[#allocation10_spill] sm:$0xff] }
 0x5d1   : > { %v4690_v9 = vpop.xlane.xlu0 %4689  ;;  %v5609_v15 = vpack.c.bf16 %v4854_v0, %v4853_v19  ;;  %v4518_v10 = vsub.f32 %v8599_v57, %v4448_v47  ;;  %v8961_v0 = vld [vmem:[#allocation9_spill] sm:$0xff] }
 0x5d2   : > { %6445 = vpow2.f32 %v4637_v12  ;;  %v6436_v62 = vpop.eup %6435 }
 0x5d3   : > { %5749 = vst [vmem:[%s8770_s20 + $0x20] sm:$0xff] %v5609_v15   ;;  %v4860_v48 = vmul.f32 %v6436_v62, %v8960_v23  ;;  %v4639_v52 = vmul.f32 1.442695, %v4518_v10  ;;  %6447 = vrcp.f32 %v4690_v9 }
 0x5d4   : > { %v4692_v14 = vpop.xlane.xlu1 %4691 }
 0x5d5   : > { %v4686_v7 = vpop.xlane.xlu0 %4685  ;;  %v5624_v16 = vpack.c.bf16 %v4860_v48, %v4859_v42  ;;  %6449 = vpow2.f32 %v4639_v52 }
 0x5d6   : > { %6451 = vrcp.f32 %v4692_v14 }
 0x5d7   : > { %v8808_v61 = vpop.eup %6437  ;;  %5752 = vst [vmem:[%s8770_s20 + $0x38] sm:$0xff] %v5624_v16   ;;  %6453 = vrcp.f32 %v4686_v7 }
 0x5d8   : > { %4769 = vadd.xlane.f32.xlu0 %v8808_v61  ;;  %v4688_v57 = vpop.xlane.xlu1 %4687  ;;  %v6440_v1 = vpop.eup %6439 }
 0x5d9   : > { %v4458_v26 = vpop.xlane.xlu0 %4457  ;;  %6455 = vrcp.f32 %v4688_v57  ;;  %v4857_v12 = vmul.f32 %v6440_v1, %v8961_v0 }
 0x5da   : > { %v8812_v11 = vpop.eup %6441  ;;  %v4523_v59 = vsub.f32 %v8620_v13, %v4458_v26 }
 0x5db   : > { %v6444_v19 = vpop.eup %6443  ;;  %4771 = vadd.xlane.f32.xlu1 %v8812_v11 }
 0x5dc   : > { %v4858_v47 = vmul.f32 %v6444_v19, %v8962_v40  ;;  %v4460_v9 = vpop.xlane.xlu1 %4459  ;;  %v4649_v42 = vmul.f32 1.442695, %v4523_v59  ;;  %v8963_v19 = vld [vmem:[#allocation12_spill] sm:$0xff] }
 0x5dd   : > { %v4454_v15 = vpop.xlane.xlu0 %4453  ;;  %v4524_v13 = vsub.f32 %v8629_v18, %v4460_v9 }
 0x5de   : > { %v4521_v10 = vsub.f32 %v8633_v43, %v4454_v15  ;;  %v5619_v33 = vpack.c.bf16 %v4858_v47, %v4857_v12  ;;  %v8964_v47 = vld [vmem:[#allocation13_spill] sm:$0xff] }
 0x5df   : > { %v8819_v62 = vpop.eup %6445  ;;  %v4651_v18 = vmul.f32 1.442695, %v4524_v13 }
 0x5e0   : > { %v4645_v23 = vmul.f32 1.442695, %v4521_v10  ;;  %4765 = vadd.xlane.f32.xlu0 %v8819_v62  ;;  %5751 = vst [vmem:[%s8770_s20 + $0x30] sm:$0xff] %v5619_v33   ;;  %v4456_v48 = vpop.xlane.xlu1 %4455  ;;  %v6448_v14 = vpop.eup %6447 }
 0x5e1   : > { %v4694_v52 = vpop.xlane.xlu0 %4693  ;;  %v4522_v7 = vsub.f32 %v8643_v36, %v4456_v48  ;;  %v4863_v1 = vmul.f32 %v6448_v14, %v8595_v6 }
 0x5e2   : > { %v8825_v16 = vpop.eup %6449  ;;  %6457 = vpow2.f32 %v4645_v23 }
 0x5e3   : > { %v6452_v57 = vpop.eup %6451  ;;  %6459 = vpow2.f32 %v4649_v42  ;;  %v4647_v43 = vmul.f32 1.442695, %v4522_v7  ;;  %4767 = vadd.xlane.f32.xlu1 %v8825_v16 }
 0x5e4   : > { %v6454_v26 = vpop.eup %6453  ;;  %v4864_v59 = vmul.f32 %v6452_v57, %v8963_v19  ;;  %6461 = vrcp.f32 %v4694_v52  ;;  %v4696_v0 = vpop.xlane.xlu1 %4695 }
 0x5e5   : > { %v4698_v12 = vpop.xlane.xlu0 %4697  ;;  %6463 = vpow2.f32 %v4647_v43  ;;  %v4861_v9 = vmul.f32 %v6454_v26, %v8964_v47 }
 0x5e6   : > { %v6456_v36 = vpop.eup %6455  ;;  %v5634_v40 = vpack.c.bf16 %v4864_v59, %v4863_v1  ;;  %6465 = vrcp.f32 %v4696_v0 }
 0x5e7   : > { %v4862_v15 = vmul.f32 %v6456_v36, %v8614_v17  ;;  %6467 = vrcp.f32 %v4698_v12 }
 0x5e8   : > { %5754 = vst [vmem:[%s8770_s20 + $0x48] sm:$0xff] %v5634_v40   ;;  %6469 = vpow2.f32 %v4651_v18  ;;  %v4700_v10 = vpop.xlane.xlu1 %4699 }
 0x5e9   : > { %v4706_v6 = vpop.xlane.xlu0 %4705  ;;  %v5629_v33 = vpack.c.bf16 %v4862_v15, %v4861_v9  ;;  %6471 = vrcp.f32 %v4700_v10 }
 0x5ea   : > { %6473 = vrcp.f32 %v4706_v6 }
 0x5eb   : > { %5753 = vst [vmem:[%s8770_s20 + $0x40] sm:$0xff] %v5629_v33  }
 0x5ec   : > { %v4708_v42 = vpop.xlane.xlu1 %4707 }
 0x5ed   : > { %v4702_v23 = vpop.xlane.xlu0 %4701  ;;  %6475 = vrcp.f32 %v4708_v42 }
 0x5ee   : > { %6477 = vrcp.f32 %v4702_v23 }
 0x5ef   : > { %v8834_v13 = vpop.eup %6457 }
 0x5f0   : > { %v8836_v48 = vpop.eup %6459  ;;  %v4704_v52 = vpop.xlane.xlu1 %4703  ;;  %4773 = vadd.xlane.f32.xlu0 %v8834_v13 }
 0x5f1   : > { %v4714_v17 = vpop.xlane.xlu0 %4713  ;;  %v6462_v14 = vpop.eup %6461  ;;  %6479 = vrcp.f32 %v4704_v52 }
 0x5f2   : > { %v8839_v7 = vpop.eup %6463  ;;  %6481 = vrcp.f32 %v4714_v17  ;;  %v4865_v26 = vmul.f32 %v6462_v14, %v8639_v51 }
 0x5f3   : > { %v6466_v57 = vpop.eup %6465  ;;  %4775 = vadd.xlane.f32.xlu1 %v8839_v7 }
 0x5f4   : > { %v6468_v43 = vpop.eup %6467  ;;  %v4866_v1 = vmul.f32 %v6466_v57, %v8651_v60  ;;  %v4716_v19 = vpop.xlane.xlu1 %4715  ;;  %4777 = vadd.xlane.f32.xlu0 %v8836_v48 }
 0x5f5   : > { %v4710_v59 = vpop.xlane.xlu0 %4709  ;;  %v8845_v18 = vpop.eup %6469  ;;  %6483 = vrcp.f32 %v4716_v19  ;;  %v4867_v36 = vmul.f32 %v6468_v43, %v8648_v63 }
 0x5f6   : > { %v6472_v0 = vpop.eup %6471  ;;  %v5639_v12 = vpack.c.bf16 %v4866_v1, %v4865_v26  ;;  %6485 = vrcp.f32 %v4710_v59 }
 0x5f7   : > { %v4868_v40 = vmul.f32 %v6472_v0, %v8656_v58  ;;  %4779 = vadd.xlane.f32.xlu1 %v8845_v18  ;;  %v6474_v51 = vpop.eup %6473 }
 0x5f8   : > { %5755 = vst [vmem:[%s8770_s20 + $0x50] sm:$0xff] %v5639_v12   ;;  %v4712_v60 = vpop.xlane.xlu1 %4711  ;;  %v4871_v10 = vmul.f32 %v6474_v51, %v8659_v32 }
 0x5f9   : > { %v4722_v47 = vpop.xlane.xlu0 %4721  ;;  %v5644_v9 = vpack.c.bf16 %v4868_v40, %v4867_v36  ;;  %6487 = vrcp.f32 %v4712_v60 }
 0x5fa   : > { %v6476_v15 = vpop.eup %6475  ;;  %6489 = vrcp.f32 %v4722_v47 }
 0x5fb   : > { %5756 = vst [vmem:[%s8770_s20 + $0x58] sm:$0xff] %v5644_v9   ;;  %v4872_v6 = vmul.f32 %v6476_v15, %v8663_v24  ;;  %v6478_v63 = vpop.eup %6477 }
 0x5fc   : > { %v4724_v58 = vpop.xlane.xlu1 %4723  ;;  %v4869_v52 = vmul.f32 %v6478_v63, %v8666_v27 }
 0x5fd   : > { %v4718_v33 = vpop.xlane.xlu0 %4717  ;;  %v5654_v42 = vpack.c.bf16 %v4872_v6, %v4871_v10  ;;  %6491 = vrcp.f32 %v4724_v58 }
 0x5fe   : > { %v6480_v23 = vpop.eup %6479  ;;  %6493 = vrcp.f32 %v4718_v33 }
 0x5ff   : > { %5758 = vst [vmem:[%s8770_s20 + $0x68] sm:$0xff] %v5654_v42   ;;  %v4870_v17 = vmul.f32 %v6480_v23, %v8670_v49  ;;  %v6482_v14 = vpop.eup %6481 }
 0x600   : > { %v4720_v57 = vpop.xlane.xlu1 %4719  ;;  %v4875_v43 = vmul.f32 %v6482_v14, %v8672_v53 }
 0x601   : > { %v5649_v32 = vpack.c.bf16 %v4870_v17, %v4869_v52  ;;  %6495 = vrcp.f32 %v4720_v57 }
 0x602   : > { %v6484_v24 = vpop.eup %6483 }
 0x603   : > { %5757 = vst [vmem:[%s8770_s20 + $0x60] sm:$0xff] %v5649_v32   ;;  %v4876_v26 = vmul.f32 %v6484_v24, %v8677_v21  ;;  %v4730_v1 = vpop.xlane.xlu0 %4729  ;;  %v6486_v19 = vpop.eup %6485 }
 0x604   : > { %6497 = vrcp.f32 %v4730_v1  ;;  %v4873_v27 = vmul.f32 %v6486_v19, %v8679_v30 }
 0x605   : > { %v5664_v59 = vpack.c.bf16 %v4876_v26, %v4875_v43 }
 0x606   : > { %v6488_v0 = vpop.eup %6487 }
 0x607   : > { %5760 = vst [vmem:[%s8770_s20 + $0x78] sm:$0xff] %v5664_v59   ;;  %v4874_v49 = vmul.f32 %v6488_v0, %v8685_v34  ;;  %v4732_v12 = vpop.xlane.xlu1 %4731  ;;  %v6490_v36 = vpop.eup %6489 }
 0x608   : > { %6499 = vrcp.f32 %v4732_v12  ;;  %v4726_v40 = vpop.xlane.xlu0 %4725  ;;  %v4879_v21 = vmul.f32 %v6490_v36, %v8687_v45 }
 0x609   : > { %v5659_v51 = vpack.c.bf16 %v4874_v49, %v4873_v27  ;;  %6501 = vrcp.f32 %v4726_v40 }
 0x60a   : > { %v6492_v53 = vpop.eup %6491 }
 0x60b   : > { %5759 = vst [vmem:[%s8770_s20 + $0x70] sm:$0xff] %v5659_v51   ;;  %v4880_v60 = vmul.f32 %v6492_v53, %v8692_v46  ;;  %v4728_v47 = vpop.xlane.xlu1 %4727  ;;  %v6494_v9 = vpop.eup %6493 }
 0x60c   : > { %6503 = vrcp.f32 %v4728_v47  ;;  %v4877_v34 = vmul.f32 %v6494_v9, %v8694_v55 }
 0x60d   : > { %v5674_v30 = vpack.c.bf16 %v4880_v60, %v4879_v21 }
 0x60e   : > { %v6496_v15 = vpop.eup %6495 }
 0x60f   : > { %5762 = vst [vmem:[%s8770_s20 + $0x88] sm:$0xff] %v5674_v30   ;;  %v4878_v10 = vmul.f32 %v6496_v15, %v8698_v44 }
 0x611   : > { %v5669_v6 = vpack.c.bf16 %v4878_v10, %v4877_v34  ;;  %v6498_v63 = vpop.eup %6497 }
 0x612   : > { %v4883_v45 = vmul.f32 %v6498_v63, %v8702_v22 }
 0x613   : > { %5761 = vst [vmem:[%s8770_s20 + $0x80] sm:$0xff] %v5669_v6   ;;  %v4738_v58 = vpop.xlane.xlu0 %4737 }
 0x614   : > { %6505 = vrcp.f32 %v4738_v58 }
 0x615   : > { %v6500_v33 = vpop.eup %6499 }
 0x616   : > { %v4884_v46 = vmul.f32 %v6500_v33, %v8707_v2  ;;  %v6502_v42 = vpop.eup %6501 }
 0x617   : > { %v4740_v23 = vpop.xlane.xlu1 %4739  ;;  %v4881_v44 = vmul.f32 %v6502_v42, %v8709_v41 }
 0x618   : > { %v5684_v52 = vpack.c.bf16 %v4884_v46, %v4883_v45  ;;  %6507 = vrcp.f32 %v4740_v23  ;;  %v4734_v17 = vpop.xlane.xlu0 %4733 }
 0x619   : > { %v6504_v55 = vpop.eup %6503  ;;  %6509 = vrcp.f32 %v4734_v17 }
 0x61a   : > { %5764 = vst [vmem:[%s8770_s20 + $0x98] sm:$0xff] %v5684_v52   ;;  %v4882_v14 = vmul.f32 %v6504_v55, %v8714_v8 }
 0x61b   : > { %v4736_v57 = vpop.xlane.xlu1 %4735 }
 0x61c   : > { %v5679_v32 = vpack.c.bf16 %v4882_v14, %v4881_v44  ;;  %6511 = vrcp.f32 %v4736_v57 }
 0x61e   : > { %5763 = vst [vmem:[%s8770_s20 + $0x90] sm:$0xff] %v5679_v32  }
 0x621   : > { %v6506_v22 = vpop.eup %6505 }
 0x622   : > { %v4887_v43 = vmul.f32 %v6506_v22, %v8718_v35 }
 0x623   : > { %v4746_v2 = vpop.xlane.xlu0 %4745 }
 0x624   : > { %6513 = vrcp.f32 %v4746_v2 }
 0x625   : > { %v6508_v24 = vpop.eup %6507 }
 0x626   : > { %v4888_v26 = vmul.f32 %v6508_v24, %v8723_v29  ;;  %v6510_v1 = vpop.eup %6509 }
 0x627   : > { %v4748_v19 = vpop.xlane.xlu1 %4747  ;;  %v4885_v0 = vmul.f32 %v6510_v1, %v8725_v38 }
 0x628   : > { %v5694_v41 = vpack.c.bf16 %v4888_v26, %v4887_v43  ;;  %6515 = vrcp.f32 %v4748_v19  ;;  %v4742_v8 = vpop.xlane.xlu0 %4741 }
 0x629   : > { %v6512_v59 = vpop.eup %6511  ;;  %6517 = vrcp.f32 %v4742_v8 }
 0x62a   : > { %5766 = vst [vmem:[%s8770_s20 + $0xa8] sm:$0xff] %v5694_v41   ;;  %v4886_v27 = vmul.f32 %v6512_v59, %v8730_v3 }
 0x62b   : > { %v4744_v49 = vpop.xlane.xlu1 %4743 }
 0x62c   : > { %v5689_v12 = vpack.c.bf16 %v4886_v27, %v4885_v0  ;;  %6519 = vrcp.f32 %v4744_v49 }
 0x62e   : > { %5765 = vst [vmem:[%s8770_s20 + $0xa0] sm:$0xff] %v5689_v12  }
 0x631   : > { %v6514_v35 = vpop.eup %6513 }
 0x632   : > { %v4891_v40 = vmul.f32 %v6514_v35, %v8734_v5 }
 0x633   : > { %v4754_v29 = vpop.xlane.xlu0 %4753 }
 0x634   : > { %6521 = vrcp.f32 %v4754_v29 }
 0x635   : > { %v6516_v36 = vpop.eup %6515 }
 0x636   : > { %v4892_v51 = vmul.f32 %v6516_v36, %v8738_v39  ;;  %v6518_v53 = vpop.eup %6517 }
 0x637   : > { %v4750_v60 = vpop.xlane.xlu0 %4749  ;;  %v4889_v47 = vmul.f32 %v6518_v53, %v8741_v37 }
 0x638   : > { %v5704_v21 = vpack.c.bf16 %v4892_v51, %v4891_v40  ;;  %v4756_v38 = vpop.xlane.xlu1 %4755 }
 0x639   : > { %v6520_v3 = vpop.eup %6519  ;;  %6523 = vrcp.f32 %v4756_v38 }
 0x63a   : > { %5768 = vst [vmem:[%s8770_s20 + $0xb8] sm:$0xff] %v5704_v21   ;;  %v4890_v9 = vmul.f32 %v6520_v3, %v8745_v4  ;;  %6525 = vrcp.f32 %v4750_v60  ;;  %v8965_v4 = vld [vmem:[#allocation14_spill] sm:$0xff] }
 0x63c   : > { %v5699_v30 = vpack.c.bf16 %v4890_v9, %v4889_v47  ;;  %v4752_v15 = vpop.xlane.xlu1 %4751 }
 0x63d   : > { %6527 = vrcp.f32 %v4752_v15 }
 0x63e   : > { %5767 = vst [vmem:[%s8770_s20 + $0xb0] sm:$0xff] %v5699_v30  }
 0x641   : > { %v6522_v5 = vpop.eup %6521 }
 0x642   : > { %v4895_v34 = vmul.f32 %v6522_v5, %v8749_v31 }
 0x646   : > { %v6524_v39 = vpop.eup %6523 }
 0x647   : > { %v4896_v10 = vmul.f32 %v6524_v39, %v8755_v54  ;;  %v6526_v6 = vpop.eup %6525 }
 0x648   : > { %v4762_v63 = vpop.xlane.xlu0 %4761  ;;  %v4893_v37 = vmul.f32 %v6526_v6, %v8752_v50 }
 0x649   : > { %v5714_v58 = vpack.c.bf16 %v4896_v10, %v4895_v34  ;;  %6529 = vrcp.f32 %v4762_v63 }
 0x64a   : > { %v6528_v33 = vpop.eup %6527 }
 0x64b   : > { %5770 = vst [vmem:[%s8770_s20 + $0xc8] sm:$0xff] %v5714_v58   ;;  %v4894_v45 = vmul.f32 %v6528_v33, %v8965_v4 }
 0x64c   : > { %v4764_v46 = vpop.xlane.xlu1 %4763 }
 0x64d   : > { %v5709_v42 = vpack.c.bf16 %v4894_v45, %v4893_v37  ;;  %6531 = vrcp.f32 %v4764_v46 }
 0x64f   : > { %5769 = vst [vmem:[%s8770_s20 + $0xc0] sm:$0xff] %v5709_v42  }
 0x651   : > { %v4758_v23 = vpop.xlane.xlu0 %4757 }
 0x652   : > { %6533 = vrcp.f32 %v4758_v23 }
 0x654   : > { %v4760_v31 = vpop.xlane.xlu1 %4759 }
 0x655   : > { %6535 = vrcp.f32 %v4760_v31 }
 0x656   : > { %v6530_v54 = vpop.eup %6529 }
 0x657   : > { %v4899_v17 = vmul.f32 %v6530_v54, %v8780_v56 }
 0x65a   : > { %v6532_v52 = vpop.eup %6531 }
 0x65b   : > { %v4900_v55 = vmul.f32 %v6532_v52, %v8784_v20 }
 0x65d   : > { %v5724_v50 = vpack.c.bf16 %v4900_v55, %v4899_v17 }
 0x65f   : > { %5772 = vst [vmem:[%s8770_s20 + $0xd8] sm:$0xff] %v5724_v50   ;;  %v6534_v44 = vpop.eup %6533 }
 0x660   : > { %v4897_v32 = vmul.f32 %v6534_v44, %v8790_v28 }
 0x661   : > { %v4770_v14 = vpop.xlane.xlu0 %4769 }
 0x662   : > { %v6536_v57 = vpop.eup %6535  ;;  %6537 = vrcp.f32 %v4770_v14 }
 0x663   : > { %v4898_v22 = vmul.f32 %v6536_v57, %v8795_v25 }
 0x664   : > { %v4772_v2 = vpop.xlane.xlu1 %4771 }
 0x665   : > { %v5719_v24 = vpack.c.bf16 %v4898_v22, %v4897_v32  ;;  %6539 = vrcp.f32 %v4772_v2 }
 0x667   : > { %5771 = vst [vmem:[%s8770_s20 + $0xd0] sm:$0xff] %v5719_v24  }
 0x669   : > { %v4766_v43 = vpop.xlane.xlu0 %4765 }
 0x66a   : > { %6541 = vrcp.f32 %v4766_v43 }
 0x66c   : > { %v4768_v56 = vpop.xlane.xlu1 %4767 }
 0x66d   : > { %6543 = vrcp.f32 %v4768_v56 }
 0x66f   : > { %v6538_v20 = vpop.eup %6537 }
 0x670   : > { %v4903_v1 = vmul.f32 %v6538_v20, %v8808_v61 }
 0x672   : > { %v6540_v26 = vpop.eup %6539 }
 0x673   : > { %v4904_v19 = vmul.f32 %v6540_v26, %v8812_v11 }
 0x675   : > { %v5734_v28 = vpack.c.bf16 %v4904_v19, %v4903_v1 }
 0x677   : > { %5774 = vst [vmem:[%s8770_s20 + $0xe8] sm:$0xff] %v5734_v28   ;;  %v6542_v41 = vpop.eup %6541 }
 0x678   : > { %v4901_v59 = vmul.f32 %v6542_v41, %v8819_v62 }
 0x679   : > { %v4774_v25 = vpop.xlane.xlu0 %4773 }
 0x67a   : > { %v6544_v8 = vpop.eup %6543  ;;  %6545 = vrcp.f32 %v4774_v25 }
 0x67b   : > { %v4902_v0 = vmul.f32 %v6544_v8, %v8825_v16 }
 0x67c   : > { %v4776_v27 = vpop.xlane.xlu1 %4775 }
 0x67d   : > { %v5729_v49 = vpack.c.bf16 %v4902_v0, %v4901_v59  ;;  %6547 = vrcp.f32 %v4776_v27  ;;  %v4778_v12 = vpop.xlane.xlu0 %4777 }
 0x67e   : > { %6549 = vrcp.f32 %v4778_v12 }
 0x67f   : > { %5773 = vst [vmem:[%s8770_s20 + $0xe0] sm:$0xff] %v5729_v49  }
 0x680   : > { %v4780_v61 = vpop.xlane.xlu1 %4779 }
 0x681   : > { %6551 = vrcp.f32 %v4780_v61 }
 0x687   : > { %v6546_v11 = vpop.eup %6545 }
 0x688   : > { %v4905_v29 = vmul.f32 %v6546_v11, %v8834_v13 }
 0x68a   : > { %v6548_v35 = vpop.eup %6547 }
 0x68b   : > { %v4906_v36 = vmul.f32 %v6548_v35, %v8839_v7  ;;  %v6550_v62 = vpop.eup %6549 }
 0x68c   : > { %v4907_v51 = vmul.f32 %v6550_v62, %v8836_v48 }
 0x68d   : > { %v5739_v40 = vpack.c.bf16 %v4906_v36, %v4905_v29 }
 0x68e   : > { %v6552_v16 = vpop.eup %6551 }
 0x68f   : > { %5775 = vst [vmem:[%s8770_s20 + $0xf0] sm:$0xff] %v5739_v40   ;;  %v4908_v53 = vmul.f32 %v6552_v16, %v8845_v18 }
 0x691   : > { %v5744_v21 = vpack.c.bf16 %v4908_v53, %v4907_v51 }
 0x693   : > { %5776 = vst [vmem:[%s8770_s20 + $0xf8] sm:$0xff] %v5744_v21  }
 0x694 PF: > { %s21_s17 = sadd.s32 1, %s6559_s17  }
 0x695   : > { %p18_p4 = scmp.ge.s32.totalorder %s21_s17, 4  }
 0x697   :  { %20 = sbr.rel (!%p18_p4) target bundleno = 1 (0x1), region = 94 }

</bundles_post_ra>
